<compile_context>
chip_gen: v6e
topology: v6e:2x2x1
jax: 0.10.0
libtpu: 0.0.40
codegen_flags: <defaults>
</compile_context>

<pallas_src>
import functools

import numpy as np
import jax
import jax.numpy as jnp
from jax.experimental import pallas as pl
from jax.experimental.pallas import tpu as pltpu

_LEAKY_SLOPE = 0.01   # torch.nn.LeakyReLU() default negative_slope
_ROW_CHUNK = 256      # batch-tile granularity (multiple of the 8-row sublane)


def _round_up(x: int, m: int) -> int:
    return (x + m - 1) // m * m


def _pick_tile_m(count: int, desired: int) -> int:
    """Pick the batch tile: as large as `desired`, but keep >= 2 grid steps when
    possible so both v7x TensorCores get work under dimension_semantics=('parallel',)."""
    desired = max(_ROW_CHUNK, _round_up(desired, _ROW_CHUNK))
    n_chunks = (max(count, 1) + _ROW_CHUNK - 1) // _ROW_CHUNK
    if n_chunks >= 2:
        chunks = min(desired // _ROW_CHUNK, max(1, n_chunks // 2))
    else:
        chunks = 1
    return _ROW_CHUNK * chunks


def _vae_decoder_kernel(layout,
                        z_ref,
                        w1_ref, b1_ref,
                        w2t_ref, w2b_ref, b2_ref,
                        w3a_ref, w3b_ref, w3c_ref, b3_ref,
                        out_ref):
    """Residual-MLP decoder + MultiActivationHead for one batch tile.

    The residual concat is never materialised:
        cat([h, x], -1) @ W  ==  h @ W_top + x @ W_bot
    with the weight split done once in the wrapper.  Matmuls are bf16 with f32
    accumulation; elementwise math is f32.
    """
    z_bf = z_ref[...]                                             # (tile_m, E_pad) bf16

    # ---- residual MLP decoder (2 hidden residual layers + final linear) ----------
    h1 = jnp.dot(z_bf, w1_ref[...], preferred_element_type=jnp.float32) + b1_ref[...]
    h1 = jnp.where(h1 > 0, h1, _LEAKY_SLOPE * h1)
    h1_bf = h1.astype(jnp.bfloat16)

    h2 = (jnp.dot(h1_bf, w2t_ref[...], preferred_element_type=jnp.float32)
          + jnp.dot(z_bf, w2b_ref[...], preferred_element_type=jnp.float32)
          + b2_ref[...])
    h2 = jnp.where(h2 > 0, h2, _LEAKY_SLOPE * h2)
    h2_bf = h2.astype(jnp.bfloat16)

    logits = (jnp.dot(h2_bf, w3a_ref[...], preferred_element_type=jnp.float32)
              + jnp.dot(h1_bf, w3b_ref[...], preferred_element_type=jnp.float32)
              + jnp.dot(z_bf, w3c_ref[...], preferred_element_type=jnp.float32)
              + b3_ref[...])                                       # (tile_m, F_pad) f32

    # ---- MultiActivationHead (tanh = continuous, softmax = discrete) -------------
    # All ops are full-width with static iota-based lane masks; the result is written
    # with ONE unmasked lane-dense store (no zero-init pass, no masked partial stores).
    lane = jax.lax.broadcasted_iota(jnp.int32, logits.shape, 1)
    out = jnp.tanh(logits)                 # continuous default; softmax lanes patched below
    off = 0
    for kind, width in layout:             # static layout -> unrolled at trace time
        if kind == "softmax":
            in_blk = (lane >= off) & (lane < off + width)
            blk = jnp.where(in_blk, logits, -1e30)                 # mask out-of-block lanes
            m = jnp.max(blk, axis=-1, keepdims=True)
            e = jnp.exp(blk - m)                                   # masked lanes underflow to 0
            s = jnp.sum(e, axis=-1, keepdims=True)
            out = jnp.where(in_blk, e * (1.0 / s), out)
        off += width
    out = jnp.where(lane < off, out, 0.0)                          # zero the padded tail lanes
    out_ref[...] = out.astype(out_ref.dtype)                       # single full-width store


def make_tabular_vae_forward(params, layout, *, tile_m=1024, out_dtype=jnp.float32):
    """Build forward(count, seed) for the TabularVAE decoder.

    params: real (unpadded) decoder weights, matching the synthcity MLP with
      n_layers_hidden=2, residual=True:
        W1 (E, H), b1 (H)            -- ResidualLayer(E, H)
        W2 (H+E, H+E), b2 (H+E)      -- ResidualLayer(H+E, H+E)
        W3 (2(H+E), F), b3 (F)       -- final nn.Linear
    layout: tuple of ("tanh", width) / ("softmax", width) feature blocks (sum = F).
    out_dtype: jnp.float32 (default) or jnp.bfloat16 to halve HBM writeback (v5e win).
    """
    W1, b1 = params["W1"], params["b1"]
    W2, b2 = params["W2"], params["b2"]
    W3, b3 = params["W3"], params["b3"]

    E, H = W1.shape                      # n_units_embedding, decoder_n_units_hidden
    H1 = H + E                           # width of cat([h1, z])
    assert W2.shape == (H1, H1), W2.shape
    assert W3.shape[0] == 2 * H1, W3.shape
    F = W3.shape[1]
    assert F == sum(w for _, w in layout)

    E_pad = _round_up(E, 128)
    H_pad = _round_up(H, 128)
    H2_pad = _round_up(H1, 128)          # h2 has width H1
    F_pad = _round_up(F, 128)

    def pad2(w, rows, cols, dtype):
        buf = jnp.zeros((rows, cols), jnp.float32)
        buf = buf.at[: w.shape[0], : w.shape[1]].set(w.astype(jnp.float32))
        return buf.astype(dtype)

    # Pre-split weights that consume a residual concat (torch.cat([out, x], -1)):
    #   layer-2 input = [h1 (H), z (E)]           -> W2 rows [0:H] | [H:H+E]
    #   final  input  = [h2 (H1), h1 (H), z (E)]  -> W3 rows [0:H1] | [H1:H1+H] | [H1+H:]
    W2_top, W2_bot = W2[:H, :], W2[H:, :]
    W3_a, W3_b, W3_c = W3[:H1, :], W3[H1:H1 + H, :], W3[H1 + H:, :]

    bf = jnp.bfloat16
    weights = (
        pad2(W1, E_pad, H_pad, bf),
        pad2(b1[None, :], 1, H_pad, jnp.float32),
        pad2(W2_top, H_pad, H2_pad, bf),
        pad2(W2_bot, E_pad, H2_pad, bf),
        pad2(b2[None, :], 1, H2_pad, jnp.float32),
        pad2(W3_a, H2_pad, F_pad, bf),
        pad2(W3_b, H_pad, F_pad, bf),
        pad2(W3_c, E_pad, F_pad, bf),
        pad2(b3[None, :], 1, F_pad, jnp.float32),
    )
    weight_bytes = sum(int(w.size) * w.dtype.itemsize for w in weights)
    out_itemsize = np.dtype(out_dtype).itemsize

    kernel = functools.partial(_vae_decoder_kernel, tuple(layout))

    def forward(count, seed=0):
        count = int(count)
        tile = _pick_tile_m(count, tile_m)
        count_pad = _round_up(max(count, 1), tile)
        grid = (count_pad // tile,)

        # Latent sampling z ~ N(0, I) is done wrapper-side (plain XLA on the TPU) and
        # streamed to the kernel as a bf16 lane-padded slab.
        # TODO(synk): distributionally equivalent to torch.normal but not bit-identical
        # to the PyTorch RNG stream of VAE.forward (which samples in batch_size chunks
        # and trims to `count`; here we sample count_pad rows and trim).
        key = jax.random.PRNGKey(seed)
        z = jax.random.normal(key, (count_pad, E), jnp.float32)
        z_pad = jnp.zeros((count_pad, E_pad), jnp.float32).at[:, :E].set(z)
        z_bf = z_pad.astype(jnp.bfloat16)

        # VMEM budget: double-buffered z/out streams + double-buffered resident weights
        # + headroom for h1/h2/logits/head temporaries.  Comfortably below every
        # generation's limit (incl. v7x's 64 MiB).
        io_bytes = tile * (E_pad * 2 + F_pad * out_itemsize)
        scratch_bytes = 8 * tile * 128 * 4
        vmem_limit = 2 * weight_bytes + 2 * io_bytes + scratch_bytes + (4 << 20)
        vmem_limit = int(min(max(vmem_limit, 16 << 20), 40 << 20))

        def resident(w):   # weight stays in VMEM: same block for every grid step
            return pl.BlockSpec(w.shape, lambda i: (0, 0))

        call = pl.pallas_call(
            kernel,
            out_shape=jax.ShapeDtypeStruct((count_pad, F_pad), out_dtype),
            grid_spec=pltpu.PrefetchScalarGridSpec(
                num_scalar_prefetch=0,
                grid=grid,
                in_specs=[pl.BlockSpec((tile, E_pad), lambda i: (i, 0))]
                         + [resident(w) for w in weights],
                out_specs=pl.BlockSpec((tile, F_pad), lambda i: (i, 0)),
            ),
            compiler_params=pltpu.CompilerParams(
                dimension_semantics=("parallel",),   # megacore-shard the batch axis
                vmem_limit_bytes=vmem_limit,
            ),
        )
        out_pad = call(z_bf, *weights)
        return out_pad[:count, :F], z_pad[:count, :E], (out_pad, z_pad)

    return forward, weights


def reference_decoder(z_pad, weights, layout):
    """Pure-JAX reference with the same bf16-matmul / f32-accumulate precision."""
    w1, b1, w2t, w2b, b2, w3a, w3b, w3c, b3 = weights
    z_bf = z_pad.astype(jnp.bfloat16)
    h1 = jnp.dot(z_bf, w1, preferred_element_type=jnp.float32) + b1
    h1 = jnp.where(h1 > 0, h1, _LEAKY_SLOPE * h1)
    h1_bf = h1.astype(jnp.bfloat16)
    h2 = (jnp.dot(h1_bf, w2t, preferred_element_type=jnp.float32)
          + jnp.dot(z_bf, w2b, preferred_element_type=jnp.float32) + b2)
    h2 = jnp.where(h2 > 0, h2, _LEAKY_SLOPE * h2)
    h2_bf = h2.astype(jnp.bfloat16)
    logits = (jnp.dot(h2_bf, w3a, preferred_element_type=jnp.float32)
              + jnp.dot(h1_bf, w3b, preferred_element_type=jnp.float32)
              + jnp.dot(z_bf, w3c, preferred_element_type=jnp.float32) + b3)
    cols, off = [], 0
    for kind, width in layout:
        blk = logits[:, off:off + width]
        cols.append(jax.nn.softmax(blk, axis=-1) if kind == "softmax" else jnp.tanh(blk))
        off += width
    return jnp.concatenate(cols, axis=-1)


if __name__ == "__main__":
    key = jax.random.PRNGKey(0)

    # Small TabularVAE-consistent configuration:
    #   n_units_embedding=32, decoder_n_layers_hidden=2, decoder_n_units_hidden=96,
    #   encoded feature layout mixing continuous (tanh) and discrete (softmax) blocks.
    E, H = 32, 96
    layout = (("tanh", 1), ("softmax", 5), ("tanh", 1),
              ("softmax", 7), ("softmax", 3), ("tanh", 1))
    F = sum(w for _, w in layout)        # 18 encoded feature columns
    H1 = H + E

    k = jax.random.split(key, 6)
    s = 0.1
    params = {
        "W1": s * jax.random.normal(k[0], (E, H), jnp.float32),
        "b1": s * jax.random.normal(k[1], (H,), jnp.float32),
        "W2": s * jax.random.normal(k[2], (H1, H1), jnp.float32),
        "b2": s * jax.random.normal(k[3], (H1,), jnp.float32),
        "W3": s * jax.random.normal(k[4], (2 * H1, F), jnp.float32),
        "b3": s * jax.random.normal(k[5], (F,), jnp.float32),
    }

    forward, padded_weights = make_tabular_vae_forward(params, layout, tile_m=1024)

    count = 300                          # TabularVAE.forward(count)
    out, z, (out_pad, z_pad) = forward(count, seed=0)
    out = jax.block_until_ready(out)

    assert out.shape == (count, F), out.shape
    assert z.shape == (count, E), z.shape
    assert bool(jnp.all(jnp.isfinite(out)))

    # Numerical check against a pure-JAX reference driven by the same z.
    ref = reference_decoder(z_pad, padded_weights, layout)[:count]
    max_err = float(jnp.max(jnp.abs(out - ref)))
    assert max_err < 1e-2, f"max abs error vs reference: {max_err}"

    # Discrete (softmax) blocks should be valid simplexes.
    off = 0
    for kind, width in layout:
        if kind == "softmax":
            sums = jnp.sum(out[:, off:off + width], axis=-1)
            assert float(jnp.max(jnp.abs(sums - 1.0))) < 1e-3
        off += width

    print("KERNEL_OK")
</pallas_src>

<mosaic_0001>
module attributes {stable_mosaic.version = 11 : i64} {
  func.func @_vae_decoder_kernel(%arg0: i32, %arg1: memref<256x128xbf16, #tpu.memory_space<vmem>>, %arg2: memref<128x128xbf16, #tpu.memory_space<vmem>>, %arg3: memref<1x128xf32, #tpu.memory_space<vmem>>, %arg4: memref<128x128xbf16, #tpu.memory_space<vmem>>, %arg5: memref<128x128xbf16, #tpu.memory_space<vmem>>, %arg6: memref<1x128xf32, #tpu.memory_space<vmem>>, %arg7: memref<128x128xbf16, #tpu.memory_space<vmem>>, %arg8: memref<128x128xbf16, #tpu.memory_space<vmem>>, %arg9: memref<128x128xbf16, #tpu.memory_space<vmem>>, %arg10: memref<1x128xf32, #tpu.memory_space<vmem>>, %arg11: memref<256x128xf32, #tpu.memory_space<vmem>>) attributes {dimension_semantics = [#tpu.dimension_semantics<parallel>], iteration_bounds = array<i64: 2>, scalar_prefetch = 0 : i64, scratch_operands = 0 : i64, tpu.core_type = #tpu.core_type<tc>, window_params = [{transform_indices = @transform_0, window_bounds = array<i64: 256, 128>}, {pipeline_mode = #tpu.pipeline_mode<synchronous>, transform_indices = @transform_1, window_bounds = array<i64: 128, 128>}, {pipeline_mode = #tpu.pipeline_mode<synchronous>, transform_indices = @transform_2, window_bounds = array<i64: 1, 128>}, {pipeline_mode = #tpu.pipeline_mode<synchronous>, transform_indices = @transform_3, window_bounds = array<i64: 128, 128>}, {pipeline_mode = #tpu.pipeline_mode<synchronous>, transform_indices = @transform_4, window_bounds = array<i64: 128, 128>}, {pipeline_mode = #tpu.pipeline_mode<synchronous>, transform_indices = @transform_5, window_bounds = array<i64: 1, 128>}, {pipeline_mode = #tpu.pipeline_mode<synchronous>, transform_indices = @transform_6, window_bounds = array<i64: 128, 128>}, {pipeline_mode = #tpu.pipeline_mode<synchronous>, transform_indices = @transform_7, window_bounds = array<i64: 128, 128>}, {pipeline_mode = #tpu.pipeline_mode<synchronous>, transform_indices = @transform_8, window_bounds = array<i64: 128, 128>}, {pipeline_mode = #tpu.pipeline_mode<synchronous>, transform_indices = @transform_9, window_bounds = array<i64: 1, 128>}, {transform_indices = @transform_10, window_bounds = array<i64: 256, 128>}]} {
    %c0 = arith.constant 0 : index
    %c0_0 = arith.constant 0 : index
    %0 = vector.load %arg1[%c0, %c0_0] : memref<256x128xbf16, #tpu.memory_space<vmem>>, vector<256x128xbf16>
    %c0_1 = arith.constant 0 : index
    %c0_2 = arith.constant 0 : index
    %1 = vector.load %arg2[%c0_1, %c0_2] : memref<128x128xbf16, #tpu.memory_space<vmem>>, vector<128x128xbf16>
    %cst = arith.constant dense<0.000000e+00> : vector<256x128xf32>
    %2 = tpu.matmul %0, %1, %cst {dimension_numbers = #tpu.dot_dimension_numbers<[1], [0], [0], [1], [0, 0, 1, 1], [], []>} : vector<256x128xbf16>, vector<128x128xbf16>, vector<256x128xf32> -> vector<256x128xf32>
    %c0_3 = arith.constant 0 : index
    %c0_4 = arith.constant 0 : index
    %3 = vector.load %arg3[%c0_3, %c0_4] : memref<1x128xf32, #tpu.memory_space<vmem>>, vector<1x128xf32>
    %4 = vector.broadcast %3 : vector<1x128xf32> to vector<256x128xf32>
    %5 = arith.addf %2, %4 : vector<256x128xf32>
    %cst_5 = arith.constant 0.000000e+00 : f32
    %6 = vector.broadcast %cst_5 : f32 to vector<256x128xf32>
    %7 = arith.cmpf ogt, %5, %6 : vector<256x128xf32>
    %cst_6 = arith.constant 0.00999999977 : f32
    %8 = vector.broadcast %cst_6 : f32 to vector<256x128xf32>
    %9 = arith.mulf %8, %5 : vector<256x128xf32>
    %10 = arith.select %7, %5, %9 : vector<256x128xi1>, vector<256x128xf32>
    %11 = arith.truncf %10 : vector<256x128xf32> to vector<256x128xbf16>
    %c0_7 = arith.constant 0 : index
    %c0_8 = arith.constant 0 : index
    %12 = vector.load %arg4[%c0_7, %c0_8] : memref<128x128xbf16, #tpu.memory_space<vmem>>, vector<128x128xbf16>
    %cst_9 = arith.constant dense<0.000000e+00> : vector<256x128xf32>
    %13 = tpu.matmul %11, %12, %cst_9 {dimension_numbers = #tpu.dot_dimension_numbers<[1], [0], [0], [1], [0, 0, 1, 1], [], []>} : vector<256x128xbf16>, vector<128x128xbf16>, vector<256x128xf32> -> vector<256x128xf32>
    %c0_10 = arith.constant 0 : index
    %c0_11 = arith.constant 0 : index
    %14 = vector.load %arg5[%c0_10, %c0_11] : memref<128x128xbf16, #tpu.memory_space<vmem>>, vector<128x128xbf16>
    %cst_12 = arith.constant dense<0.000000e+00> : vector<256x128xf32>
    %15 = tpu.matmul %0, %14, %cst_12 {dimension_numbers = #tpu.dot_dimension_numbers<[1], [0], [0], [1], [0, 0, 1, 1], [], []>} : vector<256x128xbf16>, vector<128x128xbf16>, vector<256x128xf32> -> vector<256x128xf32>
    %16 = arith.addf %13, %15 : vector<256x128xf32>
    %c0_13 = arith.constant 0 : index
    %c0_14 = arith.constant 0 : index
    %17 = vector.load %arg6[%c0_13, %c0_14] : memref<1x128xf32, #tpu.memory_space<vmem>>, vector<1x128xf32>
    %18 = vector.broadcast %17 : vector<1x128xf32> to vector<256x128xf32>
    %19 = arith.addf %16, %18 : vector<256x128xf32>
    %cst_15 = arith.constant 0.000000e+00 : f32
    %20 = vector.broadcast %cst_15 : f32 to vector<256x128xf32>
    %21 = arith.cmpf ogt, %19, %20 : vector<256x128xf32>
    %cst_16 = arith.constant 0.00999999977 : f32
    %22 = vector.broadcast %cst_16 : f32 to vector<256x128xf32>
    %23 = arith.mulf %22, %19 : vector<256x128xf32>
    %24 = arith.select %21, %19, %23 : vector<256x128xi1>, vector<256x128xf32>
    %25 = arith.truncf %24 : vector<256x128xf32> to vector<256x128xbf16>
    %c0_17 = arith.constant 0 : index
    %c0_18 = arith.constant 0 : index
    %26 = vector.load %arg7[%c0_17, %c0_18] : memref<128x128xbf16, #tpu.memory_space<vmem>>, vector<128x128xbf16>
    %cst_19 = arith.constant dense<0.000000e+00> : vector<256x128xf32>
    %27 = tpu.matmul %25, %26, %cst_19 {dimension_numbers = #tpu.dot_dimension_numbers<[1], [0], [0], [1], [0, 0, 1, 1], [], []>} : vector<256x128xbf16>, vector<128x128xbf16>, vector<256x128xf32> -> vector<256x128xf32>
    %c0_20 = arith.constant 0 : index
    %c0_21 = arith.constant 0 : index
    %28 = vector.load %arg8[%c0_20, %c0_21] : memref<128x128xbf16, #tpu.memory_space<vmem>>, vector<128x128xbf16>
    %cst_22 = arith.constant dense<0.000000e+00> : vector<256x128xf32>
    %29 = tpu.matmul %11, %28, %cst_22 {dimension_numbers = #tpu.dot_dimension_numbers<[1], [0], [0], [1], [0, 0, 1, 1], [], []>} : vector<256x128xbf16>, vector<128x128xbf16>, vector<256x128xf32> -> vector<256x128xf32>
    %30 = arith.addf %27, %29 : vector<256x128xf32>
    %c0_23 = arith.constant 0 : index
    %c0_24 = arith.constant 0 : index
    %31 = vector.load %arg9[%c0_23, %c0_24] : memref<128x128xbf16, #tpu.memory_space<vmem>>, vector<128x128xbf16>
    %cst_25 = arith.constant dense<0.000000e+00> : vector<256x128xf32>
    %32 = tpu.matmul %0, %31, %cst_25 {dimension_numbers = #tpu.dot_dimension_numbers<[1], [0], [0], [1], [0, 0, 1, 1], [], []>} : vector<256x128xbf16>, vector<128x128xbf16>, vector<256x128xf32> -> vector<256x128xf32>
    %33 = arith.addf %30, %32 : vector<256x128xf32>
    %c0_26 = arith.constant 0 : index
    %c0_27 = arith.constant 0 : index
    %34 = vector.load %arg10[%c0_26, %c0_27] : memref<1x128xf32, #tpu.memory_space<vmem>>, vector<1x128xf32>
    %35 = vector.broadcast %34 : vector<1x128xf32> to vector<256x128xf32>
    %36 = arith.addf %33, %35 : vector<256x128xf32>
    %37 = tpu.iota {dimensions = array<i32: 1>} : vector<256x128xi32>
    %38 = math.tanh %36 : vector<256x128xf32>
    %c1_i32 = arith.constant 1 : i32
    %39 = vector.broadcast %c1_i32 : i32 to vector<256x128xi32>
    %40 = arith.cmpi sge, %37, %39 : vector<256x128xi32>
    %c6_i32 = arith.constant 6 : i32
    %41 = vector.broadcast %c6_i32 : i32 to vector<256x128xi32>
    %42 = arith.cmpi slt, %37, %41 : vector<256x128xi32>
    %43 = arith.andi %40, %42 : vector<256x128xi1>
    %cst_28 = arith.constant -1.000000e+30 : f32
    %44 = vector.broadcast %cst_28 : f32 to vector<256x128xf32>
    %45 = arith.select %43, %36, %44 : vector<256x128xi1>, vector<256x128xf32>
    %cst_29 = arith.constant dense<0xFF800000> : vector<256xf32>
    %46 = vector.multi_reduction <maximumf>, %45, %cst_29 [1] : vector<256x128xf32> to vector<256xf32>
    %47 = vector.shape_cast %46 : vector<256xf32> to vector<256x1xf32>
    %48 = vector.broadcast %47 : vector<256x1xf32> to vector<256x128xf32>
    %49 = arith.subf %45, %48 : vector<256x128xf32>
    %50 = math.exp %49 : vector<256x128xf32>
    %cst_30 = arith.constant dense<0.000000e+00> : vector<256xf32>
    %51 = vector.multi_reduction <add>, %50, %cst_30 [1] : vector<256x128xf32> to vector<256xf32>
    %52 = vector.shape_cast %51 : vector<256xf32> to vector<256x1xf32>
    %cst_31 = arith.constant 1.000000e+00 : f32
    %53 = vector.broadcast %cst_31 : f32 to vector<256x1xf32>
    %54 = arith.divf %53, %52 : vector<256x1xf32>
    %55 = vector.broadcast %54 : vector<256x1xf32> to vector<256x128xf32>
    %56 = arith.mulf %50, %55 : vector<256x128xf32>
    %57 = arith.select %43, %56, %38 : vector<256x128xi1>, vector<256x128xf32>
    %c7_i32 = arith.constant 7 : i32
    %58 = vector.broadcast %c7_i32 : i32 to vector<256x128xi32>
    %59 = arith.cmpi sge, %37, %58 : vector<256x128xi32>
    %c14_i32 = arith.constant 14 : i32
    %60 = vector.broadcast %c14_i32 : i32 to vector<256x128xi32>
    %61 = arith.cmpi slt, %37, %60 : vector<256x128xi32>
    %62 = arith.andi %59, %61 : vector<256x128xi1>
    %cst_32 = arith.constant -1.000000e+30 : f32
    %63 = vector.broadcast %cst_32 : f32 to vector<256x128xf32>
    %64 = arith.select %62, %36, %63 : vector<256x128xi1>, vector<256x128xf32>
    %cst_33 = arith.constant dense<0xFF800000> : vector<256xf32>
    %65 = vector.multi_reduction <maximumf>, %64, %cst_33 [1] : vector<256x128xf32> to vector<256xf32>
    %66 = vector.shape_cast %65 : vector<256xf32> to vector<256x1xf32>
    %67 = vector.broadcast %66 : vector<256x1xf32> to vector<256x128xf32>
    %68 = arith.subf %64, %67 : vector<256x128xf32>
    %69 = math.exp %68 : vector<256x128xf32>
    %cst_34 = arith.constant dense<0.000000e+00> : vector<256xf32>
    %70 = vector.multi_reduction <add>, %69, %cst_34 [1] : vector<256x128xf32> to vector<256xf32>
    %71 = vector.shape_cast %70 : vector<256xf32> to vector<256x1xf32>
    %cst_35 = arith.constant 1.000000e+00 : f32
    %72 = vector.broadcast %cst_35 : f32 to vector<256x1xf32>
    %73 = arith.divf %72, %71 : vector<256x1xf32>
    %74 = vector.broadcast %73 : vector<256x1xf32> to vector<256x128xf32>
    %75 = arith.mulf %69, %74 : vector<256x128xf32>
    %76 = arith.select %62, %75, %57 : vector<256x128xi1>, vector<256x128xf32>
    %c14_i32_36 = arith.constant 14 : i32
    %77 = vector.broadcast %c14_i32_36 : i32 to vector<256x128xi32>
    %78 = arith.cmpi sge, %37, %77 : vector<256x128xi32>
    %c17_i32 = arith.constant 17 : i32
    %79 = vector.broadcast %c17_i32 : i32 to vector<256x128xi32>
    %80 = arith.cmpi slt, %37, %79 : vector<256x128xi32>
    %81 = arith.andi %78, %80 : vector<256x128xi1>
    %cst_37 = arith.constant -1.000000e+30 : f32
    %82 = vector.broadcast %cst_37 : f32 to vector<256x128xf32>
    %83 = arith.select %81, %36, %82 : vector<256x128xi1>, vector<256x128xf32>
    %cst_38 = arith.constant dense<0xFF800000> : vector<256xf32>
    %84 = vector.multi_reduction <maximumf>, %83, %cst_38 [1] : vector<256x128xf32> to vector<256xf32>
    %85 = vector.shape_cast %84 : vector<256xf32> to vector<256x1xf32>
    %86 = vector.broadcast %85 : vector<256x1xf32> to vector<256x128xf32>
    %87 = arith.subf %83, %86 : vector<256x128xf32>
    %88 = math.exp %87 : vector<256x128xf32>
    %cst_39 = arith.constant dense<0.000000e+00> : vector<256xf32>
    %89 = vector.multi_reduction <add>, %88, %cst_39 [1] : vector<256x128xf32> to vector<256xf32>
    %90 = vector.shape_cast %89 : vector<256xf32> to vector<256x1xf32>
    %cst_40 = arith.constant 1.000000e+00 : f32
    %91 = vector.broadcast %cst_40 : f32 to vector<256x1xf32>
    %92 = arith.divf %91, %90 : vector<256x1xf32>
    %93 = vector.broadcast %92 : vector<256x1xf32> to vector<256x128xf32>
    %94 = arith.mulf %88, %93 : vector<256x128xf32>
    %95 = arith.select %81, %94, %76 : vector<256x128xi1>, vector<256x128xf32>
    %c18_i32 = arith.constant 18 : i32
    %96 = vector.broadcast %c18_i32 : i32 to vector<256x128xi32>
    %97 = arith.cmpi slt, %37, %96 : vector<256x128xi32>
    %cst_41 = arith.constant 0.000000e+00 : f32
    %98 = vector.broadcast %cst_41 : f32 to vector<256x128xf32>
    %99 = arith.select %97, %95, %98 : vector<256x128xi1>, vector<256x128xf32>
    %c0_42 = arith.constant 0 : index
    %c0_43 = arith.constant 0 : index
    %100 = vector.load %arg11[%c0_42, %c0_43] : memref<256x128xf32, #tpu.memory_space<vmem>>, vector<256x128xf32>
    tpu.vector_store %arg11[%c0_42, %c0_43], %99 {strides = array<i32>} : memref<256x128xf32, #tpu.memory_space<vmem>>, vector<256x128xf32>,
    return
  }
  func.func @transform_0(%arg0: i32) -> (i32, i32) {
    %c0_i32 = arith.constant 0 : i32
    %c0_i32_0 = arith.constant 0 : i32
    return %arg0, %c0_i32 : i32, i32
  }
  func.func @transform_1(%arg0: i32) -> (i32, i32) {
    %c0_i32 = arith.constant 0 : i32
    %c0_i32_0 = arith.constant 0 : i32
    %c0_i32_1 = arith.constant 0 : i32
    return %c0_i32, %c0_i32_0 : i32, i32
  }
  func.func @transform_2(%arg0: i32) -> (i32, i32) {
    %c0_i32 = arith.constant 0 : i32
    %c0_i32_0 = arith.constant 0 : i32
    %c0_i32_1 = arith.constant 0 : i32
    return %c0_i32, %c0_i32_0 : i32, i32
  }
  func.func @transform_3(%arg0: i32) -> (i32, i32) {
    %c0_i32 = arith.constant 0 : i32
    %c0_i32_0 = arith.constant 0 : i32
    %c0_i32_1 = arith.constant 0 : i32
    return %c0_i32, %c0_i32_0 : i32, i32
  }
  func.func @transform_4(%arg0: i32) -> (i32, i32) {
    %c0_i32 = arith.constant 0 : i32
    %c0_i32_0 = arith.constant 0 : i32
    %c0_i32_1 = arith.constant 0 : i32
    return %c0_i32, %c0_i32_0 : i32, i32
  }
  func.func @transform_5(%arg0: i32) -> (i32, i32) {
    %c0_i32 = arith.constant 0 : i32
    %c0_i32_0 = arith.constant 0 : i32
    %c0_i32_1 = arith.constant 0 : i32
    return %c0_i32, %c0_i32_0 : i32, i32
  }
  func.func @transform_6(%arg0: i32) -> (i32, i32) {
    %c0_i32 = arith.constant 0 : i32
    %c0_i32_0 = arith.constant 0 : i32
    %c0_i32_1 = arith.constant 0 : i32
    return %c0_i32, %c0_i32_0 : i32, i32
  }
  func.func @transform_7(%arg0: i32) -> (i32, i32) {
    %c0_i32 = arith.constant 0 : i32
    %c0_i32_0 = arith.constant 0 : i32
    %c0_i32_1 = arith.constant 0 : i32
    return %c0_i32, %c0_i32_0 : i32, i32
  }
  func.func @transform_8(%arg0: i32) -> (i32, i32) {
    %c0_i32 = arith.constant 0 : i32
    %c0_i32_0 = arith.constant 0 : i32
    %c0_i32_1 = arith.constant 0 : i32
    return %c0_i32, %c0_i32_0 : i32, i32
  }
  func.func @transform_9(%arg0: i32) -> (i32, i32) {
    %c0_i32 = arith.constant 0 : i32
    %c0_i32_0 = arith.constant 0 : i32
    %c0_i32_1 = arith.constant 0 : i32
    return %c0_i32, %c0_i32_0 : i32, i32
  }
  func.func @transform_10(%arg0: i32) -> (i32, i32) {
    %c0_i32 = arith.constant 0 : i32
    %c0_i32_0 = arith.constant 0 : i32
    return %arg0, %c0_i32 : i32, i32
  }
}

</mosaic_0001>

<bundles_post_ra>
// kernel: tpu_custom_call.1
= control target key start
LH: loop header
LB: loop body
LE: loop exit
PB: predicated region body
PF: predicated region fallthrough
CT: control target
= control target key end

     0   :  { %s7558_s0 = inlined_call_operand.hbm [shape: bf16[512,128], index: 0, kind: input, shape index: {}]   ;;  %s7559_s1 = inlined_call_operand.hbm [shape: bf16[128,128], index: 1, kind: input, shape index: {}]   ;;  %s7560_s2 = inlined_call_operand.vmem [shape: f32[1,128], index: 2, kind: input, shape index: {}]   ;;  %s7561_s3 = inlined_call_operand.hbm [shape: bf16[128,128], index: 3, kind: input, shape index: {}]   ;;  %s7562_s4 = inlined_call_operand.hbm [shape: bf16[128,128], index: 4, kind: input, shape index: {}]   ;;  %s7563_s5 = inlined_call_operand.vmem [shape: f32[1,128], index: 5, kind: input, shape index: {}]   ;;  %s7564_s6 = inlined_call_operand.hbm [shape: bf16[128,128], index: 6, kind: input, shape index: {}]   ;;  %s7565_s7 = inlined_call_operand.hbm [shape: bf16[128,128], index: 7, kind: input, shape index: {}]   ;;  %s7566_s8 = inlined_call_operand.hbm [shape: bf16[128,128], index: 8, kind: input, shape index: {}]   ;;  %s7567_s9 = inlined_call_operand.vmem [shape: f32[1,128], index: 9, kind: input, shape index: {}]   ;;  %s7568_s10 = inlined_call_operand.hbm [shape: f32[512,128], index: 10, kind: output, shape index: {}]  }
   0x1   :  { %7719 = sst [smem:[#allocation111_spill]] %s7559_s1 }
   0x2   :  { %7720 = sst [smem:[#allocation112_spill]] %s7561_s3 }
   0x3   :  { %7721 = sst [smem:[#allocation113_spill]] %s7562_s4 }
   0x4   :  { %7722 = sst [smem:[#allocation114_spill]] %s7564_s6 }
   0x5   :  { %15 = vsyncpa [#allocation3], 0 }
   0x6   :  { %17 = vsyncpa [#allocation3 + $0x1], 0 }
   0x7   :  { %18 = vsyncpa [#allocation6], 0 }
   0x8   :  { %19 = vsyncpa [#allocation9], 0 }
   0x9   :  { %20 = vsyncpa [#allocation12], 0 }
   0xa   :  { %21 = vsyncpa [#allocation4], 0 }
   0xb   :  { %23 = vsyncpa [#allocation4 + $0x1], 0  ;;  %s5170_s13 = smov 0   ;;  %s5172_s14 = smov 0  }
   0xc   :  { %s5174_s15 = smov 0   ;;  %s5176_s16 = smov 0  }
   0xd LB: > { %s5103_s17 = smov [#allocation5]   ;;  %s5191_s19 = sadd.s32 4294967295, %s5101_s16   ;;  %s5101_s16 = sphi %s5176_s16, %s8043_s16   ;;  %s5097_s15 = sphi %s5174_s15, %s8042_s15   ;;  %s5093_s14 = sphi %s5172_s14, %s8041_s14   ;;  %s5089_s13 = sphi %s5170_s13, %s8040_s13  }
   0xe   : > { %s287_s18 = sshll.u32 %s5103_s17, 4  ;;  %p3692_p0 = scmp.ge.s32.totalorder %s5101_s16, 1  ;;  %s288_s18 = int_to_ptr.vmem [resolvable:$true] %s287_s18 }
   0xf   : > { %p7571_p1 = scmp.eq.s32.totalorder %s5191_s19, 0  ;;  %p275_p2 = scmp.lt.s32.totalorder %s5101_s16, 3 }
  0x10   : > { %s5104_s21 = smov [#allocation8]   ;;  %s5105_s24 = smov [#allocation11]  }
  0x11   : > { %p5196_p3 = pnand %p3692_p0, %p275_p2  ;;  %s316_s22 = sshll.u32 %s5104_s21, 4  ;;  %s5209_s22 = int_to_ptr.vmem [resolvable:$true] %s316_s22 }
  0x12   : > { %s345_s25 = sshll.u32 %s5105_s24, 4  ;;  %s4852_s27 = scalar_lea.vmem %s288_s18, 1024  ;;  %s5211_s25 = int_to_ptr.vmem [resolvable:$true] %s345_s25 }
  0x13   : > { %s7723_s20 = scalar_select %p5196_p3, 1, 0 }
  0x14   : > { %p4246_p5 = pneg %p5196_p3  ;;  %p4853_p8 = scmp.ne.s32.totalorder %s288_s18, %s4852_s27 }
  0x15   : > { %p4860_p11 = scmp.lt.s32.totalorder %s288_s18, %s288_s18  ;;  %p4861_p12 = scmp.lt.s32.totalorder %s4852_s27, %s4852_s27 }
  0x16   : > { %p5205_p6 = pnand %p4246_p5, %p7571_p1 }
  0x17   : > { %p4862_p13 = por %p4861_p12, %p4860_p11 }
  0x18   : > { %p5215_p7 = pneg %p5205_p6 }
  0x1a   : > { %p4855_p9 = pnand %p4853_p8, %p5215_p7 }
  0x1c   : > { %p4856_p10 = pneg %p4855_p9 }
  0x1e   : > { %p4863_p0 = pnand %p4862_p13, %p4856_p10 }
  0x20   : > { %4866 = shalt.err (!%p4863_p0)
}
  0x21   : > { %s7569_s28 = smov 64   ;;  %s7570_s29 = smov 4  }
  0x22   : > { %s7726_s1 = sld [smem:[#allocation111_spill]]  ;;  %s4878_s12 = scalar_lea.vmem %s5209_s22, 1024 }
  0x23   : > { %p4879_p2 = scmp.ne.s32.totalorder %s5209_s22, %s4878_s12  ;;  %p4886_p9 = scmp.lt.s32.totalorder %s5209_s22, %s5209_s22 }
  0x24   : > { %p4887_p10 = scmp.lt.s32.totalorder %s4878_s12, %s4878_s12 }
  0x25   : > { %p4881_p5 = pnand %p4879_p2, %p5215_p7 }
  0x26   : > { %p4888_p11 = por %p4887_p10, %p4886_p9 }
  0x27   : > { %p4882_p8 = pneg %p4881_p5 }
  0x28   : > { %4249 = dma.hbm_to_vmem [thread:$0]  (!%p5205_p6), %s7726_s1, 1024, %s288_s18, [#allocation6], %s7569_s28, %s7569_s28, %s7570_s29  }
  0x29   : > { %p4889_p12 = pnand %p4888_p11, %p4882_p8 }
  0x2b   : > { %4892 = shalt.err (!%p4889_p12)
}
  0x2c   : > { %s7727_s4 = sld [smem:[#allocation113_spill]]  ;;  %s4904_s18 = scalar_lea.vmem %s5211_s25, 1024 }
  0x2d   : > { %p4905_p13 = scmp.ne.s32.totalorder %s5211_s25, %s4904_s18  ;;  %p4912_p5 = scmp.lt.s32.totalorder %s5211_s25, %s5211_s25 }
  0x2e   : > { %p4913_p8 = scmp.lt.s32.totalorder %s4904_s18, %s4904_s18 }
  0x2f   : > { %p4907_p0 = pnand %p4905_p13, %p5215_p7 }
  0x30   : > { %p4914_p9 = por %p4913_p8, %p4912_p5 }
  0x31   : > { %p4908_p2 = pneg %p4907_p0 }
  0x32   : > { %4255 = dma.hbm_to_vmem [thread:$0]  (!%p5205_p6), %s7727_s4, 1024, %s5209_s22, [#allocation9], %s7569_s28, %s7569_s28, %s7570_s29  }
  0x33   : > { %p4915_p10 = pnand %p4914_p9, %p4908_p2 }
  0x35   : > { %4918 = shalt.err (!%p4915_p10)
}
  0x36   : > { %4261 = dma.hbm_to_vmem [thread:$0]  (!%p5205_p6), %s7565_s7, 1024, %s5211_s25, [#allocation12], %s7569_s28, %s7569_s28, %s7570_s29  }
  0x37   : > { %s5108_s22 = smov [#allocation7]   ;;  %s5109_s11 = smov [#allocation10]  }
  0x38   : > { %s303_s30 = sshll.u32 %s5108_s22, 4  ;;  %s332_s12 = sshll.u32 %s5109_s11, 4  ;;  %s304_s30 = int_to_ptr.vmem [resolvable:$true] %s303_s30  ;;  %s333_s12 = int_to_ptr.vmem [resolvable:$true] %s332_s12 }
  0x39   : > { %s4930_s17 = scalar_lea.vmem %s304_s30, 1024  ;;  %p4938_p0 = scmp.lt.s32.totalorder %s304_s30, %s304_s30 }
  0x3a   : > { %p4931_p11 = scmp.ne.s32.totalorder %s304_s30, %s4930_s17  ;;  %p4939_p2 = scmp.lt.s32.totalorder %s4930_s17, %s4930_s17 }
  0x3c   : > { %p4933_p12 = pnand %p4931_p11, %p5215_p7  ;;  %p4940_p5 = por %p4939_p2, %p4938_p0 }
  0x3e   : > { %p4934_p13 = pneg %p4933_p12 }
  0x40   : > { %p4941_p8 = pnand %p4940_p5, %p4934_p13 }
  0x42   : > { %4944 = shalt.err (!%p4941_p8)
}
  0x43   : > { %s7728_s3 = sld [smem:[#allocation112_spill]]  ;;  %s4956_s18 = scalar_lea.vmem %s333_s12, 1024 }
  0x44   : > { %p4957_p9 = scmp.ne.s32.totalorder %s333_s12, %s4956_s18  ;;  %p4964_p12 = scmp.lt.s32.totalorder %s333_s12, %s333_s12 }
  0x45   : > { %p4965_p0 = scmp.lt.s32.totalorder %s4956_s18, %s4956_s18 }
  0x46   : > { %p4959_p10 = pnand %p4957_p9, %p5215_p7 }
  0x47   : > { %p4966_p13 = por %p4965_p0, %p4964_p12 }
  0x48   : > { %p4960_p11 = pneg %p4959_p10 }
  0x49   : > { %4252 = dma.hbm_to_vmem [thread:$0]  (!%p5205_p6), %s7728_s3, 1024, %s304_s30, [#allocation6], %s7569_s28, %s7569_s28, %s7570_s29  }
  0x4a   : > { %p4967_p2 = pnand %p4966_p13, %p4960_p11 }
  0x4c   : > { %4970 = shalt.err (!%p4967_p2)
}
  0x4d   : > { %s7729_s6 = sld [smem:[#allocation114_spill]]  ;;  %s5110_s22 = smov [#allocation13]  }
  0x4e   : > { %s358_s30 = sshll.u32 %s5110_s22, 4  ;;  %s359_s30 = int_to_ptr.vmem [resolvable:$true] %s358_s30 }
  0x4f   : > { %s4982_s11 = scalar_lea.vmem %s359_s30, 1024  ;;  %p4990_p10 = scmp.lt.s32.totalorder %s359_s30, %s359_s30 }
  0x50   : > { %p4983_p5 = scmp.ne.s32.totalorder %s359_s30, %s4982_s11  ;;  %p4991_p11 = scmp.lt.s32.totalorder %s4982_s11, %s4982_s11 }
  0x52   : > { %p4985_p8 = pnand %p4983_p5, %p5215_p7  ;;  %p4992_p12 = por %p4991_p11, %p4990_p10 }
  0x53   : > { %4258 = dma.hbm_to_vmem [thread:$0]  (!%p5205_p6), %s7729_s6, 1024, %s333_s12, [#allocation9], %s7569_s28, %s7569_s28, %s7570_s29  }
  0x54   : > { %p4986_p9 = pneg %p4985_p8 }
  0x56   : > { %p4993_p0 = pnand %p4992_p12, %p4986_p9 }
  0x58   : > { %4996 = shalt.err (!%p4993_p0)
}
  0x59   : > { %4264 = dma.hbm_to_vmem [thread:$0]  (!%p5205_p6), %s7566_s8, 1024, %s359_s30, [#allocation12], %s7569_s28, %s7569_s28, %s7570_s29  }
  0x5a   : > { %s3691_s23 = sadd.s32 4294967294, %s5101_s16   ;;  %s5291_s26 = sadd.s32 1, %s5101_s16  }
  0x5b   : > { %s33_s25 = ssub.s32 %s5101_s16, %s5291_s26  ;;  %s36_s21 = sadd.s32 1, %s5097_s15 }
  0x5c   : > { %p34_p7 = scmp.eq.s32.totalorder %s33_s25, 0  ;;  %p43_p13 = scmp.ne.s32.totalorder %s5097_s15, %s5093_s14 }
  0x5d   : > { %p44_p2 = scmp.eq.s32.totalorder %s5101_s16, 0  ;;  %p49_p5 = scmp.ne.s32.totalorder %s5093_s14, %s5089_s13 }
  0x5e   : > { %s5302_s18 = scalar_select %p34_p7, %s5097_s15, %s36_s21  }
  0x5f   : > { %p5304_p8 = por %p44_p2, %p43_p13  ;;  %p5310_p6 = por %p7571_p1, %p49_p5 }
  0x60   : > { %p262_p9 = scmp.eq.s32.totalorder %s5191_s19, 1  ;;  %p268_p10 = scmp.eq.s32.totalorder %s3691_s23, 1 }
  0x61   : > { %s7731_s27 = scalar_select %p5310_p6, 1, 0 }
  0x62   : > { %p4279_p11 = scmp.lt.s32.totalorder %s5101_s16, 2  ;;  %s375_s22 = sand.u32 1, %s5097_s15  }
  0x63   : > { %p5317_p12 = por %p262_p9, %p43_p13  ;;  %p5321_p0 = por %p268_p10, %p49_p5 }
  0x64   : > { %s3700_s17 = sshll.u32 %s375_s22, 7  ;;  %s3784_s12 = sshll.u32 %s5101_s16, 11 }
  0x65   : > { %s7732_s30 = scalar_select %p5317_p12, 1, 0 }
  0x66   : > { %s7733_s11 = scalar_select %p5321_p0, 1, 0 }
  0x67   : > { %s5329_s28 = scalar_lea.hbm %s7558_s0, %s3784_s12  ;;  %s379_s23 = scalar_lea.vmem [#allocation2], %s3700_s17 }
  0x68   : > { %s386_s29 = sshll.u32 %s379_s23, 4  ;;  %p5335_p7 = pnand %p4279_p11, %p5304_p8  ;;  %s5331_s29 = int_to_ptr.vmem [resolvable:$true] %s386_s29 }
  0x69   : > { %s5339_s3 = scalar_lea.sflag [#allocation3], %s375_s22  ;;  %s4997_s4 = scalar_lea.hbm %s5329_s28, 2048 }
  0x6a   : > { %p4998_p13 = scmp.ne.s32.totalorder %s5329_s28, %s4997_s4  ;;  %p4999_p2 = pneg %p5335_p7 }
  0x6b   : > { %s5002_s17 = scalar_lea.hbm %s7558_s0, 4096  ;;  %p5003_p8 = scmp.lt.s32.totalorder %s5329_s28, %s7558_s0 }
  0x6c   : > { %p5000_p5 = pnand %p4999_p2, %p4998_p13  ;;  %p5004_p10 = scmp.lt.s32.totalorder %s5002_s17, %s4997_s4 }
  0x6e   : > { %p5001_p9 = pneg %p5000_p5  ;;  %p5005_p11 = por %p5004_p10, %p5003_p8 }
  0x70   : > { %p5006_p4 = pnand %p5005_p11, %p5001_p9 }
  0x72   : > { %5009 = shalt.err (!%p5006_p4)
}
  0x73   : > { %s5010_s24 = scalar_lea.vmem %s5331_s29, 2048  ;;  %s5111_s22 = smov [#allocation2]  }
  0x74   : > { %p5011_p1 = scmp.ne.s32.totalorder %s5331_s29, %s5010_s24  ;;  %s5015_s6 = sshll.u32 %s5111_s22, 4  ;;  %s5016_s6 = int_to_ptr.vmem [resolvable:$false] %s5015_s6 }
  0x75   : > { %s5017_s12 = scalar_lea.vmem %s5016_s6, 4096  ;;  %p5018_p5 = scmp.lt.s32.totalorder %s5331_s29, %s5016_s6 }
  0x76   : > { %p5013_p0 = pnand %p5011_p1, %p4999_p2  ;;  %p5019_p12 = scmp.lt.s32.totalorder %s5017_s12, %s5010_s24 }
  0x78   : > { %p5014_p13 = pneg %p5013_p0  ;;  %p5020_p6 = por %p5019_p12, %p5018_p5 }
  0x7a   : > { %p5021_p3 = pnand %p5020_p6, %p5014_p13 }
  0x7c   : > { %5024 = shalt.err (!%p5021_p3)
}
  0x7d   : > { %s7735_s4 = smov 4   ;;  %s7736_s25 = smov 64  }
  0x7e   : > { %4268 = dma.hbm_to_vmem [thread:$0]  (!%p5335_p7), %s5329_s28, 2048, %s5331_s29, %s5339_s3, %s7736_s25, %s7736_s25, %s7735_s4  }
  0x7f   : > { %p7737_p1 = scmp.ne.s32.totalorder %s7723_s20, 0 }
  0x81   : > { %398 = sbr.rel (%p7737_p1) target bundleno = 1348 (0x544), region = 60 }
  0x86   : > { %s5366_s17 = sand.u32 1, %s5093_s14   ;;  %p7738_p3 = scmp.ne.s32.totalorder %s7731_s27, 0 }
  0x87   : > { %s3704_s6 = sshll.u32 %s5366_s17, 7  ;;  %s401_s21 = scalar_lea.sflag [#allocation3], %s5366_s17 }
  0x88   : > { %s5370_s23 = scalar_lea.vmem [#allocation2], %s3704_s6 }
  0x89   : > { %5068 = dma.done.wait (%p7738_p3), %s401_s21, 2048  }
  0x8a   : > { %5070 = vsyncadd (%p7738_p3), %s401_s21, 4294965248  ;;  %p7739_p4 = scmp.eq.s32.totalorder %s5191_s19, 0 }
  0x8c   : > { %5072 = dma.done.wait (%p7739_p4), [#allocation6], 2048   ;;  %p7740_p6 = pmov %p7739_p4 }
  0x8d   : > { %p7741_p12 = pmov %p7739_p4 }
  0x8e   : > { %5074 = vsyncadd (%p7740_p6), [#allocation6], 4294965248 }
  0x8f   : > { %5076 = dma.done.wait (%p7741_p12), [#allocation9], 2048   ;;  %p7742_p0 = pmov %p7739_p4 }
  0x91   : > { %5078 = vsyncadd (%p7742_p0), [#allocation9], 4294965248  ;;  %p7743_p7 = pmov %p7742_p0 }
  0x92   : > { %p7744_p2 = pmov %p7742_p0 }
  0x93   : > { %5080 = dma.done.wait (%p7743_p7), [#allocation12], 2048  }
  0x94   : > { %5082 = vsyncadd (%p7744_p2), [#allocation12], 4294965248  ;;  %v4329_v0 = vld [vmem:[#allocation5 + $0x38] sm:$0xff]   ;;  %v4330_v1 = vld [vmem:[#allocation5 + $0x30] sm:$0xff]   ;;  %s3711_s24 = sshll.u32 %s5366_s17, 8  ;;  %s3785_s12 = sshll.u32 %s5191_s19, 12 }
  0x95   : > { %3930 = vmatprep.subr.bf16.mxu0 %v4329_v0  ;;  %v4331_v2 = vld [vmem:[#allocation5 + $0x28] sm:$0xff]   ;;  %v4332_v3 = vld [vmem:[#allocation5 + $0x20] sm:$0xff]   ;;  %v4333_v5 = vld [vmem:[#allocation5 + $0x18] sm:$0xff]   ;;  %s7076_s22 = scalar_lea.vmem [#allocation14], %s3711_s24  ;;  %s7505_s6 = scalar_lea.hbm %s7568_s10, %s3785_s12 }
  0x96   : > { %3931 = vmatpush3.bf16.msra.mxu0 %v4329_v0  ;;  %v5389_v4 = vld [vmem:[%s5370_s23] sm:$0xff]   ;;  %v4334_v6 = vld [vmem:[#allocation5 + $0x10] sm:$0xff]   ;;  %v4335_v7 = vld [vmem:[#allocation5 + $0x8] sm:$0xff]   ;;  %s3561_s4 = sshll.u32 %s7076_s22, 4  ;;  %s3548_s21 = scalar_lea.sflag [#allocation4], %s5366_s17  ;;  %s7507_s4 = int_to_ptr.vmem [resolvable:$true] %s3561_s4 }
  0x97   : > { %3932 = vmatprep.subr.bf16.mxu0 %v4330_v1  ;;  %3946 = vmatprep.mubr.bf16.mxu0 %v5389_v4  ;;  %v4336_v8 = vld [vmem:[#allocation5] sm:$0xff]   ;;  %v4353_v9 = vld [vmem:[#allocation8 + $0x38] sm:$0xff]   ;;  %v4354_v10 = vld [vmem:[#allocation8 + $0x30] sm:$0xff]   ;;  %p8037_p8 = scmp.ne.s32.totalorder %s7732_s30, 0  ;;  %s5112_s1 = smov [#allocation14]  }
  0x98   : > { %3994 = vmatprep.mubr.bf16.mxu1 %v5389_v4  ;;  %3978 = vmatprep.subr.bf16.mxu1 %v4353_v9  ;;  %v4355_v11 = vld [vmem:[#allocation8 + $0x28] sm:$0xff]   ;;  %v5397_v13 = vld [vmem:[%s5370_s23 + $0x10] sm:$0xff]   ;;  %v4356_v14 = vld [vmem:[#allocation8 + $0x20] sm:$0xff]   ;;  %s5029_s3 = sshll.u32 %s5112_s1, 4  ;;  %s5030_s3 = int_to_ptr.vmem [resolvable:$false] %s5029_s3 }
  0x99   : > { %3979 = vmatpush3.bf16.msra.mxu1 %v4353_v9  ;;  %v5394_v12 = vld [vmem:[%s5370_s23 + $0x8] sm:$0xff]   ;;  %v4361_v15 = vld [vmem:[#allocation7 + $0x38] sm:$0xff]   ;;  %v4362_v16 = vld [vmem:[#allocation7 + $0x30] sm:$0xff]   ;;  %s5031_s20 = scalar_lea.vmem %s5030_s3, 8192  ;;  %p5032_p13 = scmp.lt.s32.totalorder %s7507_s4, %s5030_s3 }
  0x9a   : > { %3933 = vmatpush3.bf16.msra.mxu0 %v4330_v1  ;;  %3980 = vmatprep.subr.bf16.mxu1 %v4354_v10  ;;  %v4357_v17 = vld [vmem:[#allocation8 + $0x18] sm:$0xff]   ;;  %v4363_v18 = vld [vmem:[#allocation7 + $0x28] sm:$0xff]   ;;  %v5405_v20 = vld [vmem:[%s5370_s23 + $0x20] sm:$0xff]  }
  0x9b   : > { %3934 = vmatprep.subr.bf16.mxu0 %v4331_v2  ;;  %v5402_v19 = vld [vmem:[%s5370_s23 + $0x18] sm:$0xff]   ;;  %v4358_v21 = vld [vmem:[#allocation8 + $0x10] sm:$0xff]   ;;  %v4364_v22 = vld [vmem:[#allocation7 + $0x20] sm:$0xff]  }
  0x9c   : > { %v4359_v23 = vld [vmem:[#allocation8 + $0x8] sm:$0xff]   ;;  %v4365_v24 = vld [vmem:[#allocation7 + $0x18] sm:$0xff]   ;;  %v5413_v26 = vld [vmem:[%s5370_s23 + $0x30] sm:$0xff]  }
  0x9d   : > { %3981 = vmatpush3.bf16.msra.mxu1 %v4354_v10  ;;  %v5410_v25 = vld [vmem:[%s5370_s23 + $0x28] sm:$0xff]   ;;  %v4360_v27 = vld [vmem:[#allocation8] sm:$0xff]   ;;  %v4368_v28 = vld [vmem:[#allocation7 + $0x10] sm:$0xff]  }
  0x9e   : > { %3935 = vmatpush3.bf16.msra.mxu0 %v4331_v2  ;;  %3982 = vmatprep.subr.bf16.mxu1 %v4355_v11  ;;  %v4366_v29 = vld [vmem:[#allocation11 + $0x38] sm:$0xff]   ;;  %v4371_v30 = vld [vmem:[#allocation7 + $0x8] sm:$0xff]   ;;  %v5421_v32 = vld [vmem:[%s5370_s23 + $0x40] sm:$0xff]  }
  0x9f   : > { %3936 = vmatprep.subr.bf16.mxu0 %v4332_v3  ;;  %v5418_v31 = vld [vmem:[%s5370_s23 + $0x38] sm:$0xff]   ;;  %v4367_v33 = vld [vmem:[#allocation11 + $0x30] sm:$0xff]   ;;  %v4369_v34 = vld [vmem:[#allocation11 + $0x28] sm:$0xff]  }
  0xa0   : > { %v5428_v35 = vld [vmem:[%s5370_s23 + $0x48] sm:$0xff]   ;;  %v5431_v36 = vld [vmem:[%s5370_s23 + $0x50] sm:$0xff]   ;;  %v4370_v37 = vld [vmem:[#allocation11 + $0x20] sm:$0xff]  }
  0xa1   : > { %3983 = vmatpush3.bf16.msra.mxu1 %v4355_v11  ;;  %v4372_v38 = vld [vmem:[#allocation11 + $0x18] sm:$0xff]   ;;  %v5441_v40 = vld [vmem:[%s5370_s23 + $0x60] sm:$0xff]   ;;  %v5448_v41 = vld [vmem:[%s5370_s23 + $0x68] sm:$0xff]  }
  0xa2   : > { %3937 = vmatpush3.bf16.msra.mxu0 %v4332_v3  ;;  %3984 = vmatprep.subr.bf16.mxu1 %v4356_v14  ;;  %v5438_v39 = vld [vmem:[%s5370_s23 + $0x58] sm:$0xff]   ;;  %v5451_v42 = vld [vmem:[%s5370_s23 + $0x70] sm:$0xff]   ;;  %v4375_v45 = vld [vmem:[#allocation11 + $0x8] sm:$0xff]  }
  0xa3   : > { %3938 = vmatprep.subr.bf16.mxu0 %v4333_v5  ;;  %v5458_v43 = vld [vmem:[%s5370_s23 + $0x78] sm:$0xff]   ;;  %v4373_v44 = vld [vmem:[#allocation11 + $0x10] sm:$0xff]   ;;  %v4374_v46 = vld [vmem:[#allocation7] sm:$0xff]   ;;  %s5025_s23 = scalar_lea.vmem %s7507_s4, 4096 }
  0xa4   : > { %v4376_v47 = vld [vmem:[#allocation11] sm:$0xff]   ;;  %v4377_v48 = vld [vmem:[#allocation10 + $0x38] sm:$0xff]   ;;  %p5026_p9 = scmp.ne.s32.totalorder %s7507_s4, %s5025_s23  ;;  %p5033_p5 = scmp.lt.s32.totalorder %s5031_s20, %s5025_s23 }
  0xa5   : > { %3985 = vmatpush3.bf16.msra.mxu1 %v4356_v14  ;;  %v4378_v49 = vld [vmem:[#allocation13 + $0x38] sm:$0xff]   ;;  %v5471_v50 = vld [vmem:[%s7560_s2] ss:$0 sm:$0xff] }
  0xa6   : > { %3939 = vmatpush3.bf16.msra.mxu0 %v4333_v5  ;;  %3986 = vmatprep.subr.bf16.mxu1 %v4357_v17  ;;  %p5027_p10 = pnand %p5026_p9, %p8037_p8  ;;  %p5034_p1 = por %p5033_p5, %p5032_p13 }
  0xa7   : > { %3940 = vmatprep.subr.bf16.mxu0 %v4334_v6 }
  0xa8   : > { %p5028_p11 = pneg %p5027_p10 }
  0xa9   : > { %3987 = vmatpush3.bf16.msra.mxu1 %v4357_v17  ;;  %v4380_v17 = vld [vmem:[#allocation13 + $0x30] sm:$0xff]  }
  0xaa   : > { %3941 = vmatpush3.bf16.msra.mxu0 %v4334_v6  ;;  %3988 = vmatprep.subr.bf16.mxu1 %v4358_v21  ;;  %p5035_p3 = pnand %p5034_p1, %p5028_p11 }
  0xab   : > { %3942 = vmatprep.subr.bf16.mxu0 %v4335_v7 }
  0xad   : > { %3989 = vmatpush3.bf16.msra.mxu1 %v4358_v21 }
  0xae   : > { %3943 = vmatpush3.bf16.msra.mxu0 %v4335_v7  ;;  %3990 = vmatprep.subr.bf16.mxu1 %v4359_v23 }
  0xaf   : > { %3944 = vmatprep.subr.bf16.mxu0 %v4336_v8 }
  0xb1   : > { %3991 = vmatpush3.bf16.msra.mxu1 %v4359_v23 }
  0xb2   : > { %3945 = vmatpush3.bf16.msra.mxu0 %v4336_v8  ;;  %3992 = vmatprep.subr.bf16.mxu1 %v4360_v27 }
  0xb3   : > { %4026 = vmatprep.subr.bf16.mxu0 %v4361_v15 }
  0xb5   : > { %3947 = vmatmul.mubr.bf16.vlgmr.msra.gmra.mxu0 %v5394_v12  ;;  %3993 = vmatpush3.bf16.msra.mxu1 %v4360_v27 }
  0xb6   : > { %3950 = vmatprep.mubr.bf16.mxu0 %v5397_v13  ;;  %4027 = vmatpush3.bf16.msra.mxu0 %v4361_v15 }
  0xb7   : > { %4028 = vmatprep.subr.bf16.mxu0 %v4362_v16  ;;  %4074 = vmatprep.subr.bf16.mxu1 %v4366_v29 }
  0xb8   : > { %3995 = vmatmul.mubr.bf16.vlgmr.msra.gmra.mxu1 %v5394_v12 }
  0xb9   : > { %3998 = vmatprep.mubr.bf16.mxu1 %v5397_v13  ;;  %4075 = vmatpush3.bf16.msra.mxu1 %v4366_v29 }
  0xba   : > { %4029 = vmatpush3.bf16.msra.mxu0 %v4362_v16  ;;  %4076 = vmatprep.subr.bf16.mxu1 %v4367_v33  ;;  %v4379_v16 = vld [vmem:[#allocation10 + $0x30] sm:$0xff]  }
  0xbb   : > { %4030 = vmatprep.subr.bf16.mxu0 %v4363_v18 }
  0xbd   : > { %3951 = vmatmul.mubr.bf16.gmra.mxu0 %v5402_v19  ;;  %4077 = vmatpush3.bf16.msra.mxu1 %v4367_v33  ;;  %v4381_v33 = vld [vmem:[#allocation10 + $0x28] sm:$0xff]  }
  0xbe   : > { %3954 = vmatprep.mubr.bf16.mxu0 %v5405_v20  ;;  %4031 = vmatpush3.bf16.msra.mxu0 %v4363_v18 }
  0xbf   : > { %4032 = vmatprep.subr.bf16.mxu0 %v4364_v22  ;;  %4078 = vmatprep.subr.bf16.mxu1 %v4369_v34 }
  0xc0   : > { %3999 = vmatmul.mubr.bf16.gmra.mxu1 %v5402_v19 }
  0xc1   : > { %4002 = vmatprep.mubr.bf16.mxu1 %v5405_v20  ;;  %4079 = vmatpush3.bf16.msra.mxu1 %v4369_v34  ;;  %v4382_v34 = vld [vmem:[#allocation13 + $0x28] sm:$0xff]  }
  0xc2   : > { %4033 = vmatpush3.bf16.msra.mxu0 %v4364_v22  ;;  %4080 = vmatprep.subr.bf16.mxu1 %v4370_v37 }
  0xc3   : > { %4034 = vmatprep.subr.bf16.mxu0 %v4365_v24 }
  0xc5   : > { %3955 = vmatmul.mubr.bf16.gmra.mxu0 %v5410_v25  ;;  %4081 = vmatpush3.bf16.msra.mxu1 %v4370_v37 }
  0xc6   : > { %3958 = vmatprep.mubr.bf16.mxu0 %v5413_v26  ;;  %4035 = vmatpush3.bf16.msra.mxu0 %v4365_v24 }
  0xc7   : > { %4036 = vmatprep.subr.bf16.mxu0 %v4368_v28  ;;  %4082 = vmatprep.subr.bf16.mxu1 %v4372_v38 }
  0xc8   : > { %4003 = vmatmul.mubr.bf16.gmra.mxu1 %v5410_v25 }
  0xc9   : > { %4006 = vmatprep.mubr.bf16.mxu1 %v5413_v26  ;;  %4083 = vmatpush3.bf16.msra.mxu1 %v4372_v38 }
  0xca   : > { %4037 = vmatpush3.bf16.msra.mxu0 %v4368_v28  ;;  %4084 = vmatprep.subr.bf16.mxu1 %v4373_v44 }
  0xcb   : > { %4038 = vmatprep.subr.bf16.mxu0 %v4371_v30 }
  0xcd   : > { %3959 = vmatmul.mubr.bf16.gmra.mxu0 %v5418_v31  ;;  %4085 = vmatpush3.bf16.msra.mxu1 %v4373_v44 }
  0xce   : > { %3962 = vmatprep.mubr.bf16.mxu0 %v5421_v32  ;;  %4039 = vmatpush3.bf16.msra.mxu0 %v4371_v30 }
  0xcf   : > { %4086 = vmatprep.subr.bf16.mxu1 %v4375_v45  ;;  %4040 = vmatprep.subr.bf16.mxu0 %v4374_v46 }
  0xd0   : > { %4007 = vmatmul.mubr.bf16.gmra.mxu1 %v5418_v31 }
  0xd1   : > { %4010 = vmatprep.mubr.bf16.mxu1 %v5421_v32  ;;  %4087 = vmatpush3.bf16.msra.mxu1 %v4375_v45 }
  0xd2   : > { %4088 = vmatprep.subr.bf16.mxu1 %v4376_v47  ;;  %4041 = vmatpush3.bf16.msra.mxu0 %v4374_v46 }
  0xd3   : > { %4122 = vmatprep.subr.bf16.mxu0 %v4377_v48 }
  0xd5   : > { %3963 = vmatmul.mubr.bf16.gmra.mxu0 %v5428_v35  ;;  %4089 = vmatpush3.bf16.msra.mxu1 %v4376_v47 }
  0xd6   : > { %3966 = vmatprep.mubr.bf16.mxu0 %v5431_v36  ;;  %4170 = vmatprep.subr.bf16.mxu1 %v4378_v49 }
  0xd8   : > { %4011 = vmatmul.mubr.bf16.gmra.mxu1 %v5428_v35 }
  0xd9   : > { %4014 = vmatprep.mubr.bf16.mxu1 %v5431_v36 }
  0xdd   : > { %3967 = vmatmul.mubr.bf16.gmra.mxu0 %v5438_v39 }
  0xde   : > { %3970 = vmatprep.mubr.bf16.mxu0 %v5441_v40 }
  0xe0   : > { %4015 = vmatmul.mubr.bf16.gmra.mxu1 %v5438_v39 }
  0xe1   : > { %4018 = vmatprep.mubr.bf16.mxu1 %v5441_v40 }
  0xe5   : > { %3971 = vmatmul.mubr.bf16.gmra.mxu0 %v5448_v41 }
  0xe6   : > { %3974 = vmatprep.mubr.bf16.mxu0 %v5451_v42 }
  0xe8   : > { %4019 = vmatmul.mubr.bf16.gmra.mxu1 %v5448_v41 }
  0xe9   : > { %4022 = vmatprep.mubr.bf16.mxu1 %v5451_v42 }
  0xed   : > { %3975 = vmatmul.mubr.bf16.gmra.mxu0 %v5458_v43 }
  0xf0   : > { %4023 = vmatmul.mubr.bf16.gmra.mxu1 %v5458_v43 }
 0x175   : > { %v3948_v51 = vpop.f32.mrf.mxu0 }
 0x176   : > { %v710_v52 = vadd.f32 %v3948_v51, %v5471_v50 }
 0x177   : > { %v701_v53 = vpop.f32.mrf.mxu0 }
 0x178   : > { %v702_v54 = vadd.f32 %v5471_v50, %v701_v53  ;;  %v862_v57 = vmul.f32 0.01, %v710_v52  ;;  %vm830_vm1 = vcmp.gt.f32.partialorder %v710_v52, 0.0  ;;  %v4384_v53 = vld [vmem:[#allocation13 + $0x20] sm:$0xff]  }
 0x179   : > { %v3949_v55 = vpop.f32.mrf.mxu0 }
 0x17a   : > { %v713_v56 = vadd.f32 %v3949_v55, %v5471_v50  ;;  %v860_v59 = vmul.f32 0.01, %v702_v54  ;;  %vm828_vm2 = vcmp.gt.f32.partialorder %v702_v54, 0.0  ;;  %v894_v3 = vsel %vm830_vm1, %v710_v52, %v862_v57  ;;  %v4383_v52 = vld [vmem:[#allocation10 + $0x20] sm:$0xff]  }
 0x17b   : > { %v704_v58 = vpop.f32.mrf.mxu0 }
 0x17c   : > { %vm831_vm0 = vcmp.gt.f32.partialorder %v713_v56, 0.0  ;;  %v863_v60 = vmul.f32 0.01, %v713_v56  ;;  %v705_v61 = vadd.f32 %v5471_v50, %v704_v58  ;;  %v892_v6 = vsel %vm828_vm2, %v702_v54, %v860_v59 }
 0x17d   : > { %v3952_v62 = vpop.f32.mrf.mxu0 }
 0x17e   : > { %v895_v63 = vsel %vm831_vm0, %v713_v56, %v863_v60  ;;  %vm829_vm3 = vcmp.gt.f32.partialorder %v705_v61, 0.0  ;;  %v861_v0 = vmul.f32 0.01, %v705_v61  ;;  %v726_v1 = vadd.f32 %v3952_v62, %v5471_v50 }
 0x17f   : > { %v717_v2 = vpop.f32.mrf.mxu0  ;;  %v925_v8 = vpack.c.bf16 %v895_v63, %v894_v3  ;;  %v4385_v63 = vld [vmem:[#allocation10 + $0x18] sm:$0xff]  }
 0x180   : > { %v718_v5 = vadd.f32 %v5471_v50, %v717_v2  ;;  %v893_v7 = vsel %vm829_vm3, %v705_v61, %v861_v0  ;;  %v866_v9 = vmul.f32 0.01, %v726_v1  ;;  %vm834_vm4 = vcmp.gt.f32.partialorder %v726_v1, 0.0  ;;  %v4386_v0 = vld [vmem:[#allocation13 + $0x18] sm:$0xff]  }
 0x181   : > { %v3953_v10 = vpop.f32.mrf.mxu0  ;;  %v924_v11 = vpack.c.bf16 %v893_v7, %v892_v6 }
 0x182   : > { %vm832_vm5 = vcmp.gt.f32.partialorder %v718_v5, 0.0  ;;  %v864_v14 = vmul.f32 0.01, %v718_v5  ;;  %v729_v15 = vadd.f32 %v3953_v10, %v5471_v50  ;;  %v898_v27 = vsel %vm834_vm4, %v726_v1, %v866_v9 }
 0x183   : > { %v720_v18 = vpop.f32.mrf.mxu0  ;;  %4042 = vmatprep.mubr.bf16.mxu0 %v924_v11  ;;  %4090 = vmatprep.mubr.bf16.mxu1 %v924_v11  ;;  %v4387_v11 = vld [vmem:[#allocation10 + $0x10] sm:$0xff]  }
 0x184   : > { %vm835_vm6 = vcmp.gt.f32.partialorder %v729_v15, 0.0  ;;  %v867_v21 = vmul.f32 0.01, %v729_v15  ;;  %v721_v22 = vadd.f32 %v5471_v50, %v720_v18  ;;  %4043 = vmatmul.mubr.bf16.vlgmr.msra.gmra.mxu0 %v925_v8  ;;  %4091 = vmatmul.mubr.bf16.vlgmr.msra.gmra.mxu1 %v925_v8  ;;  %v896_v24 = vsel %vm832_vm5, %v718_v5, %v864_v14  ;;  %v4388_v14 = vld [vmem:[#allocation13 + $0x10] sm:$0xff]  }
 0x185   : > { %v3956_v23 = vpop.f32.mrf.mxu0  ;;  %4123 = vmatpush3.bf16.msra.mxu0 %v4377_v48  ;;  %4171 = vmatpush3.bf16.msra.mxu1 %v4378_v49 }
 0x186   : > { %vm833_vm7 = vcmp.gt.f32.partialorder %v721_v22, 0.0  ;;  %v865_v28 = vmul.f32 0.01, %v721_v22  ;;  %v742_v29 = vadd.f32 %v3956_v23, %v5471_v50  ;;  %v899_v30 = vsel %vm835_vm6, %v729_v15, %v867_v21  ;;  %4124 = vmatprep.subr.bf16.mxu0 %v4379_v16  ;;  %4172 = vmatprep.subr.bf16.mxu1 %v4380_v17 }
 0x187   : > { %v733_v37 = vpop.f32.mrf.mxu0  ;;  %v927_v45 = vpack.c.bf16 %v899_v30, %v898_v27 }
 0x188   : > { %v734_v38 = vadd.f32 %v5471_v50, %v733_v37  ;;  %v897_v44 = vsel %vm833_vm7, %v721_v22, %v865_v28  ;;  %v870_v46 = vmul.f32 0.01, %v742_v29  ;;  %vm838_vm8 = vcmp.gt.f32.partialorder %v742_v29, 0.0 }
 0x189   : > { %v3957_v47 = vpop.f32.mrf.mxu0  ;;  %v926_v51 = vpack.c.bf16 %v897_v44, %v896_v24  ;;  %4125 = vmatpush3.bf16.msra.mxu0 %v4379_v16  ;;  %4173 = vmatpush3.bf16.msra.mxu1 %v4380_v17 }
 0x18a   : > { %vm836_vm9 = vcmp.gt.f32.partialorder %v734_v38, 0.0  ;;  %v868_v48 = vmul.f32 0.01, %v734_v38  ;;  %v745_v49 = vadd.f32 %v3957_v47, %v5471_v50  ;;  %4126 = vmatprep.subr.bf16.mxu0 %v4381_v33  ;;  %4174 = vmatprep.subr.bf16.mxu1 %v4382_v34  ;;  %v902_v59 = vsel %vm838_vm8, %v742_v29, %v870_v46 }
 0x18b   : > { %v736_v54 = vpop.f32.mrf.mxu0  ;;  %4046 = vmatprep.mubr.bf16.mxu0 %v926_v51  ;;  %4094 = vmatprep.mubr.bf16.mxu1 %v926_v51 }
 0x18c   : > { %vm839_vm10 = vcmp.gt.f32.partialorder %v745_v49, 0.0  ;;  %v871_v55 = vmul.f32 0.01, %v745_v49  ;;  %v737_v56 = vadd.f32 %v5471_v50, %v736_v54  ;;  %4047 = vmatmul.mubr.bf16.gmra.mxu0 %v927_v45  ;;  %4095 = vmatmul.mubr.bf16.gmra.mxu1 %v927_v45  ;;  %v900_v58 = vsel %vm836_vm9, %v734_v38, %v868_v48 }
 0x18d   : > { %v3960_v57 = vpop.f32.mrf.mxu0  ;;  %4127 = vmatpush3.bf16.msra.mxu0 %v4381_v33  ;;  %4175 = vmatpush3.bf16.msra.mxu1 %v4382_v34 }
 0x18e   : > { %vm837_vm11 = vcmp.gt.f32.partialorder %v737_v56, 0.0  ;;  %v869_v60 = vmul.f32 0.01, %v737_v56  ;;  %v758_v61 = vadd.f32 %v3960_v57, %v5471_v50  ;;  %v903_v62 = vsel %vm839_vm10, %v745_v49, %v871_v55  ;;  %4128 = vmatprep.subr.bf16.mxu0 %v4383_v52  ;;  %4176 = vmatprep.subr.bf16.mxu1 %v4384_v53 }
 0x18f   : > { %v749_v1 = vpop.f32.mrf.mxu0  ;;  %v929_v5 = vpack.c.bf16 %v903_v62, %v902_v59 }
 0x190   : > { %v750_v2 = vadd.f32 %v5471_v50, %v749_v1  ;;  %v901_v3 = vsel %vm837_vm11, %v737_v56, %v869_v60  ;;  %v874_v6 = vmul.f32 0.01, %v758_v61  ;;  %vm842_vm12 = vcmp.gt.f32.partialorder %v758_v61, 0.0 }
 0x191   : > { %v3961_v7 = vpop.f32.mrf.mxu0  ;;  %v928_v8 = vpack.c.bf16 %v901_v3, %v900_v58  ;;  %4129 = vmatpush3.bf16.msra.mxu0 %v4383_v52  ;;  %4177 = vmatpush3.bf16.msra.mxu1 %v4384_v53 }
 0x192   : > { %vm840_vm13 = vcmp.gt.f32.partialorder %v750_v2, 0.0  ;;  %v872_v9 = vmul.f32 0.01, %v750_v2  ;;  %v761_v10 = vadd.f32 %v3961_v7, %v5471_v50  ;;  %4130 = vmatprep.subr.bf16.mxu0 %v4385_v63  ;;  %4178 = vmatprep.subr.bf16.mxu1 %v4386_v0  ;;  %v906_v22 = vsel %vm842_vm12, %v758_v61, %v874_v6 }
 0x193   : > { %v752_v15 = vpop.f32.mrf.mxu0  ;;  %4050 = vmatprep.mubr.bf16.mxu0 %v928_v8  ;;  %4098 = vmatprep.mubr.bf16.mxu1 %v928_v8 }
 0x194   : > { %vm843_vm14 = vcmp.gt.f32.partialorder %v761_v10, 0.0  ;;  %v875_v16 = vmul.f32 0.01, %v761_v10  ;;  %v753_v17 = vadd.f32 %v5471_v50, %v752_v15  ;;  %4051 = vmatmul.mubr.bf16.gmra.mxu0 %v929_v5  ;;  %4099 = vmatmul.mubr.bf16.gmra.mxu1 %v929_v5  ;;  %v904_v21 = vsel %vm840_vm13, %v750_v2, %v872_v9 }
 0x195   : > { %v3964_v18 = vpop.f32.mrf.mxu0  ;;  %4131 = vmatpush3.bf16.msra.mxu0 %v4385_v63  ;;  %4179 = vmatpush3.bf16.msra.mxu1 %v4386_v0 }
 0x196   : > { %vm841_vm15 = vcmp.gt.f32.partialorder %v753_v17, 0.0  ;;  %v873_v23 = vmul.f32 0.01, %v753_v17  ;;  %v774_v24 = vadd.f32 %v3964_v18, %v5471_v50  ;;  %v907_v27 = vsel %vm843_vm14, %v761_v10, %v875_v16  ;;  %4132 = vmatprep.subr.bf16.mxu0 %v4387_v11  ;;  %4180 = vmatprep.subr.bf16.mxu1 %v4388_v14 }
 0x197   : > { %v765_v28 = vpop.f32.mrf.mxu0  ;;  %v931_v33 = vpack.c.bf16 %v907_v27, %v906_v22 }
 0x198   : > { %v766_v29 = vadd.f32 %v5471_v50, %v765_v28  ;;  %v905_v30 = vsel %vm841_vm15, %v753_v17, %v873_v23  ;;  %v878_v34 = vmul.f32 0.01, %v774_v24  ;;  %vm846_vm0 = vcmp.gt.f32.partialorder %v774_v24, 0.0 }
 0x199   : > { %v3965_v37 = vpop.f32.mrf.mxu0  ;;  %v930_v38 = vpack.c.bf16 %v905_v30, %v904_v21  ;;  %4133 = vmatpush3.bf16.msra.mxu0 %v4387_v11  ;;  %4181 = vmatpush3.bf16.msra.mxu1 %v4388_v14 }
 0x19a   : > { %vm844_vm1 = vcmp.gt.f32.partialorder %v766_v29, 0.0  ;;  %v876_v44 = vmul.f32 0.01, %v766_v29  ;;  %v777_v45 = vadd.f32 %v3965_v37, %v5471_v50  ;;  %v910_v52 = vsel %vm846_vm0, %v774_v24, %v878_v34 }
 0x19b   : > { %v768_v46 = vpop.f32.mrf.mxu0  ;;  %4054 = vmatprep.mubr.bf16.mxu0 %v930_v38  ;;  %4102 = vmatprep.mubr.bf16.mxu1 %v930_v38 }
 0x19c   : > { %vm847_vm2 = vcmp.gt.f32.partialorder %v777_v45, 0.0  ;;  %v879_v47 = vmul.f32 0.01, %v777_v45  ;;  %v769_v51 = vadd.f32 %v5471_v50, %v768_v46  ;;  %4055 = vmatmul.mubr.bf16.gmra.mxu0 %v931_v33  ;;  %4103 = vmatmul.mubr.bf16.gmra.mxu1 %v931_v33  ;;  %v908_v49 = vsel %vm844_vm1, %v766_v29, %v876_v44 }
 0x19d   : > { %v3968_v48 = vpop.f32.mrf.mxu0 }
 0x19e   : > { %vm845_vm3 = vcmp.gt.f32.partialorder %v769_v51, 0.0  ;;  %v877_v53 = vmul.f32 0.01, %v769_v51  ;;  %v790_v54 = vadd.f32 %v3968_v48, %v5471_v50  ;;  %v911_v55 = vsel %vm847_vm2, %v777_v45, %v879_v47 }
 0x19f   : > { %v781_v56 = vpop.f32.mrf.mxu0  ;;  %v933_v59 = vpack.c.bf16 %v911_v55, %v910_v52 }
 0x1a0   : > { %v782_v57 = vadd.f32 %v5471_v50, %v781_v56  ;;  %v909_v58 = vsel %vm845_vm3, %v769_v51, %v877_v53  ;;  %v882_v60 = vmul.f32 0.01, %v790_v54  ;;  %vm850_vm4 = vcmp.gt.f32.partialorder %v790_v54, 0.0 }
 0x1a1   : > { %v3969_v61 = vpop.f32.mrf.mxu0  ;;  %v932_v62 = vpack.c.bf16 %v909_v58, %v908_v49 }
 0x1a2   : > { %vm848_vm5 = vcmp.gt.f32.partialorder %v782_v57, 0.0  ;;  %v880_v63 = vmul.f32 0.01, %v782_v57  ;;  %v793_v0 = vadd.f32 %v3969_v61, %v5471_v50  ;;  %v914_v7 = vsel %vm850_vm4, %v790_v54, %v882_v60 }
 0x1a3   : > { %v784_v1 = vpop.f32.mrf.mxu0  ;;  %4058 = vmatprep.mubr.bf16.mxu0 %v932_v62  ;;  %4106 = vmatprep.mubr.bf16.mxu1 %v932_v62 }
 0x1a4   : > { %vm851_vm6 = vcmp.gt.f32.partialorder %v793_v0, 0.0  ;;  %v883_v2 = vmul.f32 0.01, %v793_v0  ;;  %v785_v3 = vadd.f32 %v5471_v50, %v784_v1  ;;  %4059 = vmatmul.mubr.bf16.gmra.mxu0 %v933_v59  ;;  %4107 = vmatmul.mubr.bf16.gmra.mxu1 %v933_v59  ;;  %v912_v6 = vsel %vm848_vm5, %v782_v57, %v880_v63  ;;  %v4392_v1 = vld [vmem:[#allocation13] sm:$0xff]  }
 0x1a5   : > { %v3972_v5 = vpop.f32.mrf.mxu0 }
 0x1a6   : > { %vm849_vm7 = vcmp.gt.f32.partialorder %v785_v3, 0.0  ;;  %v881_v8 = vmul.f32 0.01, %v785_v3  ;;  %v806_v9 = vadd.f32 %v3972_v5, %v5471_v50  ;;  %v915_v10 = vsel %vm851_vm6, %v793_v0, %v883_v2  ;;  %v4390_v0 = vld [vmem:[#allocation13 + $0x8] sm:$0xff]   ;;  %v4391_v2 = vld [vmem:[#allocation10] sm:$0xff]  }
 0x1a7   : > { %v797_v11 = vpop.f32.mrf.mxu0  ;;  %v935_v16 = vpack.c.bf16 %v915_v10, %v914_v7  ;;  %4182 = vmatprep.subr.bf16.mxu1 %v4390_v0  ;;  %v5545_v10 = vld [vmem:[%s7563_s5] ss:$0 sm:$0xff] }
 0x1a8   : > { %v798_v14 = vadd.f32 %v5471_v50, %v797_v11  ;;  %v913_v15 = vsel %vm849_vm7, %v785_v3, %v881_v8  ;;  %v886_v17 = vmul.f32 0.01, %v806_v9  ;;  %vm854_vm8 = vcmp.gt.f32.partialorder %v806_v9, 0.0  ;;  %4183 = vmatpush3.bf16.msra.mxu1 %v4390_v0 }
 0x1a9   : > { %v3973_v18 = vpop.f32.mrf.mxu0  ;;  %v934_v21 = vpack.c.bf16 %v913_v15, %v912_v6  ;;  %4184 = vmatprep.subr.bf16.mxu1 %v4392_v1 }
 0x1aa   : > { %vm852_vm9 = vcmp.gt.f32.partialorder %v798_v14, 0.0  ;;  %v884_v22 = vmul.f32 0.01, %v798_v14  ;;  %v809_v23 = vadd.f32 %v3973_v18, %v5471_v50  ;;  %v918_v33 = vsel %vm854_vm8, %v806_v9, %v886_v17 }
 0x1ab   : > { %v800_v24 = vpop.f32.mrf.mxu0  ;;  %4062 = vmatprep.mubr.bf16.mxu0 %v934_v21  ;;  %4110 = vmatprep.mubr.bf16.mxu1 %v934_v21 }
 0x1ac   : > { %vm855_vm10 = vcmp.gt.f32.partialorder %v809_v23, 0.0  ;;  %v887_v27 = vmul.f32 0.01, %v809_v23  ;;  %v801_v28 = vadd.f32 %v5471_v50, %v800_v24  ;;  %4063 = vmatmul.mubr.bf16.gmra.mxu0 %v935_v16  ;;  %4111 = vmatmul.mubr.bf16.gmra.mxu1 %v935_v16  ;;  %v916_v30 = vsel %vm852_vm9, %v798_v14, %v884_v22 }
 0x1ad   : > { %v3976_v29 = vpop.f32.mrf.mxu0  ;;  %4185 = vmatpush3.bf16.msra.mxu1 %v4392_v1 }
 0x1ae   : > { %vm853_vm11 = vcmp.gt.f32.partialorder %v801_v28, 0.0  ;;  %v885_v34 = vmul.f32 0.01, %v801_v28  ;;  %v822_v37 = vadd.f32 %v3976_v29, %v5471_v50  ;;  %v919_v38 = vsel %vm855_vm10, %v809_v23, %v887_v27 }
 0x1af   : > { %v813_v44 = vpop.f32.mrf.mxu0  ;;  %v937_v47 = vpack.c.bf16 %v919_v38, %v918_v33 }
 0x1b0   : > { %v814_v45 = vadd.f32 %v5471_v50, %v813_v44  ;;  %v917_v46 = vsel %vm853_vm11, %v801_v28, %v885_v34  ;;  %v890_v51 = vmul.f32 0.01, %v822_v37  ;;  %vm858_vm12 = vcmp.gt.f32.partialorder %v822_v37, 0.0 }
 0x1b1   : > { %v3977_v48 = vpop.f32.mrf.mxu0  ;;  %v936_v49 = vpack.c.bf16 %v917_v46, %v916_v30 }
 0x1b2   : > { %v888_v52 = vmul.f32 0.01, %v814_v45  ;;  %v825_v53 = vadd.f32 %v3977_v48, %v5471_v50  ;;  %vm856_vm13 = vcmp.gt.f32.partialorder %v814_v45, 0.0  ;;  %v922_v57 = vsel %vm858_vm12, %v822_v37, %v890_v51 }
 0x1b3   : > { %v816_v54 = vpop.f32.mrf.mxu0  ;;  %4066 = vmatprep.mubr.bf16.mxu0 %v936_v49  ;;  %4114 = vmatprep.mubr.bf16.mxu1 %v936_v49 }
 0x1b4   : > { %vm859_vm14 = vcmp.gt.f32.partialorder %v825_v53, 0.0  ;;  %v891_v55 = vmul.f32 0.01, %v825_v53  ;;  %v817_v56 = vadd.f32 %v5471_v50, %v816_v54  ;;  %4067 = vmatmul.mubr.bf16.gmra.mxu0 %v937_v47  ;;  %4115 = vmatmul.mubr.bf16.gmra.mxu1 %v937_v47  ;;  %v920_v59 = vsel %vm856_vm13, %v814_v45, %v888_v52  ;;  %v4389_v50 = vld [vmem:[#allocation10 + $0x8] sm:$0xff]  }
 0x1b5   : > { %4134 = vmatprep.subr.bf16.mxu0 %v4389_v50 }
 0x1b6   : > { %vm857_vm15 = vcmp.gt.f32.partialorder %v817_v56, 0.0  ;;  %v889_v58 = vmul.f32 0.01, %v817_v56  ;;  %v923_v60 = vsel %vm859_vm14, %v825_v53, %v891_v55  ;;  %4135 = vmatpush3.bf16.msra.mxu0 %v4389_v50 }
 0x1b7   : > { %v939_v62 = vpack.c.bf16 %v923_v60, %v922_v57  ;;  %4136 = vmatprep.subr.bf16.mxu0 %v4391_v2 }
 0x1b8   : > { %v921_v61 = vsel %vm857_vm15, %v817_v56, %v889_v58 }
 0x1b9   : > { %v938_v63 = vpack.c.bf16 %v921_v61, %v920_v59 }
 0x1ba   : > { %4137 = vmatpush3.bf16.msra.mxu0 %v4391_v2 }
 0x1bb   : > { %4070 = vmatprep.mubr.bf16.mxu0 %v938_v63  ;;  %4118 = vmatprep.mubr.bf16.mxu1 %v938_v63 }
 0x1bc   : > { %4071 = vmatmul.mubr.bf16.gmra.mxu0 %v939_v62  ;;  %4119 = vmatmul.mubr.bf16.gmra.mxu1 %v939_v62 }
 0x1bd   : > { %4186 = vmatprep.mubr.bf16.mxu1 %v5389_v4  ;;  %v3996_v4 = vpop.f32.mrf.mxu1 }
 0x1c4   : > { %4187 = vmatmul.mubr.bf16.vlgmr.msra.gmra.mxu1 %v5394_v12  ;;  %v1054_v12 = vpop.f32.mrf.mxu1 }
 0x1c5   : > { %4190 = vmatprep.mubr.bf16.mxu1 %v5397_v13 }
 0x1c6   : > { %v3997_v13 = vpop.f32.mrf.mxu1 }
 0x1cc   : > { %4191 = vmatmul.mubr.bf16.gmra.mxu1 %v5402_v19  ;;  %v1057_v19 = vpop.f32.mrf.mxu1 }
 0x1cd   : > { %4194 = vmatprep.mubr.bf16.mxu1 %v5405_v20 }
 0x1ce   : > { %v4000_v20 = vpop.f32.mrf.mxu1 }
 0x1d4   : > { %4195 = vmatmul.mubr.bf16.gmra.mxu1 %v5410_v25  ;;  %v1070_v25 = vpop.f32.mrf.mxu1 }
 0x1d5   : > { %4198 = vmatprep.mubr.bf16.mxu1 %v5413_v26 }
 0x1d6   : > { %v4001_v26 = vpop.f32.mrf.mxu1 }
 0x1dc   : > { %4199 = vmatmul.mubr.bf16.gmra.mxu1 %v5418_v31  ;;  %v1073_v31 = vpop.f32.mrf.mxu1 }
 0x1dd   : > { %4202 = vmatprep.mubr.bf16.mxu1 %v5421_v32 }
 0x1de   : > { %v4004_v32 = vpop.f32.mrf.mxu1 }
 0x1e4   : > { %4203 = vmatmul.mubr.bf16.gmra.mxu1 %v5428_v35  ;;  %v5526_v35 = vpop.f32.mrf.mxu1 }
 0x1e5   : > { %4206 = vmatprep.mubr.bf16.mxu1 %v5431_v36 }
 0x1e6   : > { %v5528_v36 = vpop.f32.mrf.mxu1 }
 0x1ec   : > { %4207 = vmatmul.mubr.bf16.gmra.mxu1 %v5438_v39  ;;  %v5530_v39 = vpop.f32.mrf.mxu1 }
 0x1ed   : > { %4210 = vmatprep.mubr.bf16.mxu1 %v5441_v40 }
 0x1ee   : > { %v5532_v40 = vpop.f32.mrf.mxu1 }
 0x1f4   : > { %4211 = vmatmul.mubr.bf16.gmra.mxu1 %v5448_v41  ;;  %v5534_v41 = vpop.f32.mrf.mxu1 }
 0x1f5   : > { %4214 = vmatprep.mubr.bf16.mxu1 %v5451_v42 }
 0x1f6   : > { %v5536_v42 = vpop.f32.mrf.mxu1 }
 0x1fc   : > { %4215 = vmatmul.mubr.bf16.gmra.mxu1 %v5458_v43  ;;  %v5538_v43 = vpop.f32.mrf.mxu1 }
 0x1fe   : > { %v5540_v5 = vpop.f32.mrf.mxu1 }
 0x200   : > { %v5547_v14 = vpop.f32.mrf.mxu1 }
 0x202   : > { %v5552_v23 = vpop.f32.mrf.mxu1 }
 0x204   : > { %v5555_v45 = vpop.f32.mrf.mxu1 }
 0x206   : > { %v5561_v62 = vpop.f32.mrf.mxu1 }
 0x244   : > { %v4044_v3 = vpop.f32.mrf.mxu0 }
 0x245   : > { %v1272_v8 = vadd.f32 %v4044_v3, %v3996_v4 }
 0x246   : > { %v1263_v6 = vpop.f32.mrf.mxu0 }
 0x247   : > { %v1264_v7 = vadd.f32 %v1263_v6, %v1054_v12  ;;  %v1399_v18 = vadd.f32 %v5545_v10, %v1272_v8 }
 0x248   : > { %v4045_v9 = vpop.f32.mrf.mxu0 }
 0x249   : > { %v1275_v11 = vadd.f32 %v4045_v9, %v3997_v13  ;;  %v1397_v16 = vadd.f32 %v5545_v10, %v1264_v7  ;;  %v1463_v34 = vmul.f32 0.01, %v1399_v18  ;;  %vm1431_vm3 = vcmp.gt.f32.partialorder %v1399_v18, 0.0 }
 0x24a   : > { %v1266_v15 = vpop.f32.mrf.mxu0 }
 0x24b   : > { %v1400_v17 = vadd.f32 %v5545_v10, %v1275_v11  ;;  %v1267_v21 = vadd.f32 %v1266_v15, %v1057_v19  ;;  %v1461_v30 = vmul.f32 0.01, %v1397_v16  ;;  %vm1429_vm1 = vcmp.gt.f32.partialorder %v1397_v16, 0.0 }
 0x24c   : > { %v4048_v22 = vpop.f32.mrf.mxu0  ;;  %v1495_v55 = vsel %vm1431_vm3, %v1399_v18, %v1463_v34 }
 0x24d   : > { %v1464_v24 = vmul.f32 0.01, %v1400_v17  ;;  %v1398_v27 = vadd.f32 %v5545_v10, %v1267_v21  ;;  %v1288_v28 = vadd.f32 %v4048_v22, %v4000_v20  ;;  %vm1432_vm0 = vcmp.gt.f32.partialorder %v1400_v17, 0.0 }
 0x24e   : > { %v1279_v29 = vpop.f32.mrf.mxu0  ;;  %v1493_v54 = vsel %vm1429_vm1, %v1397_v16, %v1461_v30 }
 0x24f   : > { %v1280_v33 = vadd.f32 %v1279_v29, %v1070_v25  ;;  %vm1430_vm2 = vcmp.gt.f32.partialorder %v1398_v27, 0.0  ;;  %v1462_v37 = vmul.f32 0.01, %v1398_v27  ;;  %v1496_v46 = vsel %vm1432_vm0, %v1400_v17, %v1464_v24  ;;  %v5567_v25 = vpop.f32.mrf.mxu1 }
 0x250   : > { %v4049_v38 = vpop.f32.mrf.mxu0  ;;  %v1403_v47 = vadd.f32 %v5545_v10, %v1288_v28  ;;  %v1526_v58 = vpack.c.bf16 %v1496_v46, %v1495_v55 }
 0x251   : > { %v1291_v44 = vadd.f32 %v4049_v38, %v4001_v26  ;;  %v1401_v51 = vadd.f32 %v5545_v10, %v1280_v33  ;;  %v1494_v49 = vsel %vm1430_vm2, %v1398_v27, %v1462_v37  ;;  %v5574_v18 = vpop.f32.mrf.mxu1 }
 0x252   : > { %v1282_v48 = vpop.f32.mrf.mxu0  ;;  %v1525_v57 = vpack.c.bf16 %v1494_v49, %v1493_v54  ;;  %vm1435_vm4 = vcmp.gt.f32.partialorder %v1403_v47, 0.0  ;;  %v1467_v63 = vmul.f32 0.01, %v1403_v47 }
 0x253   : > { %v1404_v52 = vadd.f32 %v5545_v10, %v1291_v44  ;;  %v1283_v53 = vadd.f32 %v1282_v48, %v1073_v31  ;;  %v1465_v0 = vmul.f32 0.01, %v1401_v51  ;;  %vm1433_vm7 = vcmp.gt.f32.partialorder %v1401_v51, 0.0  ;;  %v5581_v34 = vpop.f32.mrf.mxu1 }
 0x254   : > { %v4052_v56 = vpop.f32.mrf.mxu0  ;;  %4138 = vmatprep.mubr.bf16.mxu0 %v1525_v57 }
 0x255   : > { %v1468_v59 = vmul.f32 0.01, %v1404_v52  ;;  %v1402_v60 = vadd.f32 %v5545_v10, %v1283_v53  ;;  %v1304_v61 = vadd.f32 %v4052_v56, %v4004_v32  ;;  %vm1436_vm5 = vcmp.gt.f32.partialorder %v1404_v52, 0.0  ;;  %4139 = vmatmul.mubr.bf16.vlgmr.msra.gmra.mxu0 %v1526_v58  ;;  %v4020_v54 = vpop.f32.mrf.mxu1 }
 0x256   : > { %v1295_v50 = vpop.f32.mrf.mxu0  ;;  %v1499_v32 = vsel %vm1435_vm4, %v1403_v47, %v1467_v63  ;;  %v1497_v7 = vsel %vm1433_vm7, %v1401_v51, %v1465_v0 }
 0x257   : > { %vm1434_vm6 = vcmp.gt.f32.partialorder %v1402_v60, 0.0  ;;  %v1466_v1 = vmul.f32 0.01, %v1402_v60  ;;  %v1407_v2 = vadd.f32 %v5545_v10, %v1304_v61  ;;  %v1296_v4 = vadd.f32 %v1295_v50, %v5526_v35  ;;  %v1150_v0 = vpop.f32.mrf.mxu1 }
 0x258   : > { %v4053_v12 = vpop.f32.mrf.mxu0  ;;  %v1500_v20 = vsel %vm1436_vm5, %v1404_v52, %v1468_v59 }
 0x259   : > { %v1405_v13 = vadd.f32 %v5545_v10, %v1296_v4  ;;  %v1307_v19 = vadd.f32 %v4053_v12, %v5528_v36  ;;  %v1498_v31 = vsel %vm1434_vm6, %v1402_v60, %v1466_v1  ;;  %vm1439_vm8 = vcmp.gt.f32.partialorder %v1407_v2, 0.0 }
 0x25a   : > { %v1298_v26 = vpop.f32.mrf.mxu0  ;;  %v1471_v35 = vmul.f32 0.01, %v1407_v2  ;;  %v1527_v11 = vpack.c.bf16 %v1498_v31, %v1497_v7  ;;  %v1528_v15 = vpack.c.bf16 %v1500_v20, %v1499_v32  ;;  %v4021_v32 = vpop.f32.mrf.mxu1 }
 0x25b   : > { %v1408_v3 = vadd.f32 %v5545_v10, %v1307_v19  ;;  %v1299_v6 = vadd.f32 %v1298_v26, %v5530_v39  ;;  %v1469_v8 = vmul.f32 0.01, %v1405_v13  ;;  %vm1437_vm10 = vcmp.gt.f32.partialorder %v1405_v13, 0.0 }
 0x25c   : > { %v4056_v9 = vpop.f32.mrf.mxu0  ;;  %4142 = vmatprep.mubr.bf16.mxu0 %v1527_v11  ;;  %v1503_v28 = vsel %vm1439_vm8, %v1407_v2, %v1471_v35 }
 0x25d   : > { %vm1440_vm9 = vcmp.gt.f32.partialorder %v1408_v3, 0.0  ;;  %v1472_v36 = vmul.f32 0.01, %v1408_v3  ;;  %v1406_v16 = vadd.f32 %v5545_v10, %v1299_v6  ;;  %v1320_v17 = vadd.f32 %v4056_v9, %v5532_v40  ;;  %4143 = vmatmul.mubr.bf16.gmra.mxu0 %v1528_v15 }
 0x25e   : > { %v1311_v21 = vpop.f32.mrf.mxu0  ;;  %v1501_v33 = vsel %vm1437_vm10, %v1405_v13, %v1469_v8 }
 0x25f   : > { %vm1438_vm11 = vcmp.gt.f32.partialorder %v1406_v16, 0.0  ;;  %v1470_v22 = vmul.f32 0.01, %v1406_v16  ;;  %v1312_v39 = vadd.f32 %v1311_v21, %v5534_v41  ;;  %v1411_v24 = vadd.f32 %v5545_v10, %v1320_v17 }
 0x260   : > { %v4057_v27 = vpop.f32.mrf.mxu0  ;;  %v1504_v29 = vsel %vm1440_vm9, %v1408_v3, %v1472_v36  ;;  %v1153_v36 = vpop.f32.mrf.mxu1 }
 0x261   : > { %v1409_v30 = vadd.f32 %v5545_v10, %v1312_v39  ;;  %v1323_v40 = vadd.f32 %v4057_v27, %v5536_v42  ;;  %v1502_v38 = vsel %vm1438_vm11, %v1406_v16, %v1470_v22  ;;  %v1530_v41 = vpack.c.bf16 %v1504_v29, %v1503_v28 }
 0x262   : > { %v1314_v37 = vpop.f32.mrf.mxu0  ;;  %vm1443_vm12 = vcmp.gt.f32.partialorder %v1411_v24, 0.0  ;;  %v1475_v47 = vmul.f32 0.01, %v1411_v24  ;;  %v1529_v49 = vpack.c.bf16 %v1502_v38, %v1501_v33 }
 0x263   : > { %v1412_v44 = vadd.f32 %v5545_v10, %v1323_v40  ;;  %v1315_v46 = vadd.f32 %v1314_v37, %v5538_v43  ;;  %v1473_v51 = vmul.f32 0.01, %v1409_v30  ;;  %vm1441_vm14 = vcmp.gt.f32.partialorder %v1409_v30, 0.0 }
 0x264   : > { %v4060_v48 = vpop.f32.mrf.mxu0  ;;  %4146 = vmatprep.mubr.bf16.mxu0 %v1529_v49  ;;  %v1507_v59 = vsel %vm1443_vm12, %v1411_v24, %v1475_v47 }
 0x265   : > { %vm1444_vm13 = vcmp.gt.f32.partialorder %v1412_v44, 0.0  ;;  %v1476_v52 = vmul.f32 0.01, %v1412_v44  ;;  %v1410_v53 = vadd.f32 %v5545_v10, %v1315_v46  ;;  %v1336_v42 = vadd.f32 %v4060_v48, %v5540_v5  ;;  %4147 = vmatmul.mubr.bf16.gmra.mxu0 %v1530_v41 }
 0x266   : > { %v1327_v55 = vpop.f32.mrf.mxu0  ;;  %v1505_v5 = vsel %vm1441_vm14, %v1409_v30, %v1473_v51 }
 0x267   : > { %vm1442_vm15 = vcmp.gt.f32.partialorder %v1410_v53, 0.0  ;;  %v1474_v56 = vmul.f32 0.01, %v1410_v53  ;;  %v1328_v43 = vadd.f32 %v1327_v55, %v5547_v14  ;;  %v1415_v57 = vadd.f32 %v5545_v10, %v1336_v42 }
 0x268   : > { %v4061_v58 = vpop.f32.mrf.mxu0  ;;  %v1508_v60 = vsel %vm1444_vm13, %v1412_v44, %v1476_v52 }
 0x269   : > { %v1413_v61 = vadd.f32 %v5545_v10, %v1328_v43  ;;  %v1339_v63 = vadd.f32 %v4061_v58, %v5552_v23  ;;  %v1506_v1 = vsel %vm1442_vm15, %v1410_v53, %v1474_v56  ;;  %v1532_v12 = vpack.c.bf16 %v1508_v60, %v1507_v59 }
 0x26a   : > { %v1330_v50 = vpop.f32.mrf.mxu0  ;;  %vm1447_vm0 = vcmp.gt.f32.partialorder %v1415_v57, 0.0  ;;  %v1479_v14 = vmul.f32 0.01, %v1415_v57  ;;  %v1531_v20 = vpack.c.bf16 %v1506_v1, %v1505_v5 }
 0x26b   : > { %v1416_v2 = vadd.f32 %v5545_v10, %v1339_v63  ;;  %v1331_v4 = vadd.f32 %v1330_v50, %v5555_v45  ;;  %v1477_v13 = vmul.f32 0.01, %v1413_v61  ;;  %vm1445_vm2 = vcmp.gt.f32.partialorder %v1413_v61, 0.0 }
 0x26c   : > { %v4064_v19 = vpop.f32.mrf.mxu0  ;;  %4150 = vmatprep.mubr.bf16.mxu0 %v1531_v20  ;;  %v1511_v8 = vsel %vm1447_vm0, %v1415_v57, %v1479_v14 }
 0x26d   : > { %vm1448_vm1 = vcmp.gt.f32.partialorder %v1416_v2, 0.0  ;;  %v1480_v26 = vmul.f32 0.01, %v1416_v2  ;;  %v1414_v31 = vadd.f32 %v5545_v10, %v1331_v4  ;;  %v1352_v23 = vadd.f32 %v4064_v19, %v5561_v62  ;;  %4151 = vmatmul.mubr.bf16.gmra.mxu0 %v1532_v12 }
 0x26e   : > { %v1343_v3 = vpop.f32.mrf.mxu0  ;;  %v1509_v62 = vsel %vm1445_vm2, %v1413_v61, %v1477_v13 }
 0x26f   : > { %vm1446_vm3 = vcmp.gt.f32.partialorder %v1414_v31, 0.0  ;;  %v1478_v6 = vmul.f32 0.01, %v1414_v31  ;;  %v1344_v45 = vadd.f32 %v1343_v3, %v5567_v25  ;;  %v1419_v7 = vadd.f32 %v5545_v10, %v1352_v23 }
 0x270   : > { %v4065_v35 = vpop.f32.mrf.mxu0  ;;  %v1512_v9 = vsel %vm1448_vm1, %v1416_v2, %v1480_v26 }
 0x271   : > { %v1417_v11 = vadd.f32 %v5545_v10, %v1344_v45  ;;  %v1355_v15 = vadd.f32 %v4065_v35, %v5574_v18  ;;  %v1510_v17 = vsel %vm1446_vm3, %v1414_v31, %v1478_v6  ;;  %v1534_v39 = vpack.c.bf16 %v1512_v9, %v1511_v8  ;;  %v4024_v18 = vpop.f32.mrf.mxu1 }
 0x272   : > { %v1346_v16 = vpop.f32.mrf.mxu0  ;;  %vm1451_vm4 = vcmp.gt.f32.partialorder %v1419_v7, 0.0  ;;  %v1483_v25 = vmul.f32 0.01, %v1419_v7  ;;  %v1533_v28 = vpack.c.bf16 %v1510_v17, %v1509_v62 }
 0x273   : > { %v1420_v21 = vadd.f32 %v5545_v10, %v1355_v15  ;;  %v1347_v22 = vadd.f32 %v1346_v16, %v5581_v34  ;;  %v1481_v24 = vmul.f32 0.01, %v1417_v11  ;;  %vm1449_vm6 = vcmp.gt.f32.partialorder %v1417_v11, 0.0  ;;  %v1166_v49 = vpop.f32.mrf.mxu1 }
 0x274   : > { %v4068_v27 = vpop.f32.mrf.mxu0  ;;  %4154 = vmatprep.mubr.bf16.mxu0 %v1533_v28  ;;  %v1515_v46 = vsel %vm1451_vm4, %v1419_v7, %v1483_v25 }
 0x275   : > { %vm1452_vm5 = vcmp.gt.f32.partialorder %v1420_v21, 0.0  ;;  %v1484_v29 = vmul.f32 0.01, %v1420_v21  ;;  %v1418_v30 = vadd.f32 %v5545_v10, %v1347_v22  ;;  %v1368_v40 = vadd.f32 %v4068_v27, %v4020_v54  ;;  %4155 = vmatmul.mubr.bf16.gmra.mxu0 %v1534_v39  ;;  %v4025_v63 = vpop.f32.mrf.mxu1 }
 0x276   : > { %v1359_v33 = vpop.f32.mrf.mxu0  ;;  %v1513_v48 = vsel %vm1449_vm6, %v1417_v11, %v1481_v24 }
 0x277   : > { %vm1450_vm7 = vcmp.gt.f32.partialorder %v1418_v30, 0.0  ;;  %v1482_v37 = vmul.f32 0.01, %v1418_v30  ;;  %v1360_v38 = vadd.f32 %v1359_v33, %v1150_v0  ;;  %v1423_v34 = vadd.f32 %v5545_v10, %v1368_v40  ;;  %v1169_v20 = vpop.f32.mrf.mxu1 }
 0x278   : > { %v4069_v44 = vpop.f32.mrf.mxu0  ;;  %v1516_v41 = vsel %vm1452_vm5, %v1420_v21, %v1484_v29 }
 0x279   : > { %v1421_v47 = vadd.f32 %v5545_v10, %v1360_v38  ;;  %v1371_v51 = vadd.f32 %v4069_v44, %v4021_v32  ;;  %v1514_v53 = vsel %vm1450_vm7, %v1418_v30, %v1482_v37  ;;  %v1536_v55 = vpack.c.bf16 %v1516_v41, %v1515_v46  ;;  %v4092_v21 = vpop.f32.mrf.mxu1 }
 0x27a   : > { %v1362_v52 = vpop.f32.mrf.mxu0  ;;  %vm1455_vm8 = vcmp.gt.f32.partialorder %v1423_v34, 0.0  ;;  %v1487_v56 = vmul.f32 0.01, %v1423_v34  ;;  %v1535_v58 = vpack.c.bf16 %v1514_v53, %v1513_v48 }
 0x27b   : > { %v1424_v42 = vadd.f32 %v5545_v10, %v1371_v51  ;;  %v1363_v54 = vadd.f32 %v1362_v52, %v1153_v36  ;;  %v1485_v43 = vmul.f32 0.01, %v1421_v47  ;;  %vm1453_vm10 = vcmp.gt.f32.partialorder %v1421_v47, 0.0  ;;  %v1655_v22 = vpop.f32.mrf.mxu1 }
 0x27c   : > { %v4072_v57 = vpop.f32.mrf.mxu0  ;;  %4158 = vmatprep.mubr.bf16.mxu0 %v1535_v58  ;;  %v1519_v4 = vsel %vm1455_vm8, %v1423_v34, %v1487_v56  ;;  %v2287_v58 = vlaneseq }
 0x27d   : > { %vm1456_vm9 = vcmp.gt.f32.partialorder %v1424_v42, 0.0  ;;  %v1488_v59 = vmul.f32 0.01, %v1424_v42  ;;  %v1422_v60 = vadd.f32 %v5545_v10, %v1363_v54  ;;  %v1384_v61 = vadd.f32 %v4072_v57, %v4024_v18  ;;  %4159 = vmatmul.mubr.bf16.gmra.mxu0 %v1536_v55  ;;  %v4093_v39 = vpop.f32.mrf.mxu1 }
 0x27e   : > { %v1375_v5 = vpop.f32.mrf.mxu0  ;;  %v1517_v19 = vsel %vm1453_vm10, %v1421_v47, %v1485_v43 }
 0x27f   : > { %vm1454_vm11 = vcmp.gt.f32.partialorder %v1422_v60, 0.0  ;;  %v1486_v0 = vmul.f32 0.01, %v1422_v60  ;;  %v1376_v50 = vadd.f32 %v1375_v5, %v1166_v49  ;;  %v1427_v1 = vadd.f32 %v5545_v10, %v1384_v61  ;;  %v5614_v25 = vpop.f32.mrf.mxu1 }
 0x280   : > { %v4073_v2 = vpop.f32.mrf.mxu0  ;;  %v1520_v12 = vsel %vm1456_vm9, %v1424_v42, %v1488_v59 }
 0x281   : > { %v1425_v14 = vadd.f32 %v5545_v10, %v1376_v50  ;;  %v1387_v13 = vadd.f32 %v4073_v2, %v4025_v63  ;;  %v1518_v31 = vsel %vm1454_vm11, %v1422_v60, %v1486_v0  ;;  %v1538_v6 = vpack.c.bf16 %v1520_v12, %v1519_v4  ;;  %v5616_v24 = vpop.f32.mrf.mxu1  ;;  %v5679_v50 = vld [vmem:[%s7567_s9] ss:$0 sm:$0xff] }
 0x282   : > { %v1378_v26 = vpop.f32.mrf.mxu0  ;;  %v1491_v45 = vmul.f32 0.01, %v1427_v1  ;;  %v1537_v7 = vpack.c.bf16 %v1518_v31, %v1517_v19  ;;  %vm1459_vm13 = vcmp.gt.f32.partialorder %v1427_v1, 0.0  ;;  %v5672_v60 = vand.u32 127, %v2287_v58 }
 0x283   : > { %v1489_v23 = vmul.f32 0.01, %v1425_v14  ;;  %v1428_v32 = vadd.f32 %v5545_v10, %v1387_v13  ;;  %v1379_v3 = vadd.f32 %v1378_v26, %v1169_v20  ;;  %vm1457_vm12 = vcmp.gt.f32.partialorder %v1425_v14, 0.0 }
 0x284   : > { %4162 = vmatprep.mubr.bf16.mxu0 %v1537_v7  ;;  %v1523_v15 = vsel %vm1459_vm13, %v1427_v1, %v1491_v45  ;;  %7745 = vst [vmem:[#allocation20_spill] sm:$0xff] %v5672_v60  ;;  %vm2708_vm0 = vcmp.ge.s32.totalorder %v5672_v60, 7  ;;  %vm2709_vm1 = vcmp.lt.s32.totalorder %v5672_v60, 14  ;;  %vm2321_vm2 = vcmp.ge.s32.totalorder %v5672_v60, 1 }
 0x285   : > { %vm1460_vm14 = vcmp.gt.f32.partialorder %v1428_v32, 0.0  ;;  %v1492_v35 = vmul.f32 0.01, %v1428_v32  ;;  %v1426_v8 = vadd.f32 %v5545_v10, %v1379_v3  ;;  %4163 = vmatmul.mubr.bf16.gmra.mxu0 %v1538_v6  ;;  %v1521_v11 = vsel %vm1457_vm12, %v1425_v14, %v1489_v23  ;;  %v5618_v10 = vpop.f32.mrf.mxu1  ;;  %vm5683_vm4 = vmand %vm2708_vm0, %vm2709_vm1 }
 0x286   : > { %vm2322_vm3 = vcmp.lt.s32.totalorder %v5672_v60, 6  ;;  %vm3095_vm6 = vcmp.ge.s32.totalorder %v5672_v60, 14  ;;  %vm3096_vm7 = vcmp.lt.s32.totalorder %v5672_v60, 17 }
 0x287   : > { %vm1458_vm15 = vcmp.gt.f32.partialorder %v1426_v8, 0.0  ;;  %v1490_v9 = vmul.f32 0.01, %v1426_v8  ;;  %v1524_v62 = vsel %vm1460_vm14, %v1428_v32, %v1492_v35  ;;  %v5620_v27 = vpop.f32.mrf.mxu1  ;;  %vm5690_vm5 = vmand %vm2321_vm2, %vm2322_vm3 }
 0x288   : > { %v1540_v17 = vpack.c.bf16 %v1524_v62, %v1523_v15  ;;  %vm5711_vm8 = vmand %vm3095_vm6, %vm3096_vm7 }
 0x289   : > { %v1522_v36 = vsel %vm1458_vm15, %v1426_v8, %v1490_v9  ;;  %v5622_v28 = vpop.f32.mrf.mxu1 }
 0x28a   : > { %v1539_v16 = vpack.c.bf16 %v1522_v36, %v1521_v11 }
 0x28b   : > { %v5624_v29 = vpop.f32.mrf.mxu1 }
 0x28c   : > { %4166 = vmatprep.mubr.bf16.mxu0 %v1539_v16 }
 0x28d   : > { %4167 = vmatmul.mubr.bf16.gmra.mxu0 %v1540_v17  ;;  %v5626_v30 = vpop.f32.mrf.mxu1 }
 0x28f   : > { %v5628_v40 = vpop.f32.mrf.mxu1 }
 0x291   : > { %v5630_v18 = vpop.f32.mrf.mxu1 }
 0x293   : > { %v5632_v33 = vpop.f32.mrf.mxu1 }
 0x295   : > { %v5634_v37 = vpop.f32.mrf.mxu1 }
 0x297   : > { %v5636_v38 = vpop.f32.mrf.mxu1 }
 0x299   : > { %v5638_v34 = vpop.f32.mrf.mxu1 }
 0x29b   : > { %v5640_v44 = vpop.f32.mrf.mxu1 }
 0x29d   : > { %v5642_v46 = vpop.f32.mrf.mxu1 }
 0x29f   : > { %v5644_v41 = vpop.f32.mrf.mxu1 }
 0x2a1   : > { %v5646_v47 = vpop.f32.mrf.mxu1 }
 0x2a3   : > { %v5648_v51 = vpop.f32.mrf.mxu1 }
 0x2a5   : > { %v5650_v48 = vpop.f32.mrf.mxu1 }
 0x2a7   : > { %v5652_v49 = vpop.f32.mrf.mxu1 }
 0x2a9   : > { %v5654_v52 = vpop.f32.mrf.mxu1 }
 0x2ab   : > { %v5656_v53 = vpop.f32.mrf.mxu1 }
 0x2ad   : > { %v5658_v42 = vpop.f32.mrf.mxu1 }
 0x2af   : > { %v5660_v54 = vpop.f32.mrf.mxu1 }
 0x2b1   : > { %v5662_v55 = vpop.f32.mrf.mxu1 }
 0x2b3   : > { %v5664_v56 = vpop.f32.mrf.mxu1 }
 0x2b5   : > { %v5666_v43 = vpop.f32.mrf.mxu1 }
 0x2b7   : > { %v5668_v57 = vpop.f32.mrf.mxu1 }
 0x2b9   : > { %v5670_v59 = vpop.f32.mrf.mxu1 }
 0x2bb   : > { %v4188_v61 = vpop.f32.mrf.mxu1 }
 0x2bd   : > { %v2089_v0 = vpop.f32.mrf.mxu1 }
 0x2bf   : > { %v4189_v26 = vpop.f32.mrf.mxu1 }
 0x2c1   : > { %v2092_v8 = vpop.f32.mrf.mxu1 }
 0x2c3   : > { %v4192_v16 = vpop.f32.mrf.mxu1 }
 0x315   : > { %v4140_v63 = vpop.f32.mrf.mxu0 }
 0x316   : > { %v1873_v5 = vadd.f32 %v4140_v63, %v4092_v21 }
 0x317   : > { %v1864_v1 = vpop.f32.mrf.mxu0 }
 0x318   : > { %v2218_v2 = vadd.f32 %v4188_v61, %v1873_v5  ;;  %v1865_v4 = vadd.f32 %v1864_v1, %v1655_v22 }
 0x319   : > { %v4141_v12 = vpop.f32.mrf.mxu0 }
 0x31a   : > { %v5688_v13 = vadd.f32 %v5679_v50, %v2218_v2  ;;  %v1876_v19 = vadd.f32 %v4141_v12, %v4093_v39  ;;  %v2216_v32 = vadd.f32 %v2089_v0, %v1865_v4  ;;  %v2105_v39 = vpop.f32.mrf.mxu1 }
 0x31b   : > { %v1867_v31 = vpop.f32.mrf.mxu0 }
 0x31c   : > { %7748 = vst [vmem:[#allocation21_spill] sm:$0xff] %v5688_v13  ;;  %v2219_v23 = vadd.f32 %v4189_v26, %v1876_v19  ;;  %v5699_v3 = vsel %vm5683_vm4, %v5688_v13, -1e+30  ;;  %v5704_v6 = vsel %vm5690_vm5, %v5688_v13, -1e+30  ;;  %v5716_v9 = vadd.f32 %v5679_v50, %v2216_v32  ;;  %v4193_v1 = vpop.f32.mrf.mxu1 }
 0x31d   : > { %2747 = vmax.xlane.f32.xlu0 %v5699_v3  ;;  %2360 = vmax.xlane.f32.xlu1 %v5704_v6  ;;  %v4144_v7 = vpop.f32.mrf.mxu0  ;;  %v1868_v11 = vadd.f32 %v1867_v31, %v5614_v25  ;;  %v5722_v15 = vsel %vm5711_vm8, %v5688_v13, -1e+30 }
 0x31e   : > { %v5707_v45 = vadd.f32 %v5679_v50, %v2219_v23  ;;  %7754 = vst [vmem:[#allocation23_spill] sm:$0xff] %v5716_v9  ;;  %v5739_v22 = vsel %vm5690_vm5, %v5716_v9, -1e+30  ;;  %v1889_v58 = vadd.f32 %v4144_v7, %v5616_v24  ;;  %v5756_v0 = vsel %vm5683_vm4, %v5716_v9, -1e+30 }
 0x31f   : > { %v1880_v36 = vpop.f32.mrf.mxu0  ;;  %v2217_v17 = vadd.f32 %v2092_v8, %v1868_v11  ;;  %v5768_v4 = vsel %vm5711_vm8, %v5716_v9, -1e+30 }
 0x320   : > { %7751 = vst [vmem:[#allocation22_spill] sm:$0xff] %v5707_v45  ;;  %v5727_v62 = vsel %vm5690_vm5, %v5707_v45, -1e+30  ;;  %v5734_v21 = vsel %vm5683_vm4, %v5707_v45, -1e+30  ;;  %v2222_v24 = vadd.f32 %v4192_v16, %v1889_v58  ;;  %v1881_v32 = vadd.f32 %v1880_v36, %v5618_v10  ;;  %v2108_v16 = vpop.f32.mrf.mxu1 }
 0x321   : > { %3134 = vmax.xlane.f32.xlu0 %v5722_v15  ;;  %2362 = vmax.xlane.f32.xlu1 %v5727_v62  ;;  %v4145_v25 = vpop.f32.mrf.mxu0  ;;  %v5745_v61 = vadd.f32 %v5679_v50, %v2217_v17  ;;  %v5751_v5 = vsel %vm5711_vm8, %v5707_v45, -1e+30 }
 0x322   : > { %v1892_v63 = vadd.f32 %v4145_v25, %v5620_v27  ;;  %v5773_v12 = vadd.f32 %v5679_v50, %v2222_v24  ;;  %v2220_v25 = vadd.f32 %v2105_v39, %v1881_v32 }
 0x323   : > { %7755 = vst [vmem:[#allocation24_spill] sm:$0xff] %v5745_v61  ;;  %v5763_v27 = vsel %vm5683_vm4, %v5745_v61, -1e+30  ;;  %v5781_v26 = vsel %vm5711_vm8, %v5745_v61, -1e+30  ;;  %v1883_v23 = vpop.f32.mrf.mxu0 }
 0x324   : > { %v2223_v2 = vadd.f32 %v4193_v1, %v1892_v63  ;;  %7756 = vst [vmem:[#allocation25_spill] sm:$0xff] %v5773_v12  ;;  %v5786_v31 = vsel %vm5690_vm5, %v5745_v61, -1e+30  ;;  %v1884_v7 = vadd.f32 %v1883_v23, %v5622_v28  ;;  %v5800_v11 = vsel %vm5690_vm5, %v5773_v12, -1e+30  ;;  %v4196_v63 = vpop.f32.mrf.mxu1 }
 0x325   : > { %2749 = vmax.xlane.f32.xlu1 %v5734_v21  ;;  %2356 = vmax.xlane.f32.xlu0 %v5739_v22  ;;  %v4148_v17 = vpop.f32.mrf.mxu0  ;;  %v5812_v36 = vsel %vm5683_vm4, %v5773_v12, -1e+30  ;;  %v5817_v1 = vadd.f32 %v5679_v50, %v2220_v25 }
 0x326   : > { %v5776_v19 = vadd.f32 %v5679_v50, %v2223_v2  ;;  %v2221_v10 = vadd.f32 %v2108_v16, %v1884_v7  ;;  %v5830_v2 = vsel %vm5711_vm8, %v5773_v12, -1e+30  ;;  %v2121_v23 = vpop.f32.mrf.mxu1  ;;  %v1905_v7 = vadd.f32 %v4148_v17, %v5624_v29 }
 0x327   : > { %v1896_v58 = vpop.f32.mrf.mxu0  ;;  %7758 = vst [vmem:[#allocation27_spill] sm:$0xff] %v5817_v1 }
 0x328   : > { %7757 = vst [vmem:[#allocation26_spill] sm:$0xff] %v5776_v19  ;;  %v5795_v8 = vsel %vm5690_vm5, %v5776_v19, -1e+30  ;;  %v5807_v28 = vsel %vm5683_vm4, %v5776_v19, -1e+30  ;;  %v5820_v39 = vadd.f32 %v5679_v50, %v2221_v10  ;;  %v4197_v60 = vpop.f32.mrf.mxu1 }
 0x329   : > { %3136 = vmax.xlane.f32.xlu1 %v5751_v5  ;;  %2743 = vmax.xlane.f32.xlu0 %v5756_v0  ;;  %v5825_v24 = vsel %vm5711_vm8, %v5776_v19, -1e+30  ;;  %v4149_v32 = vpop.f32.mrf.mxu0  ;;  %v5844_v10 = vsel %vm5690_vm5, %v5817_v1, -1e+30  ;;  %v2226_v19 = vadd.f32 %v4196_v63, %v1905_v7 }
 0x32a   : > { %7759 = vst [vmem:[#allocation28_spill] sm:$0xff] %v5820_v39  ;;  %v1908_v16 = vadd.f32 %v4149_v32, %v5628_v40  ;;  %v5839_v25 = vsel %vm5690_vm5, %v5820_v39, -1e+30  ;;  %v5851_v29 = vsel %vm5683_vm4, %v5820_v39, -1e+30  ;;  %v2124_v61 = vpop.f32.mrf.mxu1 }
 0x32b   : > { %v5856_v40 = vsel %vm5683_vm4, %v5817_v1, -1e+30  ;;  %v5861_v17 = vadd.f32 %v5679_v50, %v2226_v19  ;;  %v5874_v32 = vsel %vm5711_vm8, %v5817_v1, -1e+30  ;;  %v1899_v7 = vpop.f32.mrf.mxu0  ;;  %v1897_v19 = vadd.f32 %v1896_v58, %v5626_v30 }
 0x32c   : > { %v2227_v12 = vadd.f32 %v4197_v60, %v1908_v16  ;;  %v5869_v60 = vsel %vm5711_vm8, %v5820_v39, -1e+30  ;;  %v4200_v9 = vpop.f32.mrf.mxu1 }
 0x32d   : > { %2745 = vmax.xlane.f32.xlu1 %v5763_v27  ;;  %3130 = vmax.xlane.f32.xlu0 %v5768_v4  ;;  %7760 = vst [vmem:[#allocation29_spill] sm:$0xff] %v5861_v17  ;;  %v5888_v39 = vsel %vm5690_vm5, %v5861_v17, -1e+30  ;;  %v4152_v1 = vpop.f32.mrf.mxu0  ;;  %v2224_v45 = vadd.f32 %v2121_v23, %v1897_v19  ;;  %v5900_v58 = vsel %vm5683_vm4, %v5861_v17, -1e+30 }
 0x32e   : > { %v5864_v63 = vadd.f32 %v5679_v50, %v2227_v12  ;;  %v1900_v12 = vadd.f32 %v1899_v7, %v5630_v18  ;;  %7763 = vst [vmem:[#allocation32_spill] sm:$0xff] %v5900_v58  ;;  %v5918_v19 = vsel %vm5711_vm8, %v5861_v17, -1e+30 }
 0x32f   : > { %v1912_v7 = vpop.f32.mrf.mxu0  ;;  %v5905_v13 = vadd.f32 %v5679_v50, %v2224_v45  ;;  %7767 = vst [vmem:[#allocation36_spill] sm:$0xff] %v5918_v19  ;;  %v1921_v45 = vadd.f32 %v4152_v1, %v5632_v33 }
 0x330   : > { %7761 = vst [vmem:[#allocation30_spill] sm:$0xff] %v5864_v63  ;;  %v5883_v16 = vsel %vm5690_vm5, %v5864_v63, -1e+30  ;;  %v2225_v30 = vadd.f32 %v2124_v61, %v1900_v12  ;;  %v5895_v18 = vsel %vm5683_vm4, %v5864_v63, -1e+30 }
 0x331   : > { %3132 = vmax.xlane.f32.xlu1 %v5781_v26  ;;  %2358 = vmax.xlane.f32.xlu0 %v5786_v31  ;;  %7762 = vst [vmem:[#allocation31_spill] sm:$0xff] %v5895_v18  ;;  %7764 = vst [vmem:[#allocation33_spill] sm:$0xff] %v5905_v13  ;;  %v5913_v23 = vsel %vm5711_vm8, %v5864_v63, -1e+30  ;;  %v4153_v12 = vpop.f32.mrf.mxu0  ;;  %v5932_v17 = vsel %vm5690_vm5, %v5905_v13, -1e+30 }
 0x332   : > { %v5908_v61 = vadd.f32 %v5679_v50, %v2225_v30  ;;  %7766 = vst [vmem:[#allocation35_spill] sm:$0xff] %v5913_v23  ;;  %v1924_v30 = vadd.f32 %v4153_v12, %v5636_v38  ;;  %v5944_v38 = vsel %vm5683_vm4, %v5905_v13, -1e+30  ;;  %v5962_v12 = vsel %vm5711_vm8, %v5905_v13, -1e+30 }
 0x333   : > { %7768 = vst [vmem:[#allocation37_spill] sm:$0xff] %v5944_v38  ;;  %7772 = vst [vmem:[#allocation41_spill] sm:$0xff] %v5962_v12 }
 0x334   : > { %7765 = vst [vmem:[#allocation34_spill] sm:$0xff] %v5908_v61  ;;  %v5927_v63 = vsel %vm5690_vm5, %v5908_v61, -1e+30  ;;  %v5939_v33 = vsel %vm5683_vm4, %v5908_v61, -1e+30 }
 0x335   : > { %2370 = vmax.xlane.f32.xlu1 %v5795_v8  ;;  %2368 = vmax.xlane.f32.xlu0 %v5800_v11 }
 0x339   : > { %2757 = vmax.xlane.f32.xlu1 %v5807_v28  ;;  %2755 = vmax.xlane.f32.xlu0 %v5812_v36 }
 0x33d   : > { %3144 = vmax.xlane.f32.xlu1 %v5825_v24  ;;  %3142 = vmax.xlane.f32.xlu0 %v5830_v2 }
 0x341   : > { %2366 = vmax.xlane.f32.xlu1 %v5839_v25  ;;  %2364 = vmax.xlane.f32.xlu0 %v5844_v10 }
 0x345   : > { %2753 = vmax.xlane.f32.xlu1 %v5851_v29  ;;  %2751 = vmax.xlane.f32.xlu0 %v5856_v40 }
 0x349   : > { %3140 = vmax.xlane.f32.xlu1 %v5869_v60  ;;  %3138 = vmax.xlane.f32.xlu0 %v5874_v32 }
 0x34d   : > { %2378 = vmax.xlane.f32.xlu1 %v5883_v16  ;;  %2376 = vmax.xlane.f32.xlu0 %v5888_v39 }
 0x351   : > { %2765 = vmax.xlane.f32.xlu1 %v5895_v18  ;;  %2763 = vmax.xlane.f32.xlu0 %v5900_v58  ;;  %v2137_v18 = vpop.f32.mrf.mxu1 }
 0x353   : > { %v4201_v58 = vpop.f32.mrf.mxu1 }
 0x355   : > { %3152 = vmax.xlane.f32.xlu1 %v5913_v23  ;;  %3150 = vmax.xlane.f32.xlu0 %v5918_v19  ;;  %v2230_v19 = vadd.f32 %v4200_v9, %v1921_v45  ;;  %v2231_v23 = vadd.f32 %v4201_v58, %v1924_v30  ;;  %v5957_v58 = vsel %vm5711_vm8, %v5908_v61, -1e+30  ;;  %v1915_v45 = vpop.f32.mrf.mxu0 }
 0x356   : > { %7771 = vst [vmem:[#allocation40_spill] sm:$0xff] %v5957_v58 }
 0x357   : > { %v5949_v1 = vadd.f32 %v5679_v50, %v2230_v19  ;;  %v5952_v9 = vadd.f32 %v5679_v50, %v2231_v23  ;;  %v1913_v19 = vadd.f32 %v1912_v7, %v5634_v37  ;;  %v1916_v23 = vadd.f32 %v1915_v45, %v5638_v34  ;;  %v4156_v13 = vpop.f32.mrf.mxu0 }
 0x359   : > { %2374 = vmax.xlane.f32.xlu1 %v5927_v63  ;;  %2372 = vmax.xlane.f32.xlu0 %v5932_v17  ;;  %7769 = vst [vmem:[#allocation38_spill] sm:$0xff] %v5949_v1  ;;  %7770 = vst [vmem:[#allocation39_spill] sm:$0xff] %v5952_v9  ;;  %v5971_v30 = vsel %vm5690_vm5, %v5952_v9, -1e+30  ;;  %v5976_v61 = vsel %vm5690_vm5, %v5949_v1, -1e+30  ;;  %v1928_v45 = vpop.f32.mrf.mxu0 }
 0x35a   : > { %7773 = vst [vmem:[#allocation42_spill] sm:$0xff] %v5971_v30  ;;  %7774 = vst [vmem:[#allocation43_spill] sm:$0xff] %v5976_v61  ;;  %v5983_v34 = vsel %vm5683_vm4, %v5952_v9, -1e+30  ;;  %v5988_v7 = vsel %vm5683_vm4, %v5949_v1, -1e+30 }
 0x35b   : > { %7775 = vst [vmem:[#allocation44_spill] sm:$0xff] %v5983_v34  ;;  %7776 = vst [vmem:[#allocation45_spill] sm:$0xff] %v5988_v7 }
 0x35d   : > { %2761 = vmax.xlane.f32.xlu1 %v5939_v33  ;;  %2759 = vmax.xlane.f32.xlu0 %v5944_v38  ;;  %v2140_v38 = vpop.f32.mrf.mxu1 }
 0x35e   : > { %v2229_v37 = vadd.f32 %v2140_v38, %v1916_v23  ;;  %v6001_v38 = vsel %vm5711_vm8, %v5952_v9, -1e+30  ;;  %v4157_v23 = vpop.f32.mrf.mxu0 }
 0x35f   : > { %7779 = vst [vmem:[#allocation48_spill] sm:$0xff] %v6001_v38 }
 0x361   : > { %3148 = vmax.xlane.f32.xlu1 %v5957_v58  ;;  %3146 = vmax.xlane.f32.xlu0 %v5962_v12  ;;  %v2228_v12 = vadd.f32 %v2137_v18, %v1913_v19  ;;  %v4204_v58 = vpop.f32.mrf.mxu1  ;;  %v5996_v18 = vadd.f32 %v5679_v50, %v2229_v37  ;;  %v6006_v19 = vsel %vm5711_vm8, %v5949_v1, -1e+30  ;;  %v1940_v37 = vadd.f32 %v4157_v23, %v5644_v41 }
 0x362   : > { %7780 = vst [vmem:[#allocation49_spill] sm:$0xff] %v6006_v19 }
 0x363   : > { %7778 = vst [vmem:[#allocation47_spill] sm:$0xff] %v5996_v18  ;;  %v6015_v9 = vsel %vm5690_vm5, %v5996_v18, -1e+30 }
 0x364   : > { %7781 = vst [vmem:[#allocation50_spill] sm:$0xff] %v6015_v9 }
 0x365   : > { %2386 = vmax.xlane.f32.xlu1 %v5971_v30  ;;  %2384 = vmax.xlane.f32.xlu0 %v5976_v61  ;;  %v5993_v61 = vadd.f32 %v5679_v50, %v2228_v12  ;;  %v1937_v12 = vadd.f32 %v4156_v13, %v5640_v44  ;;  %v6027_v44 = vsel %vm5683_vm4, %v5996_v18, -1e+30 }
 0x366   : > { %7783 = vst [vmem:[#allocation52_spill] sm:$0xff] %v6027_v44 }
 0x367   : > { %7777 = vst [vmem:[#allocation46_spill] sm:$0xff] %v5993_v61  ;;  %v6020_v1 = vsel %vm5690_vm5, %v5993_v61, -1e+30  ;;  %v6032_v41 = vsel %vm5683_vm4, %v5993_v61, -1e+30 }
 0x368   : > { %7782 = vst [vmem:[#allocation51_spill] sm:$0xff] %v6020_v1  ;;  %7784 = vst [vmem:[#allocation53_spill] sm:$0xff] %v6032_v41  ;;  %v6050_v23 = vsel %vm5711_vm8, %v5993_v61, -1e+30 }
 0x369   : > { %2773 = vmax.xlane.f32.xlu1 %v5983_v34  ;;  %2771 = vmax.xlane.f32.xlu0 %v5988_v7  ;;  %v2153_v34 = vpop.f32.mrf.mxu1  ;;  %7788 = vst [vmem:[#allocation57_spill] sm:$0xff] %v6050_v23 }
 0x36b   : > { %v4205_v7 = vpop.f32.mrf.mxu1 }
 0x36d   : > { %3160 = vmax.xlane.f32.xlu1 %v6001_v38  ;;  %3158 = vmax.xlane.f32.xlu0 %v6006_v19  ;;  %v2234_v19 = vadd.f32 %v4204_v58, %v1937_v12  ;;  %v2235_v38 = vadd.f32 %v4205_v7, %v1940_v37  ;;  %v6045_v7 = vsel %vm5711_vm8, %v5996_v18, -1e+30  ;;  %v1931_v12 = vpop.f32.mrf.mxu0 }
 0x36e   : > { %7787 = vst [vmem:[#allocation56_spill] sm:$0xff] %v6045_v7 }
 0x36f   : > { %v6037_v13 = vadd.f32 %v5679_v50, %v2234_v19  ;;  %v6040_v58 = vadd.f32 %v5679_v50, %v2235_v38  ;;  %v1929_v19 = vadd.f32 %v1928_v45, %v5642_v46  ;;  %v1932_v38 = vadd.f32 %v1931_v12, %v5646_v47  ;;  %v4160_v61 = vpop.f32.mrf.mxu0 }
 0x371   : > { %2382 = vmax.xlane.f32.xlu1 %v6015_v9  ;;  %2380 = vmax.xlane.f32.xlu0 %v6020_v1  ;;  %7785 = vst [vmem:[#allocation54_spill] sm:$0xff] %v6037_v13  ;;  %7786 = vst [vmem:[#allocation55_spill] sm:$0xff] %v6040_v58  ;;  %v6059_v37 = vsel %vm5690_vm5, %v6040_v58, -1e+30  ;;  %v6064_v18 = vsel %vm5690_vm5, %v6037_v13, -1e+30  ;;  %v1944_v12 = vpop.f32.mrf.mxu0 }
 0x372   : > { %7789 = vst [vmem:[#allocation58_spill] sm:$0xff] %v6059_v37  ;;  %7790 = vst [vmem:[#allocation59_spill] sm:$0xff] %v6064_v18  ;;  %v6071_v47 = vsel %vm5683_vm4, %v6040_v58, -1e+30  ;;  %v6076_v45 = vsel %vm5683_vm4, %v6037_v13, -1e+30 }
 0x373   : > { %7791 = vst [vmem:[#allocation60_spill] sm:$0xff] %v6071_v47  ;;  %7792 = vst [vmem:[#allocation61_spill] sm:$0xff] %v6076_v45 }
 0x375   : > { %2769 = vmax.xlane.f32.xlu1 %v6027_v44  ;;  %2767 = vmax.xlane.f32.xlu0 %v6032_v41  ;;  %v2156_v41 = vpop.f32.mrf.mxu1 }
 0x376   : > { %v2233_v46 = vadd.f32 %v2156_v41, %v1932_v38  ;;  %v6089_v41 = vsel %vm5711_vm8, %v6040_v58, -1e+30  ;;  %v4161_v38 = vpop.f32.mrf.mxu0 }
 0x377   : > { %7795 = vst [vmem:[#allocation64_spill] sm:$0xff] %v6089_v41 }
 0x379   : > { %3156 = vmax.xlane.f32.xlu1 %v6045_v7  ;;  %3154 = vmax.xlane.f32.xlu0 %v6050_v23  ;;  %v2232_v23 = vadd.f32 %v2153_v34, %v1929_v19  ;;  %v4208_v7 = vpop.f32.mrf.mxu1  ;;  %v6084_v34 = vadd.f32 %v5679_v50, %v2233_v46  ;;  %v6094_v19 = vsel %vm5711_vm8, %v6037_v13, -1e+30  ;;  %v1956_v46 = vadd.f32 %v4161_v38, %v5652_v49 }
 0x37a   : > { %7796 = vst [vmem:[#allocation65_spill] sm:$0xff] %v6094_v19 }
 0x37b   : > { %7794 = vst [vmem:[#allocation63_spill] sm:$0xff] %v6084_v34  ;;  %v6103_v58 = vsel %vm5690_vm5, %v6084_v34, -1e+30 }
 0x37c   : > { %7797 = vst [vmem:[#allocation66_spill] sm:$0xff] %v6103_v58 }
 0x37d   : > { %2394 = vmax.xlane.f32.xlu1 %v6059_v37  ;;  %2392 = vmax.xlane.f32.xlu0 %v6064_v18  ;;  %v6081_v18 = vadd.f32 %v5679_v50, %v2232_v23  ;;  %v1953_v23 = vadd.f32 %v4160_v61, %v5648_v51  ;;  %v6115_v51 = vsel %vm5683_vm4, %v6084_v34, -1e+30 }
 0x37e   : > { %7799 = vst [vmem:[#allocation68_spill] sm:$0xff] %v6115_v51 }
 0x37f   : > { %7793 = vst [vmem:[#allocation62_spill] sm:$0xff] %v6081_v18  ;;  %v6108_v13 = vsel %vm5690_vm5, %v6081_v18, -1e+30  ;;  %v6120_v49 = vsel %vm5683_vm4, %v6081_v18, -1e+30 }
 0x380   : > { %7798 = vst [vmem:[#allocation67_spill] sm:$0xff] %v6108_v13  ;;  %7800 = vst [vmem:[#allocation69_spill] sm:$0xff] %v6120_v49  ;;  %v6138_v38 = vsel %vm5711_vm8, %v6081_v18, -1e+30 }
 0x381   : > { %2781 = vmax.xlane.f32.xlu1 %v6071_v47  ;;  %2779 = vmax.xlane.f32.xlu0 %v6076_v45  ;;  %v2169_v47 = vpop.f32.mrf.mxu1  ;;  %7804 = vst [vmem:[#allocation73_spill] sm:$0xff] %v6138_v38 }
 0x383   : > { %v4209_v45 = vpop.f32.mrf.mxu1 }
 0x385   : > { %3168 = vmax.xlane.f32.xlu1 %v6089_v41  ;;  %3166 = vmax.xlane.f32.xlu0 %v6094_v19  ;;  %v2238_v19 = vadd.f32 %v4208_v7, %v1953_v23  ;;  %v2239_v41 = vadd.f32 %v4209_v45, %v1956_v46  ;;  %v6133_v45 = vsel %vm5711_vm8, %v6084_v34, -1e+30  ;;  %v1947_v23 = vpop.f32.mrf.mxu0 }
 0x386   : > { %7803 = vst [vmem:[#allocation72_spill] sm:$0xff] %v6133_v45 }
 0x387   : > { %v6125_v61 = vadd.f32 %v5679_v50, %v2238_v19  ;;  %v6128_v7 = vadd.f32 %v5679_v50, %v2239_v41  ;;  %v1945_v19 = vadd.f32 %v1944_v12, %v5650_v48  ;;  %v1948_v41 = vadd.f32 %v1947_v23, %v5654_v52  ;;  %v4164_v18 = vpop.f32.mrf.mxu0 }
 0x389   : > { %2390 = vmax.xlane.f32.xlu1 %v6103_v58  ;;  %2388 = vmax.xlane.f32.xlu0 %v6108_v13  ;;  %7801 = vst [vmem:[#allocation70_spill] sm:$0xff] %v6125_v61  ;;  %7802 = vst [vmem:[#allocation71_spill] sm:$0xff] %v6128_v7  ;;  %v6147_v46 = vsel %vm5690_vm5, %v6128_v7, -1e+30  ;;  %v6152_v34 = vsel %vm5690_vm5, %v6125_v61, -1e+30  ;;  %v1960_v23 = vpop.f32.mrf.mxu0 }
 0x38a   : > { %7805 = vst [vmem:[#allocation74_spill] sm:$0xff] %v6147_v46  ;;  %7806 = vst [vmem:[#allocation75_spill] sm:$0xff] %v6152_v34  ;;  %v6159_v52 = vsel %vm5683_vm4, %v6128_v7, -1e+30  ;;  %v6164_v12 = vsel %vm5683_vm4, %v6125_v61, -1e+30 }
 0x38b   : > { %7807 = vst [vmem:[#allocation76_spill] sm:$0xff] %v6159_v52  ;;  %7808 = vst [vmem:[#allocation77_spill] sm:$0xff] %v6164_v12 }
 0x38d   : > { %2777 = vmax.xlane.f32.xlu1 %v6115_v51  ;;  %2775 = vmax.xlane.f32.xlu0 %v6120_v49  ;;  %v2172_v49 = vpop.f32.mrf.mxu1 }
 0x38e   : > { %v2237_v48 = vadd.f32 %v2172_v49, %v1948_v41  ;;  %v6177_v49 = vsel %vm5711_vm8, %v6128_v7, -1e+30  ;;  %v4165_v41 = vpop.f32.mrf.mxu0 }
 0x38f   : > { %7811 = vst [vmem:[#allocation80_spill] sm:$0xff] %v6177_v49 }
 0x391   : > { %3164 = vmax.xlane.f32.xlu1 %v6133_v45  ;;  %3162 = vmax.xlane.f32.xlu0 %v6138_v38  ;;  %v2236_v38 = vadd.f32 %v2169_v47, %v1945_v19  ;;  %v4212_v45 = vpop.f32.mrf.mxu1  ;;  %v6172_v47 = vadd.f32 %v5679_v50, %v2237_v48  ;;  %v6182_v19 = vsel %vm5711_vm8, %v6125_v61, -1e+30  ;;  %v1972_v48 = vadd.f32 %v4165_v41, %v5660_v54 }
 0x392   : > { %7812 = vst [vmem:[#allocation81_spill] sm:$0xff] %v6182_v19 }
 0x393   : > { %7810 = vst [vmem:[#allocation79_spill] sm:$0xff] %v6172_v47  ;;  %v6191_v7 = vsel %vm5690_vm5, %v6172_v47, -1e+30 }
 0x394   : > { %7813 = vst [vmem:[#allocation82_spill] sm:$0xff] %v6191_v7 }
 0x395   : > { %2402 = vmax.xlane.f32.xlu1 %v6147_v46  ;;  %2400 = vmax.xlane.f32.xlu0 %v6152_v34  ;;  %v6169_v34 = vadd.f32 %v5679_v50, %v2236_v38  ;;  %v1969_v38 = vadd.f32 %v4164_v18, %v5656_v53  ;;  %v6203_v53 = vsel %vm5683_vm4, %v6172_v47, -1e+30 }
 0x396   : > { %7815 = vst [vmem:[#allocation84_spill] sm:$0xff] %v6203_v53 }
 0x397   : > { %7809 = vst [vmem:[#allocation78_spill] sm:$0xff] %v6169_v34  ;;  %v6196_v61 = vsel %vm5690_vm5, %v6169_v34, -1e+30  ;;  %v6208_v54 = vsel %vm5683_vm4, %v6169_v34, -1e+30 }
 0x398   : > { %7814 = vst [vmem:[#allocation83_spill] sm:$0xff] %v6196_v61  ;;  %7816 = vst [vmem:[#allocation85_spill] sm:$0xff] %v6208_v54 }
 0x399   : > { %2789 = vmax.xlane.f32.xlu1 %v6159_v52  ;;  %2787 = vmax.xlane.f32.xlu0 %v6164_v12  ;;  %v2185_v52 = vpop.f32.mrf.mxu1 }
 0x39b   : > { %v4213_v12 = vpop.f32.mrf.mxu1 }
 0x39d   : > { %3176 = vmax.xlane.f32.xlu1 %v6177_v49  ;;  %3174 = vmax.xlane.f32.xlu0 %v6182_v19  ;;  %v2242_v19 = vadd.f32 %v4212_v45, %v1969_v38  ;;  %v2243_v49 = vadd.f32 %v4213_v12, %v1972_v48  ;;  %v6225_v38 = vsel %vm5711_vm8, %v6172_v47, -1e+30  ;;  %v6230_v48 = vsel %vm5711_vm8, %v6169_v34, -1e+30 }
 0x39e   : > { %7819 = vst [vmem:[#allocation88_spill] sm:$0xff] %v6225_v38  ;;  %7820 = vst [vmem:[#allocation89_spill] sm:$0xff] %v6230_v48 }
 0x39f   : > { %v6217_v45 = vadd.f32 %v5679_v50, %v2242_v19  ;;  %v6220_v12 = vadd.f32 %v5679_v50, %v2243_v49  ;;  %v1961_v49 = vadd.f32 %v1960_v23, %v5658_v42 }
 0x3a1   : > { %2398 = vmax.xlane.f32.xlu1 %v6191_v7  ;;  %2396 = vmax.xlane.f32.xlu0 %v6196_v61  ;;  %7817 = vst [vmem:[#allocation86_spill] sm:$0xff] %v6217_v45  ;;  %7818 = vst [vmem:[#allocation87_spill] sm:$0xff] %v6220_v12  ;;  %v6243_v47 = vsel %vm5690_vm5, %v6220_v12, -1e+30  ;;  %v6248_v34 = vsel %vm5690_vm5, %v6217_v45, -1e+30 }
 0x3a2   : > { %7821 = vst [vmem:[#allocation90_spill] sm:$0xff] %v6243_v47  ;;  %7822 = vst [vmem:[#allocation91_spill] sm:$0xff] %v6248_v34  ;;  %v6264_v46 = vsel %vm5683_vm4, %v6217_v45, -1e+30 }
 0x3a3   : > { %7824 = vst [vmem:[#allocation93_spill] sm:$0xff] %v6264_v46 }
 0x3a5   : > { %2785 = vmax.xlane.f32.xlu1 %v6203_v53  ;;  %2783 = vmax.xlane.f32.xlu0 %v6208_v54  ;;  %v1963_v54 = vpop.f32.mrf.mxu0 }
 0x3a6   : > { %v6212_v18 = vpop.xlane.xlu0 %2747  ;;  %v6214_v41 = vpop.xlane.xlu1 %2360  ;;  %v1964_v61 = vadd.f32 %v1963_v54, %v5662_v55  ;;  %v2240_v55 = vadd.f32 %v2185_v52, %v1961_v49  ;;  %v6259_v54 = vsel %vm5683_vm4, %v6220_v12, -1e+30  ;;  %v6281_v49 = vsel %vm5711_vm8, %v6220_v12, -1e+30 }
 0x3a7   : > { %7823 = vst [vmem:[#allocation92_spill] sm:$0xff] %v6259_v54  ;;  %7827 = vst [vmem:[#allocation96_spill] sm:$0xff] %v6281_v49 }
 0x3a9   : > { %3172 = vmax.xlane.f32.xlu1 %v6225_v38  ;;  %3170 = vmax.xlane.f32.xlu0 %v6230_v48  ;;  %v4168_v38 = vpop.f32.mrf.mxu0  ;;  %v2188_v48 = vpop.f32.mrf.mxu1 }
 0x3aa   : > { %v6234_v19 = vpop.xlane.xlu0 %3134  ;;  %v6236_v53 = vpop.xlane.xlu1 %2362  ;;  %v2241_v23 = vadd.f32 %v2188_v48, %v1964_v61  ;;  %v6273_v61 = vadd.f32 %v5679_v50, %v2240_v55  ;;  %v1985_v58 = vadd.f32 %v4168_v38, %v5664_v56 }
 0x3ab   : > { %v1976_v51 = vpop.f32.mrf.mxu0 }
 0x3ac   : > { %7825 = vst [vmem:[#allocation94_spill] sm:$0xff] %v6273_v61  ;;  %v6276_v48 = vadd.f32 %v5679_v50, %v2241_v23  ;;  %v6320_v44 = vsel %vm5683_vm4, %v6273_v61, -1e+30 }
 0x3ad   : > { %2410 = vmax.xlane.f32.xlu1 %v6243_v47  ;;  %2408 = vmax.xlane.f32.xlu0 %v6248_v34  ;;  %v4216_v47 = vpop.f32.mrf.mxu1  ;;  %7832 = vst [vmem:[#allocation101_spill] sm:$0xff] %v6320_v44 }
 0x3ae   : > { %v6252_v7 = vpop.xlane.xlu1 %2749  ;;  %v6254_v42 = vpop.xlane.xlu0 %2356  ;;  %7826 = vst [vmem:[#allocation95_spill] sm:$0xff] %v6276_v48  ;;  %v6299_v37 = vsel %vm5690_vm5, %v6276_v48, -1e+30  ;;  %v6315_v38 = vsel %vm5683_vm4, %v6276_v48, -1e+30 }
 0x3af   : > { %v2201_v13 = vpop.f32.mrf.mxu1  ;;  %7829 = vst [vmem:[#allocation98_spill] sm:$0xff] %v6299_v37  ;;  %7831 = vst [vmem:[#allocation100_spill] sm:$0xff] %v6315_v38 }
 0x3b1   : > { %2797 = vmax.xlane.f32.xlu1 %v6259_v54  ;;  %2795 = vmax.xlane.f32.xlu0 %v6264_v46  ;;  %v6286_v54 = vsel %vm5711_vm8, %v6217_v45, -1e+30  ;;  %v4169_v46 = vpop.f32.mrf.mxu0  ;;  %v6304_v45 = vsel %vm5690_vm5, %v6273_v61, -1e+30 }
 0x3b2   : > { %v6268_v34 = vpop.xlane.xlu1 %3136  ;;  %v6270_v52 = vpop.xlane.xlu0 %2743  ;;  %7828 = vst [vmem:[#allocation97_spill] sm:$0xff] %v6286_v54  ;;  %v1988_v12 = vadd.f32 %v4169_v46, %v5668_v57  ;;  %7830 = vst [vmem:[#allocation99_spill] sm:$0xff] %v6304_v45  ;;  %v2246_v57 = vadd.f32 %v4216_v47, %v1985_v58 }
 0x3b4   : > { %v6329_v58 = vadd.f32 %v5679_v50, %v2246_v57 }
 0x3b5   : > { %3184 = vmax.xlane.f32.xlu1 %v6281_v49  ;;  %3182 = vmax.xlane.f32.xlu0 %v6286_v54  ;;  %v4217_v49 = vpop.f32.mrf.mxu1 }
 0x3b6   : > { %v6290_v55 = vpop.xlane.xlu1 %2745  ;;  %v6292_v23 = vpop.xlane.xlu0 %3130  ;;  %v2247_v46 = vadd.f32 %v4217_v49, %v1988_v12  ;;  %7833 = vst [vmem:[#allocation102_spill] sm:$0xff] %v6329_v58  ;;  %v6337_v12 = vsel %vm5711_vm8, %v6276_v48, -1e+30  ;;  %v6342_v49 = vsel %vm5711_vm8, %v6273_v61, -1e+30 }
 0x3b7   : > { %7835 = vst [vmem:[#allocation104_spill] sm:$0xff] %v6337_v12  ;;  %7836 = vst [vmem:[#allocation105_spill] sm:$0xff] %v6342_v49  ;;  %v6360_v61 = vsel %vm5690_vm5, %v6329_v58, -1e+30 }
 0x3b8   : > { %v6332_v47 = vadd.f32 %v5679_v50, %v2247_v46  ;;  %v1977_v46 = vadd.f32 %v1976_v51, %v5666_v43  ;;  %7837 = vst [vmem:[#allocation106_spill] sm:$0xff] %v6360_v61  ;;  %v2422_v43 = vsub.f32 %v5704_v6, %v6214_v41  ;;  %v2809_v6 = vsub.f32 %v5699_v3, %v6212_v18 }
 0x3b9   : > { %2406 = vmax.xlane.f32.xlu1 %v6299_v37  ;;  %2404 = vmax.xlane.f32.xlu0 %v6304_v45  ;;  %v2810_v41 = vsub.f32 %v5734_v21, %v6252_v7  ;;  %v6406_v3 = vsel %vm5711_vm8, %v6329_v58, -1e+30 }
 0x3ba   : > { %v6308_v54 = vpop.xlane.xlu1 %3132  ;;  %v6310_v56 = vpop.xlane.xlu0 %2358  ;;  %7834 = vst [vmem:[#allocation103_spill] sm:$0xff] %v6332_v47  ;;  %v6355_v48 = vsel %vm5690_vm5, %v6332_v47, -1e+30  ;;  %v6375_v30 = vsel %vm5683_vm4, %v6332_v47, -1e+30 }
 0x3bb   : > { %v2843_v21 = vmul.f32 1.442695, %v2809_v6  ;;  %v2845_v18 = vmul.f32 1.442695, %v2810_v41 }
 0x3bd   : > { %2793 = vmax.xlane.f32.xlu1 %v6315_v38  ;;  %2791 = vmax.xlane.f32.xlu0 %v6320_v44  ;;  %v1979_v44 = vpop.f32.mrf.mxu0 }
 0x3be   : > { %v6324_v45 = vpop.xlane.xlu1 %2370  ;;  %v6326_v37 = vpop.xlane.xlu0 %2368  ;;  %v1980_v1 = vadd.f32 %v1979_v44, %v5670_v59  ;;  %v2423_v44 = vsub.f32 %v5727_v62, %v6236_v53  ;;  %v2456_v62 = vmul.f32 1.442695, %v2422_v43 }
 0x3c0   : > { %v2458_v53 = vmul.f32 1.442695, %v2423_v44  ;;  %4393 = vpow2.f32 %v2456_v62  ;;  %v2421_v62 = vsub.f32 %v5786_v31, %v6310_v56 }
 0x3c1   : > { %3180 = vmax.xlane.f32.xlu1 %v6337_v12  ;;  %3178 = vmax.xlane.f32.xlu0 %v6342_v49  ;;  %v2204_v12 = vpop.f32.mrf.mxu1  ;;  %v2244_v49 = vadd.f32 %v2201_v13, %v1977_v46 }
 0x3c2   : > { %v6346_v57 = vpop.xlane.xlu1 %2757  ;;  %v6348_v38 = vpop.xlane.xlu0 %2755  ;;  %v2245_v9 = vadd.f32 %v2204_v12, %v1980_v1  ;;  %4395 = vpow2.f32 %v2458_v53 }
 0x3c3   : > { %v6393_v12 = vadd.f32 %v5679_v50, %v2244_v49  ;;  %v3197_v49 = vsub.f32 %v5751_v5, %v6268_v34  ;;  %4397 = vpow2.f32 %v2843_v21  ;;  %v2808_v21 = vsub.f32 %v5763_v27, %v6290_v55 }
 0x3c4   : > { %v6396_v46 = vadd.f32 %v5679_v50, %v2245_v9  ;;  %v3196_v50 = vsub.f32 %v5722_v15, %v6234_v19  ;;  %v2420_v19 = vsub.f32 %v5739_v22, %v6254_v42  ;;  %4399 = vpow2.f32 %v2845_v18 }
 0x3c5   : > { %2418 = vmax.xlane.f32.xlu1 %v6355_v48  ;;  %2416 = vmax.xlane.f32.xlu0 %v6360_v61  ;;  %v6380_v61 = vsel %vm5683_vm4, %v6329_v58, -1e+30  ;;  %7839 = vst [vmem:[#allocation108_spill] sm:$0xff] %v6393_v12  ;;  %v6426_v44 = vsel %vm5690_vm5, %v6393_v12, -1e+30  ;;  %v2807_v42 = vsub.f32 %v5756_v0, %v6270_v52  ;;  %v3194_v27 = vsub.f32 %v5768_v4, %v6292_v23 }
 0x3c6   : > { %v6366_v51 = vpop.xlane.xlu1 %3144  ;;  %v6368_v59 = vpop.xlane.xlu0 %3142  ;;  %7838 = vst [vmem:[#allocation107_spill] sm:$0xff] %v6380_v61  ;;  %7840 = vst [vmem:[#allocation109_spill] sm:$0xff] %v6396_v46  ;;  %v6421_v43 = vsel %vm5690_vm5, %v6396_v46, -1e+30  ;;  %v3230_v15 = vmul.f32 1.442695, %v3196_v50  ;;  %v2427_v4 = vsub.f32 %v5795_v8, %v6324_v45  ;;  %v2814_v8 = vsub.f32 %v5807_v28, %v6346_v57 }
 0x3c7   : > { %v3232_v6 = vmul.f32 1.442695, %v3197_v49  ;;  %v6441_v53 = vsel %vm5683_vm4, %v6396_v46, -1e+30  ;;  %v6446_v41 = vsel %vm5683_vm4, %v6393_v12, -1e+30  ;;  %v3201_v28 = vsub.f32 %v5825_v24, %v6366_v51 }
 0x3c8   : > { %4401 = vpow2.f32 %v3230_v15  ;;  %v2452_v22 = vmul.f32 1.442695, %v2420_v19  ;;  %v2454_v50 = vmul.f32 1.442695, %v2421_v62  ;;  %v6461_v18 = vsel %vm5711_vm8, %v6396_v46, -1e+30 }
 0x3c9   : > { %2805 = vmax.xlane.f32.xlu1 %v6375_v30  ;;  %2803 = vmax.xlane.f32.xlu0 %v6380_v61  ;;  %v6401_v61 = vsel %vm5711_vm8, %v6332_v47, -1e+30  ;;  %4403 = vpow2.f32 %v3232_v6  ;;  %v6466_v49 = vsel %vm5711_vm8, %v6393_v12, -1e+30  ;;  %v2839_v0 = vmul.f32 1.442695, %v2807_v42 }
 0x3ca   : > { %v6386_v13 = vpop.xlane.xlu1 %2366  ;;  %v6388_v1 = vpop.xlane.xlu0 %2364  ;;  %4405 = vpow2.f32 %v2452_v22  ;;  %v2841_v19 = vmul.f32 1.442695, %v2808_v21  ;;  %v3195_v6 = vsub.f32 %v5781_v26, %v6308_v54  ;;  %v3226_v22 = vmul.f32 1.442695, %v3194_v27 }
 0x3cb   : > { %4407 = vpow2.f32 %v2454_v50  ;;  %v2426_v54 = vsub.f32 %v5800_v11, %v6326_v37  ;;  %v2813_v11 = vsub.f32 %v5812_v36, %v6348_v38  ;;  %v3200_v36 = vsub.f32 %v5830_v2, %v6368_v59 }
 0x3cc   : > { %4409 = vpow2.f32 %v2839_v0  ;;  %v3228_v26 = vmul.f32 1.442695, %v3195_v6  ;;  %v2466_v0 = vmul.f32 1.442695, %v2427_v4  ;;  %v2425_v24 = vsub.f32 %v5839_v25, %v6386_v13 }
 0x3cd   : > { %3192 = vmax.xlane.f32.xlu1 %v6401_v61  ;;  %3190 = vmax.xlane.f32.xlu0 %v6406_v3  ;;  %v6476_v15 = vpop.eup %4393  ;;  %4411 = vpow2.f32 %v2841_v19  ;;  %v2464_v6 = vmul.f32 1.442695, %v2426_v54  ;;  %v2851_v54 = vmul.f32 1.442695, %v2813_v11  ;;  %v3238_v11 = vmul.f32 1.442695, %v3200_v36 }
 0x3ce   : > { %v6412_v9 = vpop.xlane.xlu1 %2753  ;;  %v6414_v7 = vpop.xlane.xlu0 %2751  ;;  %4413 = vpow2.f32 %v3226_v22  ;;  %v2853_v22 = vmul.f32 1.442695, %v2814_v8  ;;  %v2424_v2 = vsub.f32 %v5844_v10, %v6388_v1 }
 0x3cf   : > { %v6480_v62 = vpop.eup %4395  ;;  %4415 = vpow2.f32 %v3228_v26  ;;  %v2812_v25 = vsub.f32 %v5851_v29, %v6412_v9  ;;  %v2811_v10 = vsub.f32 %v5856_v40, %v6414_v7 }
 0x3d0   : > { %v6490_v21 = vpop.eup %4397  ;;  %4417 = vpow2.f32 %v2466_v0  ;;  %v3240_v0 = vmul.f32 1.442695, %v3201_v28  ;;  %v2460_v36 = vmul.f32 1.442695, %v2424_v2 }
 0x3d1   : > { %2414 = vmax.xlane.f32.xlu1 %v6421_v43  ;;  %2412 = vmax.xlane.f32.xlu0 %v6426_v44  ;;  %v6494_v50 = vpop.eup %4399  ;;  %4419 = vpow2.f32 %v2464_v6  ;;  %v2847_v2 = vmul.f32 1.442695, %v2811_v10 }
 0x3d2   : > { %v6432_v5 = vpop.xlane.xlu1 %3140  ;;  %v6434_v34 = vpop.xlane.xlu0 %3138  ;;  %4421 = vpow2.f32 %v2853_v22  ;;  %v2462_v22 = vmul.f32 1.442695, %v2425_v24 }
 0x3d3   : > { %4423 = vpow2.f32 %v2851_v54  ;;  %v3199_v29 = vsub.f32 %v5869_v60, %v6432_v5  ;;  %v3198_v40 = vsub.f32 %v5874_v32, %v6434_v34 }
 0x3d4   : > { %4425 = vpow2.f32 %v3240_v0  ;;  %v2849_v0 = vmul.f32 1.442695, %v2812_v25 }
 0x3d5   : > { %2801 = vmax.xlane.f32.xlu1 %v6441_v53  ;;  %2799 = vmax.xlane.f32.xlu0 %v6446_v41  ;;  %v6504_v19 = vpop.eup %4401  ;;  %4427 = vpow2.f32 %v3238_v11  ;;  %v3234_v10 = vmul.f32 1.442695, %v3198_v40 }
 0x3d6   : > { %v6452_v31 = vpop.xlane.xlu1 %2378  ;;  %v6454_v56 = vpop.xlane.xlu0 %2376  ;;  %4429 = vpow2.f32 %v2462_v22  ;;  %v3236_v22 = vmul.f32 1.442695, %v3199_v29 }
 0x3d7   : > { %v6508_v37 = vpop.eup %4403  ;;  %4431 = vpow2.f32 %v2460_v36  ;;  %v2431_v60 = vsub.f32 %v5883_v16, %v6452_v31  ;;  %v2430_v32 = vsub.f32 %v5888_v39, %v6454_v56  ;;  %v7841_v16 = vld [vmem:[#allocation31_spill] sm:$0xff]  ;;  %v7842_v39 = vld [vmem:[#allocation32_spill] sm:$0xff] }
 0x3d8   : > { %v6518_v26 = vpop.eup %4405  ;;  %4433 = vpow2.f32 %v2849_v0 }
 0x3d9   : > { %3188 = vmax.xlane.f32.xlu1 %v6461_v18  ;;  %3186 = vmax.xlane.f32.xlu0 %v6466_v49  ;;  %v6522_v38 = vpop.eup %4407  ;;  %4435 = vpow2.f32 %v2847_v2  ;;  %v2474_v0 = vmul.f32 1.442695, %v2431_v60  ;;  %v2472_v40 = vmul.f32 1.442695, %v2430_v32 }
 0x3da   : > { %v6472_v52 = vpop.xlane.xlu1 %2765  ;;  %v6474_v55 = vpop.xlane.xlu0 %2763  ;;  %4437 = vpow2.f32 %v3236_v22 }
 0x3db   : > { %v6532_v6 = vpop.eup %4409  ;;  %v2818_v31 = vsub.f32 %v7841_v16, %v6472_v52  ;;  %4439 = vpow2.f32 %v3234_v10  ;;  %v2817_v56 = vsub.f32 %v7842_v39, %v6474_v55  ;;  %v7843_v52 = vld [vmem:[#allocation35_spill] sm:$0xff]  ;;  %v7845_v55 = vld [vmem:[#allocation36_spill] sm:$0xff] }
 0x3dc   : > { %v6536_v59 = vpop.eup %4411  ;;  %4441 = vpow2.f32 %v2474_v0 }
 0x3dd   : > { %2522 = vadd.xlane.f32.xlu1 %v6480_v62  ;;  %2520 = vadd.xlane.f32.xlu0 %v6476_v15  ;;  %v6546_v54 = vpop.eup %4413  ;;  %v2861_v22 = vmul.f32 1.442695, %v2818_v31  ;;  %4443 = vpow2.f32 %v2472_v40  ;;  %v2859_v32 = vmul.f32 1.442695, %v2817_v56 }
 0x3de   : > { %v6486_v23 = vpop.xlane.xlu1 %3152  ;;  %v6488_v42 = vpop.xlane.xlu0 %3150 }
 0x3df   : > { %v6550_v1 = vpop.eup %4415  ;;  %v3205_v60 = vsub.f32 %v7843_v52, %v6486_v23  ;;  %v3204_v39 = vsub.f32 %v7845_v55, %v6488_v42  ;;  %4445 = vpow2.f32 %v2861_v22 }
 0x3e0   : > { %v6560_v11 = vpop.eup %4417  ;;  %4447 = vpow2.f32 %v2859_v32 }
 0x3e1   : > { %2909 = vadd.xlane.f32.xlu1 %v6494_v50  ;;  %2907 = vadd.xlane.f32.xlu0 %v6490_v21  ;;  %v6564_v7 = vpop.eup %4419  ;;  %v3248_v0 = vmul.f32 1.442695, %v3205_v60  ;;  %v3246_v56 = vmul.f32 1.442695, %v3204_v39 }
 0x3e2   : > { %v6500_v45 = vpop.xlane.xlu1 %2374  ;;  %v6502_v27 = vpop.xlane.xlu0 %2372 }
 0x3e3   : > { %v6574_v36 = vpop.eup %4421  ;;  %v2429_v23 = vsub.f32 %v5927_v63, %v6500_v45  ;;  %v2428_v42 = vsub.f32 %v5932_v17, %v6502_v27  ;;  %4449 = vpow2.f32 %v3248_v0  ;;  %v7850_v17 = vld [vmem:[#allocation37_spill] sm:$0xff] }
 0x3e4   : > { %v6578_v34 = vpop.eup %4423  ;;  %4451 = vpow2.f32 %v3246_v56 }
 0x3e5   : > { %3296 = vadd.xlane.f32.xlu1 %v6508_v37  ;;  %3294 = vadd.xlane.f32.xlu0 %v6504_v19  ;;  %v6588_v2 = vpop.eup %4425  ;;  %v2470_v22 = vmul.f32 1.442695, %v2429_v23  ;;  %v2468_v39 = vmul.f32 1.442695, %v2428_v42 }
 0x3e6   : > { %v6514_v57 = vpop.xlane.xlu1 %2761  ;;  %v6516_v4 = vpop.xlane.xlu0 %2759 }
 0x3e7   : > { %v6592_v58 = vpop.eup %4427  ;;  %v2816_v63 = vsub.f32 %v5939_v33, %v6514_v57  ;;  %v2815_v27 = vsub.f32 %v7850_v17, %v6516_v4  ;;  %4453 = vpow2.f32 %v2470_v22  ;;  %v7852_v33 = vld [vmem:[#allocation40_spill] sm:$0xff]  ;;  %v7854_v4 = vld [vmem:[#allocation41_spill] sm:$0xff] }
 0x3e8   : > { %v6602_v10 = vpop.eup %4429  ;;  %4455 = vpow2.f32 %v2468_v39 }
 0x3e9   : > { %2516 = vadd.xlane.f32.xlu0 %v6518_v26  ;;  %2518 = vadd.xlane.f32.xlu1 %v6522_v38  ;;  %7844 = vst [vmem:[#allocation31_spill] sm:$0xff] %v6602_v10  ;;  %v6606_v12 = vpop.eup %4431  ;;  %v2857_v0 = vmul.f32 1.442695, %v2816_v63  ;;  %v2855_v42 = vmul.f32 1.442695, %v2815_v27 }
 0x3ea   : > { %v6528_v51 = vpop.xlane.xlu1 %3148  ;;  %v6530_v8 = vpop.xlane.xlu0 %3146  ;;  %7846 = vst [vmem:[#allocation32_spill] sm:$0xff] %v6606_v12 }
 0x3eb   : > { %v6616_v40 = vpop.eup %4433  ;;  %v3203_v57 = vsub.f32 %v7852_v33, %v6528_v51  ;;  %v3202_v17 = vsub.f32 %v7854_v4, %v6530_v8  ;;  %4457 = vpow2.f32 %v2857_v0  ;;  %v7856_v51 = vld [vmem:[#allocation42_spill] sm:$0xff]  ;;  %v7858_v8 = vld [vmem:[#allocation43_spill] sm:$0xff] }
 0x3ec   : > { %7847 = vst [vmem:[#allocation35_spill] sm:$0xff] %v6616_v40  ;;  %v6620_v55 = vpop.eup %4435  ;;  %4459 = vpow2.f32 %v2855_v42 }
 0x3ed   : > { %2903 = vadd.xlane.f32.xlu0 %v6532_v6  ;;  %2905 = vadd.xlane.f32.xlu1 %v6536_v59  ;;  %7848 = vst [vmem:[#allocation36_spill] sm:$0xff] %v6620_v55  ;;  %v6630_v32 = vpop.eup %4437  ;;  %v3244_v22 = vmul.f32 1.442695, %v3203_v57  ;;  %v3242_v27 = vmul.f32 1.442695, %v3202_v17 }
 0x3ee   : > { %v6542_v13 = vpop.xlane.xlu1 %2386  ;;  %v6544_v28 = vpop.xlane.xlu0 %2384  ;;  %7849 = vst [vmem:[#allocation110_spill] sm:$0xff] %v6630_v32 }
 0x3ef   : > { %v2435_v63 = vsub.f32 %v7856_v51, %v6542_v13  ;;  %v2434_v4 = vsub.f32 %v7858_v8, %v6544_v28  ;;  %4461 = vpow2.f32 %v3244_v22  ;;  %v7860_v13 = vld [vmem:[#allocation44_spill] sm:$0xff]  ;;  %v7862_v28 = vld [vmem:[#allocation45_spill] sm:$0xff] }
 0x3f0   : > { %4463 = vpow2.f32 %v3242_v27 }
 0x3f1   : > { %3290 = vadd.xlane.f32.xlu0 %v6546_v54  ;;  %3292 = vadd.xlane.f32.xlu1 %v6550_v1  ;;  %v2482_v0 = vmul.f32 1.442695, %v2435_v63  ;;  %v2480_v17 = vmul.f32 1.442695, %v2434_v4 }
 0x3f2   : > { %v6556_v9 = vpop.xlane.xlu1 %2773  ;;  %v6558_v24 = vpop.xlane.xlu0 %2771 }
 0x3f3   : > { %v2822_v57 = vsub.f32 %v7860_v13, %v6556_v9  ;;  %v2821_v8 = vsub.f32 %v7862_v28, %v6558_v24  ;;  %4465 = vpow2.f32 %v2482_v0  ;;  %v7864_v9 = vld [vmem:[#allocation48_spill] sm:$0xff]  ;;  %v7866_v24 = vld [vmem:[#allocation49_spill] sm:$0xff] }
 0x3f4   : > { %4467 = vpow2.f32 %v2480_v17 }
 0x3f5   : > { %2530 = vadd.xlane.f32.xlu1 %v6560_v11  ;;  %2528 = vadd.xlane.f32.xlu0 %v6564_v7  ;;  %v2869_v22 = vmul.f32 1.442695, %v2822_v57  ;;  %v2867_v4 = vmul.f32 1.442695, %v2821_v8 }
 0x3f6   : > { %v6570_v5 = vpop.xlane.xlu1 %3160  ;;  %v6572_v25 = vpop.xlane.xlu0 %3158 }
 0x3f7   : > { %v3209_v63 = vsub.f32 %v7864_v9, %v6570_v5  ;;  %v3208_v28 = vsub.f32 %v7866_v24, %v6572_v25  ;;  %4469 = vpow2.f32 %v2869_v22  ;;  %v7868_v5 = vld [vmem:[#allocation50_spill] sm:$0xff]  ;;  %v7870_v25 = vld [vmem:[#allocation51_spill] sm:$0xff] }
 0x3f9   : > { %2917 = vadd.xlane.f32.xlu1 %v6574_v36  ;;  %2915 = vadd.xlane.f32.xlu0 %v6578_v34  ;;  %v3256_v0 = vmul.f32 1.442695, %v3209_v63  ;;  %v3254_v8 = vmul.f32 1.442695, %v3208_v28 }
 0x3fa   : > { %v6584_v29 = vpop.xlane.xlu1 %2382  ;;  %v6586_v47 = vpop.xlane.xlu0 %2380 }
 0x3fb   : > { %v2433_v57 = vsub.f32 %v7868_v5, %v6584_v29  ;;  %v2432_v24 = vsub.f32 %v7870_v25, %v6586_v47  ;;  %v7872_v29 = vld [vmem:[#allocation52_spill] sm:$0xff]  ;;  %v7874_v47 = vld [vmem:[#allocation53_spill] sm:$0xff] }
 0x3fd   : > { %3304 = vadd.xlane.f32.xlu1 %v6588_v2  ;;  %3302 = vadd.xlane.f32.xlu0 %v6592_v58  ;;  %v2478_v22 = vmul.f32 1.442695, %v2433_v57  ;;  %v2476_v28 = vmul.f32 1.442695, %v2432_v24 }
 0x3fe   : > { %v6598_v16 = vpop.xlane.xlu1 %2769  ;;  %v6600_v46 = vpop.xlane.xlu0 %2767 }
 0x3ff   : > { %v2820_v63 = vsub.f32 %v7872_v29, %v6598_v16  ;;  %v2819_v25 = vsub.f32 %v7874_v47, %v6600_v46  ;;  %v7876_v16 = vld [vmem:[#allocation56_spill] sm:$0xff]  ;;  %v7878_v46 = vld [vmem:[#allocation57_spill] sm:$0xff] }
 0x401   : > { %2526 = vadd.xlane.f32.xlu1 %v6602_v10  ;;  %2524 = vadd.xlane.f32.xlu0 %v6606_v12  ;;  %v6634_v12 = vpop.eup %4439  ;;  %4471 = vpow2.f32 %v2867_v4  ;;  %v2863_v24 = vmul.f32 1.442695, %v2819_v25 }
 0x402   : > { %v6612_v31 = vpop.xlane.xlu1 %3156  ;;  %v6614_v52 = vpop.xlane.xlu0 %3154  ;;  %7851 = vst [vmem:[#allocation37_spill] sm:$0xff] %v6634_v12 }
 0x403   : > { %v6644_v56 = vpop.eup %4441  ;;  %4473 = vpow2.f32 %v3256_v0  ;;  %v2865_v0 = vmul.f32 1.442695, %v2820_v63  ;;  %v3207_v57 = vsub.f32 %v7876_v16, %v6612_v31  ;;  %v3206_v47 = vsub.f32 %v7878_v46, %v6614_v52  ;;  %v7880_v31 = vld [vmem:[#allocation58_spill] sm:$0xff]  ;;  %v7882_v52 = vld [vmem:[#allocation59_spill] sm:$0xff] }
 0x404   : > { %7853 = vst [vmem:[#allocation40_spill] sm:$0xff] %v6644_v56 }
 0x405   : > { %2913 = vadd.xlane.f32.xlu1 %v6616_v40  ;;  %2911 = vadd.xlane.f32.xlu0 %v6620_v55  ;;  %v6648_v40 = vpop.eup %4443  ;;  %4475 = vpow2.f32 %v3254_v8  ;;  %v3250_v25 = vmul.f32 1.442695, %v3206_v47 }
 0x406   : > { %v6626_v45 = vpop.xlane.xlu1 %2394  ;;  %v6628_v60 = vpop.xlane.xlu0 %2392  ;;  %7855 = vst [vmem:[#allocation41_spill] sm:$0xff] %v6648_v40 }
 0x407   : > { %v6658_v39 = vpop.eup %4445  ;;  %4477 = vpow2.f32 %v2478_v22  ;;  %v3252_v22 = vmul.f32 1.442695, %v3207_v57  ;;  %v2439_v63 = vsub.f32 %v7880_v31, %v6626_v45  ;;  %v2438_v46 = vsub.f32 %v7882_v52, %v6628_v60  ;;  %v7884_v45 = vld [vmem:[#allocation60_spill] sm:$0xff]  ;;  %v7886_v60 = vld [vmem:[#allocation61_spill] sm:$0xff] }
 0x408   : > { %7857 = vst [vmem:[#allocation42_spill] sm:$0xff] %v6658_v39 }
 0x409   : > { %3300 = vadd.xlane.f32.xlu1 %v6630_v32  ;;  %3298 = vadd.xlane.f32.xlu0 %v6634_v12  ;;  %v6662_v32 = vpop.eup %4447  ;;  %4479 = vpow2.f32 %v2476_v28  ;;  %v2488_v47 = vmul.f32 1.442695, %v2438_v46 }
 0x40a   : > { %v6640_v23 = vpop.xlane.xlu1 %2781  ;;  %v6642_v55 = vpop.xlane.xlu0 %2779  ;;  %7859 = vst [vmem:[#allocation43_spill] sm:$0xff] %v6662_v32 }
 0x40b   : > { %v6672_v42 = vpop.eup %4449  ;;  %4481 = vpow2.f32 %v2865_v0  ;;  %v2490_v0 = vmul.f32 1.442695, %v2439_v63  ;;  %v2826_v57 = vsub.f32 %v7884_v45, %v6640_v23  ;;  %v2825_v52 = vsub.f32 %v7886_v60, %v6642_v55  ;;  %v7888_v23 = vld [vmem:[#allocation64_spill] sm:$0xff]  ;;  %v7890_v55 = vld [vmem:[#allocation65_spill] sm:$0xff] }
 0x40c   : > { %7861 = vst [vmem:[#allocation44_spill] sm:$0xff] %v6672_v42 }
 0x40d   : > { %2538 = vadd.xlane.f32.xlu1 %v6644_v56  ;;  %2536 = vadd.xlane.f32.xlu0 %v6648_v40  ;;  %v6676_v56 = vpop.eup %4451  ;;  %4483 = vpow2.f32 %v2863_v24  ;;  %v2875_v46 = vmul.f32 1.442695, %v2825_v52 }
 0x40e   : > { %v6654_v33 = vpop.xlane.xlu1 %3168  ;;  %v6656_v12 = vpop.xlane.xlu0 %3166  ;;  %7863 = vst [vmem:[#allocation45_spill] sm:$0xff] %v6676_v56 }
 0x40f   : > { %v6686_v27 = vpop.eup %4453  ;;  %4485 = vpow2.f32 %v3252_v22  ;;  %v2877_v22 = vmul.f32 1.442695, %v2826_v57  ;;  %v3213_v63 = vsub.f32 %v7888_v23, %v6654_v33  ;;  %v3212_v60 = vsub.f32 %v7890_v55, %v6656_v12  ;;  %v7892_v33 = vld [vmem:[#allocation66_spill] sm:$0xff]  ;;  %v7894_v12 = vld [vmem:[#allocation67_spill] sm:$0xff] }
 0x410   : > { %7865 = vst [vmem:[#allocation48_spill] sm:$0xff] %v6686_v27 }
 0x411   : > { %2925 = vadd.xlane.f32.xlu1 %v6658_v39  ;;  %2923 = vadd.xlane.f32.xlu0 %v6662_v32  ;;  %v6690_v39 = vpop.eup %4455  ;;  %4487 = vpow2.f32 %v3250_v25  ;;  %v3262_v52 = vmul.f32 1.442695, %v3212_v60 }
 0x412   : > { %v6668_v51 = vpop.xlane.xlu1 %2390  ;;  %v6670_v40 = vpop.xlane.xlu0 %2388  ;;  %7867 = vst [vmem:[#allocation49_spill] sm:$0xff] %v6690_v39 }
 0x413   : > { %v6700_v17 = vpop.eup %4457  ;;  %4489 = vpow2.f32 %v2490_v0  ;;  %v3264_v0 = vmul.f32 1.442695, %v3213_v63  ;;  %v2437_v57 = vsub.f32 %v7892_v33, %v6668_v51  ;;  %v2436_v55 = vsub.f32 %v7894_v12, %v6670_v40  ;;  %v7896_v51 = vld [vmem:[#allocation68_spill] sm:$0xff]  ;;  %v7898_v40 = vld [vmem:[#allocation69_spill] sm:$0xff] }
 0x414   : > { %7869 = vst [vmem:[#allocation50_spill] sm:$0xff] %v6700_v17 }
 0x415   : > { %3312 = vadd.xlane.f32.xlu1 %v6672_v42  ;;  %3310 = vadd.xlane.f32.xlu0 %v6676_v56  ;;  %v6704_v42 = vpop.eup %4459  ;;  %4491 = vpow2.f32 %v2488_v47  ;;  %v2484_v60 = vmul.f32 1.442695, %v2436_v55 }
 0x416   : > { %v6682_v13 = vpop.xlane.xlu1 %2777  ;;  %v6684_v32 = vpop.xlane.xlu0 %2775  ;;  %7871 = vst [vmem:[#allocation51_spill] sm:$0xff] %v6704_v42 }
 0x417   : > { %v6714_v4 = vpop.eup %4461  ;;  %4493 = vpow2.f32 %v2877_v22  ;;  %v2486_v22 = vmul.f32 1.442695, %v2437_v57  ;;  %v2824_v63 = vsub.f32 %v7896_v51, %v6682_v13  ;;  %v2823_v12 = vsub.f32 %v7898_v40, %v6684_v32  ;;  %v7900_v13 = vld [vmem:[#allocation72_spill] sm:$0xff]  ;;  %v7902_v32 = vld [vmem:[#allocation73_spill] sm:$0xff] }
 0x418   : > { %7873 = vst [vmem:[#allocation52_spill] sm:$0xff] %v6714_v4 }
 0x419   : > { %2534 = vadd.xlane.f32.xlu1 %v6686_v27  ;;  %2532 = vadd.xlane.f32.xlu0 %v6690_v39  ;;  %v6718_v27 = vpop.eup %4463  ;;  %4495 = vpow2.f32 %v2875_v46  ;;  %v2871_v55 = vmul.f32 1.442695, %v2823_v12 }
 0x41a   : > { %v6696_v9 = vpop.xlane.xlu1 %3164  ;;  %v6698_v56 = vpop.xlane.xlu0 %3162  ;;  %7875 = vst [vmem:[#allocation53_spill] sm:$0xff] %v6718_v27 }
 0x41b   : > { %v6728_v8 = vpop.eup %4465  ;;  %4497 = vpow2.f32 %v3264_v0  ;;  %v2873_v0 = vmul.f32 1.442695, %v2824_v63  ;;  %v3211_v57 = vsub.f32 %v7900_v13, %v6696_v9  ;;  %v3210_v40 = vsub.f32 %v7902_v32, %v6698_v56  ;;  %v7904_v9 = vld [vmem:[#allocation74_spill] sm:$0xff]  ;;  %v7906_v56 = vld [vmem:[#allocation75_spill] sm:$0xff] }
 0x41c   : > { %7877 = vst [vmem:[#allocation56_spill] sm:$0xff] %v6728_v8 }
 0x41d   : > { %2921 = vadd.xlane.f32.xlu1 %v6700_v17  ;;  %2919 = vadd.xlane.f32.xlu0 %v6704_v42  ;;  %v6732_v17 = vpop.eup %4467  ;;  %4499 = vpow2.f32 %v3262_v52  ;;  %v3258_v12 = vmul.f32 1.442695, %v3210_v40 }
 0x41e   : > { %v6710_v5 = vpop.xlane.xlu1 %2402  ;;  %v6712_v39 = vpop.xlane.xlu0 %2400  ;;  %7879 = vst [vmem:[#allocation57_spill] sm:$0xff] %v6732_v17 }
 0x41f   : > { %v6742_v28 = vpop.eup %4469  ;;  %4501 = vpow2.f32 %v2486_v22  ;;  %v3260_v22 = vmul.f32 1.442695, %v3211_v57  ;;  %v2443_v63 = vsub.f32 %v7904_v9, %v6710_v5  ;;  %v2442_v32 = vsub.f32 %v7906_v56, %v6712_v39  ;;  %v7908_v5 = vld [vmem:[#allocation76_spill] sm:$0xff]  ;;  %v7910_v39 = vld [vmem:[#allocation77_spill] sm:$0xff] }
 0x420   : > { %7881 = vst [vmem:[#allocation58_spill] sm:$0xff] %v6742_v28 }
 0x421   : > { %3308 = vadd.xlane.f32.xlu1 %v6714_v4  ;;  %3306 = vadd.xlane.f32.xlu0 %v6718_v27  ;;  %v6746_v4 = vpop.eup %4471  ;;  %4503 = vpow2.f32 %v2484_v60  ;;  %v2496_v40 = vmul.f32 1.442695, %v2442_v32 }
 0x422   : > { %v6724_v29 = vpop.xlane.xlu1 %2789  ;;  %v6726_v42 = vpop.xlane.xlu0 %2787  ;;  %7883 = vst [vmem:[#allocation59_spill] sm:$0xff] %v6746_v4 }
 0x423   : > { %v6756_v24 = vpop.eup %4473  ;;  %4505 = vpow2.f32 %v2873_v0  ;;  %v2498_v0 = vmul.f32 1.442695, %v2443_v63  ;;  %v2830_v57 = vsub.f32 %v7908_v5, %v6724_v29  ;;  %v2829_v56 = vsub.f32 %v7910_v39, %v6726_v42  ;;  %v7912_v29 = vld [vmem:[#allocation80_spill] sm:$0xff]  ;;  %v7914_v42 = vld [vmem:[#allocation81_spill] sm:$0xff] }
 0x424   : > { %7885 = vst [vmem:[#allocation60_spill] sm:$0xff] %v6756_v24 }
 0x425   : > { %2546 = vadd.xlane.f32.xlu1 %v6728_v8  ;;  %2544 = vadd.xlane.f32.xlu0 %v6732_v17  ;;  %v6760_v8 = vpop.eup %4475  ;;  %4507 = vpow2.f32 %v2871_v55  ;;  %v2883_v32 = vmul.f32 1.442695, %v2829_v56 }
 0x426   : > { %v6738_v16 = vpop.xlane.xlu1 %3176  ;;  %v6740_v27 = vpop.xlane.xlu0 %3174  ;;  %7887 = vst [vmem:[#allocation61_spill] sm:$0xff] %v6760_v8 }
 0x427   : > { %v6770_v25 = vpop.eup %4477  ;;  %4509 = vpow2.f32 %v3260_v22  ;;  %v2885_v22 = vmul.f32 1.442695, %v2830_v57  ;;  %v3217_v63 = vsub.f32 %v7912_v29, %v6738_v16  ;;  %v3216_v39 = vsub.f32 %v7914_v42, %v6740_v27  ;;  %v7916_v16 = vld [vmem:[#allocation82_spill] sm:$0xff]  ;;  %v7918_v27 = vld [vmem:[#allocation83_spill] sm:$0xff] }
 0x428   : > { %7889 = vst [vmem:[#allocation64_spill] sm:$0xff] %v6770_v25 }
 0x429   : > { %2933 = vadd.xlane.f32.xlu1 %v6742_v28  ;;  %2931 = vadd.xlane.f32.xlu0 %v6746_v4  ;;  %v6774_v28 = vpop.eup %4479  ;;  %4511 = vpow2.f32 %v3258_v12  ;;  %v3270_v56 = vmul.f32 1.442695, %v3216_v39 }
 0x42a   : > { %v6752_v31 = vpop.xlane.xlu1 %2398  ;;  %v6754_v17 = vpop.xlane.xlu0 %2396  ;;  %7891 = vst [vmem:[#allocation65_spill] sm:$0xff] %v6774_v28 }
 0x42b   : > { %v6784_v47 = vpop.eup %4481  ;;  %4513 = vpow2.f32 %v2498_v0  ;;  %v3272_v0 = vmul.f32 1.442695, %v3217_v63  ;;  %v2441_v57 = vsub.f32 %v7916_v16, %v6752_v31  ;;  %v2440_v42 = vsub.f32 %v7918_v27, %v6754_v17  ;;  %v7920_v31 = vld [vmem:[#allocation84_spill] sm:$0xff]  ;;  %v7922_v17 = vld [vmem:[#allocation85_spill] sm:$0xff] }
 0x42c   : > { %7893 = vst [vmem:[#allocation66_spill] sm:$0xff] %v6784_v47 }
 0x42d   : > { %3320 = vadd.xlane.f32.xlu1 %v6756_v24  ;;  %3318 = vadd.xlane.f32.xlu0 %v6760_v8  ;;  %v6788_v24 = vpop.eup %4483  ;;  %4515 = vpow2.f32 %v2496_v40  ;;  %v2492_v39 = vmul.f32 1.442695, %v2440_v42 }
 0x42e   : > { %v6766_v45 = vpop.xlane.xlu1 %2785  ;;  %v6768_v4 = vpop.xlane.xlu0 %2783  ;;  %7895 = vst [vmem:[#allocation67_spill] sm:$0xff] %v6788_v24 }
 0x42f   : > { %v6798_v46 = vpop.eup %4485  ;;  %4517 = vpow2.f32 %v2885_v22  ;;  %v2494_v22 = vmul.f32 1.442695, %v2441_v57  ;;  %v2828_v63 = vsub.f32 %v7920_v31, %v6766_v45  ;;  %v2827_v27 = vsub.f32 %v7922_v17, %v6768_v4  ;;  %v7924_v45 = vld [vmem:[#allocation88_spill] sm:$0xff]  ;;  %v7926_v4 = vld [vmem:[#allocation89_spill] sm:$0xff] }
 0x430   : > { %7897 = vst [vmem:[#allocation68_spill] sm:$0xff] %v6798_v46 }
 0x431   : > { %2542 = vadd.xlane.f32.xlu1 %v6770_v25  ;;  %2540 = vadd.xlane.f32.xlu0 %v6774_v28  ;;  %v6802_v25 = vpop.eup %4487  ;;  %4519 = vpow2.f32 %v2883_v32  ;;  %v2879_v42 = vmul.f32 1.442695, %v2827_v27 }
 0x432   : > { %v6780_v23 = vpop.xlane.xlu1 %3172  ;;  %v6782_v8 = vpop.xlane.xlu0 %3170  ;;  %7899 = vst [vmem:[#allocation69_spill] sm:$0xff] %v6802_v25 }
 0x433   : > { %v6812_v52 = vpop.eup %4489  ;;  %4521 = vpow2.f32 %v3272_v0  ;;  %v2881_v0 = vmul.f32 1.442695, %v2828_v63  ;;  %v3215_v57 = vsub.f32 %v7924_v45, %v6780_v23  ;;  %v3214_v17 = vsub.f32 %v7926_v4, %v6782_v8  ;;  %v7928_v23 = vld [vmem:[#allocation90_spill] sm:$0xff]  ;;  %v7930_v8 = vld [vmem:[#allocation91_spill] sm:$0xff] }
 0x434   : > { %7901 = vst [vmem:[#allocation72_spill] sm:$0xff] %v6812_v52 }
 0x435   : > { %2929 = vadd.xlane.f32.xlu1 %v6784_v47  ;;  %2927 = vadd.xlane.f32.xlu0 %v6788_v24  ;;  %v6816_v47 = vpop.eup %4491  ;;  %4523 = vpow2.f32 %v3270_v56  ;;  %v3266_v27 = vmul.f32 1.442695, %v3214_v17 }
 0x436   : > { %v6794_v33 = vpop.xlane.xlu1 %2410  ;;  %v6796_v28 = vpop.xlane.xlu0 %2408  ;;  %7903 = vst [vmem:[#allocation73_spill] sm:$0xff] %v6816_v47 }
 0x437   : > { %v6826_v60 = vpop.eup %4493  ;;  %4525 = vpow2.f32 %v2494_v22  ;;  %v3268_v22 = vmul.f32 1.442695, %v3215_v57  ;;  %v2447_v63 = vsub.f32 %v7928_v23, %v6794_v33  ;;  %v2446_v4 = vsub.f32 %v7930_v8, %v6796_v28  ;;  %v7934_v57 = vld [vmem:[#allocation92_spill] sm:$0xff] }
 0x438   : > { %7905 = vst [vmem:[#allocation74_spill] sm:$0xff] %v6826_v60 }
 0x439   : > { %3316 = vadd.xlane.f32.xlu1 %v6798_v46  ;;  %3314 = vadd.xlane.f32.xlu0 %v6802_v25  ;;  %v6830_v46 = vpop.eup %4495  ;;  %4527 = vpow2.f32 %v2492_v39  ;;  %v2506_v33 = vmul.f32 1.442695, %v2447_v63  ;;  %v2504_v8 = vmul.f32 1.442695, %v2446_v4 }
 0x43a   : > { %v6808_v51 = vpop.xlane.xlu1 %2797  ;;  %v6810_v24 = vpop.xlane.xlu0 %2795  ;;  %7907 = vst [vmem:[#allocation75_spill] sm:$0xff] %v6830_v46 }
 0x43b   : > { %v6840_v55 = vpop.eup %4497  ;;  %4529 = vpow2.f32 %v2881_v0  ;;  %v7933_v0 = vld [vmem:[#allocation23_spill] sm:$0xff]  ;;  %v2834_v23 = vsub.f32 %v7934_v57, %v6808_v51  ;;  %v7940_v51 = vld [vmem:[#allocation97_spill] sm:$0xff] }
 0x43c   : > { %7909 = vst [vmem:[#allocation76_spill] sm:$0xff] %v6840_v55 }
 0x43d   : > { %2554 = vadd.xlane.f32.xlu1 %v6812_v52  ;;  %2552 = vadd.xlane.f32.xlu0 %v6816_v47  ;;  %v6844_v52 = vpop.eup %4499  ;;  %4531 = vpow2.f32 %v2879_v42 }
 0x43e   : > { %v6822_v13 = vpop.xlane.xlu1 %3184  ;;  %v6824_v25 = vpop.xlane.xlu0 %3182  ;;  %7911 = vst [vmem:[#allocation77_spill] sm:$0xff] %v6844_v52 }
 0x43f   : > { %v6854_v12 = vpop.eup %4501  ;;  %v3220_v57 = vsub.f32 %v7940_v51, %v6824_v25  ;;  %v7945_v51 = vld [vmem:[#allocation25_spill] sm:$0xff] }
 0x440   : > { %7913 = vst [vmem:[#allocation80_spill] sm:$0xff] %v6854_v12 }
 0x441   : > { %2941 = vadd.xlane.f32.xlu1 %v6826_v60  ;;  %2939 = vadd.xlane.f32.xlu0 %v6830_v46  ;;  %v6858_v60 = vpop.eup %4503 }
 0x442   : > { %v6836_v9 = vpop.xlane.xlu1 %2406  ;;  %v6838_v47 = vpop.xlane.xlu0 %2404  ;;  %7915 = vst [vmem:[#allocation81_spill] sm:$0xff] %v6858_v60 }
 0x443   : > { %v6868_v40 = vpop.eup %4505 }
 0x444   : > { %7917 = vst [vmem:[#allocation82_spill] sm:$0xff] %v6868_v40 }
 0x445   : > { %3328 = vadd.xlane.f32.xlu1 %v6840_v55  ;;  %3326 = vadd.xlane.f32.xlu0 %v6844_v52  ;;  %v6872_v55 = vpop.eup %4507 }
 0x446   : > { %v6850_v5 = vpop.xlane.xlu1 %2793  ;;  %v6852_v46 = vpop.xlane.xlu0 %2791  ;;  %7919 = vst [vmem:[#allocation83_spill] sm:$0xff] %v6872_v55 }
 0x447   : > { %v6882_v32 = vpop.eup %4509 }
 0x448   : > { %7921 = vst [vmem:[#allocation84_spill] sm:$0xff] %v6882_v32 }
 0x449   : > { %2550 = vadd.xlane.f32.xlu1 %v6854_v12  ;;  %2548 = vadd.xlane.f32.xlu0 %v6858_v60  ;;  %v6886_v12 = vpop.eup %4511 }
 0x44a   : > { %v6864_v29 = vpop.xlane.xlu1 %3180  ;;  %v6866_v52 = vpop.xlane.xlu0 %3178  ;;  %7923 = vst [vmem:[#allocation85_spill] sm:$0xff] %v6886_v12 }
 0x44b   : > { %v6896_v56 = vpop.eup %4513 }
 0x44c   : > { %7925 = vst [vmem:[#allocation88_spill] sm:$0xff] %v6896_v56 }
 0x44d   : > { %2937 = vadd.xlane.f32.xlu1 %v6868_v40  ;;  %2935 = vadd.xlane.f32.xlu0 %v6872_v55  ;;  %v6900_v40 = vpop.eup %4515 }
 0x44e   : > { %v6878_v16 = vpop.xlane.xlu1 %2418  ;;  %v6880_v60 = vpop.xlane.xlu0 %2416  ;;  %7927 = vst [vmem:[#allocation89_spill] sm:$0xff] %v6900_v40 }
 0x44f   : > { %v6910_v39 = vpop.eup %4517 }
 0x450   : > { %7929 = vst [vmem:[#allocation90_spill] sm:$0xff] %v6910_v39 }
 0x451   : > { %3324 = vadd.xlane.f32.xlu1 %v6882_v32  ;;  %3322 = vadd.xlane.f32.xlu0 %v6886_v12  ;;  %v6914_v32 = vpop.eup %4519 }
 0x452   : > { %v6892_v31 = vpop.xlane.xlu1 %2805  ;;  %v6894_v55 = vpop.xlane.xlu0 %2803  ;;  %7931 = vst [vmem:[#allocation91_spill] sm:$0xff] %v6914_v32 }
 0x453   : > { %v6926_v28 = vpop.eup %4521 }
 0x455   : > { %2562 = vadd.xlane.f32.xlu1 %v6896_v56  ;;  %2560 = vadd.xlane.f32.xlu0 %v6900_v40  ;;  %v7932_v56 = vld [vmem:[#allocation21_spill] sm:$0xff]  ;;  %v6930_v40 = vpop.eup %4523 }
 0x456   : > { %v6906_v45 = vpop.xlane.xlu1 %3192  ;;  %v6908_v12 = vpop.xlane.xlu0 %3190  ;;  %4533 = vtanh.f32 %v7932_v56  ;;  %v7935_v56 = vld [vmem:[#allocation93_spill] sm:$0xff]  ;;  %7936 = vst [vmem:[#allocation21_spill] sm:$0xff] %v6930_v40 }
 0x457   : > { %4535 = vtanh.f32 %v7933_v0  ;;  %v2833_v0 = vsub.f32 %v7935_v56, %v6810_v24  ;;  %v7941_v24 = vld [vmem:[#allocation98_spill] sm:$0xff]  ;;  %v6946_v10 = vpop.eup %4525 }
 0x458   : > { %4537 = vpow2.f32 %v3268_v22  ;;  %v7938_v22 = vld [vmem:[#allocation96_spill] sm:$0xff]  ;;  %v2445_v4 = vsub.f32 %v7941_v24, %v6836_v9  ;;  %7942 = vst [vmem:[#allocation23_spill] sm:$0xff] %v6946_v10  ;;  %v7947_v9 = vld [vmem:[#allocation26_spill] sm:$0xff]  ;;  %v3278_v24 = vmul.f32 1.442695, %v3220_v57  ;;  %v7950_v57 = vld [vmem:[#allocation101_spill] sm:$0xff] }
 0x459   : > { %2949 = vadd.xlane.f32.xlu1 %v6910_v39  ;;  %2947 = vadd.xlane.f32.xlu0 %v6914_v32  ;;  %4539 = vpow2.f32 %v3266_v27  ;;  %v7937_v39 = vld [vmem:[#allocation22_spill] sm:$0xff]  ;;  %v3221_v63 = vsub.f32 %v7938_v22, %v6822_v13  ;;  %v7939_v32 = vld [vmem:[#allocation24_spill] sm:$0xff]  ;;  %v2893_v27 = vmul.f32 1.442695, %v2834_v23  ;;  %v2891_v13 = vmul.f32 1.442695, %v2833_v0  ;;  %v6950_v22 = vpop.eup %4527 }
 0x45a   : > { %v6922_v42 = vpop.xlane.xlu1 %2414  ;;  %v6924_v17 = vpop.xlane.xlu0 %2412  ;;  %4541 = vtanh.f32 %v7937_v39  ;;  %7944 = vst [vmem:[#allocation92_spill] sm:$0xff] %v6950_v22  ;;  %v7946_v23 = vld [vmem:[#allocation100_spill] sm:$0xff] }
 0x45b   : > { %4543 = vtanh.f32 %v7939_v32  ;;  %v7943_v32 = vld [vmem:[#allocation99_spill] sm:$0xff] }
 0x45c   : > { %4545 = vpow2.f32 %v2506_v33  ;;  %v2444_v25 = vsub.f32 %v7943_v32, %v6838_v47  ;;  %v3280_v33 = vmul.f32 1.442695, %v3221_v63  ;;  %v6962_v32 = vpop.eup %4529 }
 0x45d   : > { %3336 = vadd.xlane.f32.xlu1 %v6926_v28  ;;  %3334 = vadd.xlane.f32.xlu0 %v6930_v40  ;;  %4547 = vpow2.f32 %v2504_v8  ;;  %v2832_v40 = vsub.f32 %v7946_v23, %v6850_v5  ;;  %v2502_v8 = vmul.f32 1.442695, %v2445_v4  ;;  %7948 = vst [vmem:[#allocation93_spill] sm:$0xff] %v6962_v32  ;;  %v7951_v4 = vld [vmem:[#allocation104_spill] sm:$0xff] }
 0x45e   : > { %v6942_v56 = vpop.xlane.xlu1 %2801  ;;  %v6944_v39 = vpop.xlane.xlu0 %2799  ;;  %4549 = vtanh.f32 %v7945_v51  ;;  %v2500_v63 = vmul.f32 1.442695, %v2444_v25 }
 0x45f   : > { %4551 = vtanh.f32 %v7947_v9  ;;  %v6964_v51 = vpop.eup %4531  ;;  %v2889_v5 = vmul.f32 1.442695, %v2832_v40  ;;  %v2831_v9 = vsub.f32 %v7950_v57, %v6852_v46  ;;  %v7952_v57 = vld [vmem:[#allocation105_spill] sm:$0xff] }
 0x460   : > { %4553 = vpow2.f32 %v2893_v27  ;;  %7949 = vst [vmem:[#allocation22_spill] sm:$0xff] %v6964_v51 }
 0x461   : > { %2558 = vadd.xlane.f32.xlu1 %v6946_v10  ;;  %2556 = vadd.xlane.f32.xlu0 %v6950_v22  ;;  %4555 = vpow2.f32 %v2891_v13  ;;  %v3219_v13 = vsub.f32 %v7951_v4, %v6864_v29  ;;  %v2887_v46 = vmul.f32 1.442695, %v2831_v9  ;;  %v7953_v9 = vld [vmem:[#allocation106_spill] sm:$0xff] }
 0x462   : > { %v6958_v0 = vpop.xlane.xlu1 %3188  ;;  %v6960_v47 = vpop.xlane.xlu0 %3186  ;;  %4557 = vpow2.f32 %v3280_v33  ;;  %v2450_v10 = vsub.f32 %v7953_v9, %v6880_v60 }
 0x463   : > { %v6966_v23 = vpop.eup %4533  ;;  %4559 = vpow2.f32 %v3278_v24 }
 0x464   : > { %v6972_v27 = vpop.eup %4535  ;;  %4561 = vpow2.f32 %v2502_v8  ;;  %v3276_v8 = vmul.f32 1.442695, %v3219_v13  ;;  %v2512_v9 = vmul.f32 1.442695, %v2450_v10  ;;  %v2449_v10 = vsub.f32 %v6421_v43, %v6922_v42 }
 0x465   : > { %2945 = vadd.xlane.f32.xlu1 %v6962_v32  ;;  %2943 = vadd.xlane.f32.xlu0 %v6964_v51  ;;  %v6976_v33 = vpop.eup %4537  ;;  %4563 = vpow2.f32 %v2500_v63  ;;  %v3218_v51 = vsub.f32 %v7952_v57, %v6866_v52  ;;  %v2451_v63 = vsub.f32 %v6355_v48, %v6878_v16 }
 0x466   : > { %v2523_v25 = vpop.xlane.xlu1 %2522  ;;  %v2521_v22 = vpop.xlane.xlu0 %2520  ;;  %4565 = vpow2.f32 %v2889_v5  ;;  %v2510_v42 = vmul.f32 1.442695, %v2449_v10 }
 0x467   : > { %v6978_v40 = vpop.eup %4539  ;;  %4567 = vrcp.f32 %v2523_v25  ;;  %v2838_v25 = vsub.f32 %v6375_v30, %v6892_v31  ;;  %v3274_v13 = vmul.f32 1.442695, %v3218_v51  ;;  %v2514_v16 = vmul.f32 1.442695, %v2451_v63  ;;  %v7956_v51 = vld [vmem:[#allocation107_spill] sm:$0xff] }
 0x468   : > { %v6980_v24 = vpop.eup %4541  ;;  %4569 = vrcp.f32 %v2521_v22 }
 0x469   : > { %3332 = vadd.xlane.f32.xlu1 %v6976_v33  ;;  %3330 = vadd.xlane.f32.xlu0 %v6978_v40  ;;  %v6986_v29 = vpop.eup %4543  ;;  %v2901_v31 = vmul.f32 1.442695, %v2838_v25 }
 0x46a   : > { %v2910_v4 = vpop.xlane.xlu1 %2909  ;;  %v2908_v5 = vpop.xlane.xlu0 %2907 }
 0x46b   : > { %v6990_v32 = vpop.eup %4545  ;;  %4571 = vrcp.f32 %v2910_v4 }
 0x46c   : > { %v6994_v52 = vpop.eup %4547  ;;  %4573 = vrcp.f32 %v2908_v5  ;;  %v2837_v5 = vsub.f32 %v7956_v51, %v6894_v55  ;;  %v2448_v51 = vsub.f32 %v6426_v44, %v6924_v17 }
 0x46d   : > { %v6998_v57 = vpop.eup %4549  ;;  %4575 = vpow2.f32 %v2887_v46  ;;  %2570 = vadd.xlane.f32.xlu1 %v6990_v32  ;;  %2568 = vadd.xlane.f32.xlu0 %v6994_v52 }
 0x46e   : > { %v7002_v48 = vpop.eup %4551  ;;  %4577 = vpow2.f32 %v3276_v8  ;;  %v3297_v60 = vpop.xlane.xlu1 %3296  ;;  %v2899_v55 = vmul.f32 1.442695, %v2837_v5  ;;  %v2835_v5 = vsub.f32 %v6446_v41, %v6944_v39  ;;  %v2508_v17 = vmul.f32 1.442695, %v2448_v51 }
 0x46f   : > { %v3295_v22 = vpop.xlane.xlu0 %3294  ;;  %v7004_v4 = vpop.eup %4553  ;;  %4579 = vrcp.f32 %v3297_v60 }
 0x470   : > { %7954 = vst [vmem:[#allocation96_spill] sm:$0xff] %v7004_v4  ;;  %v7006_v30 = vpop.eup %4555  ;;  %4581 = vrcp.f32 %v3295_v22  ;;  %v2895_v51 = vmul.f32 1.442695, %v2835_v5 }
 0x471   : > { %7955 = vst [vmem:[#allocation24_spill] sm:$0xff] %v7006_v30  ;;  %v7008_v46 = vpop.eup %4557  ;;  %4583 = vpow2.f32 %v3274_v13  ;;  %2957 = vadd.xlane.f32.xlu1 %v7004_v4  ;;  %2955 = vadd.xlane.f32.xlu0 %v7006_v30 }
 0x472   : > { %v7014_v8 = vpop.eup %4559  ;;  %4585 = vpow2.f32 %v2514_v16  ;;  %v2519_v63 = vpop.xlane.xlu1 %2518 }
 0x473   : > { %v2517_v60 = vpop.xlane.xlu0 %2516  ;;  %v7018_v25 = vpop.eup %4561  ;;  %4587 = vpow2.f32 %v2512_v9 }
 0x474   : > { %v7020_v22 = vpop.eup %4563  ;;  %4589 = vpow2.f32 %v2901_v31  ;;  %v2836_v31 = vsub.f32 %v6441_v53, %v6942_v56 }
 0x475   : > { %v7022_v13 = vpop.eup %4565  ;;  %4591 = vrcp.f32 %v2519_v63  ;;  %3344 = vadd.xlane.f32.xlu1 %v7008_v46  ;;  %3342 = vadd.xlane.f32.xlu0 %v7014_v8 }
 0x476   : > { %v4568_v43 = vpop.eup %4567  ;;  %4593 = vrcp.f32 %v2517_v60  ;;  %v2906_v16 = vpop.xlane.xlu1 %2905 }
 0x477   : > { %v2904_v30 = vpop.xlane.xlu0 %2903  ;;  %v4570_v9 = vpop.eup %4569  ;;  %4595 = vrcp.f32 %v2906_v16  ;;  %v2647_v63 = vmul.f32 %v4568_v43, %v6480_v62  ;;  %v7957_v43 = vld [vmem:[#allocation20_spill] sm:$0xff] }
 0x478   : > { %v4572_v4 = vpop.eup %4571  ;;  %4597 = vrcp.f32 %v2904_v30  ;;  %v2646_v53 = vmul.f32 %v4570_v9, %v6476_v15  ;;  %v2897_v30 = vmul.f32 1.442695, %v2836_v31  ;;  %vm3482_vm9 = vcmp.lt.s32.totalorder %v7957_v43, 18 }
 0x479   : > { %v4574_v44 = vpop.eup %4573  ;;  %4599 = vpow2.f32 %v2899_v55  ;;  %2566 = vadd.xlane.f32.xlu1 %v7018_v25  ;;  %2564 = vadd.xlane.f32.xlu0 %v7020_v22  ;;  %v3034_v56 = vmul.f32 %v4572_v4, %v6494_v50  ;;  %v3223_v15 = vsub.f32 %v6461_v18, %v6958_v0  ;;  %v2679_v50 = vsel %vm5690_vm5, %v2647_v63, %v6980_v24 }
 0x47a   : > { %v7035_v10 = vpop.eup %4575  ;;  %4601 = vpow2.f32 %v2510_v42  ;;  %v3293_v60 = vpop.xlane.xlu1 %3292  ;;  %v3033_v55 = vmul.f32 %v4574_v44, %v6490_v21  ;;  %v3222_v42 = vsub.f32 %v6466_v49, %v6960_v47  ;;  %v2678_v9 = vsel %vm5690_vm5, %v2646_v53, %v6966_v23 }
 0x47b   : > { %v3291_v41 = vpop.xlane.xlu0 %3290  ;;  %v7039_v39 = vpop.eup %4577  ;;  %4603 = vrcp.f32 %v3293_v60  ;;  %v3066_v18 = vsel %vm5683_vm4, %v3034_v56, %v2679_v50  ;;  %v3225_v56 = vsub.f32 %v6401_v61, %v6906_v45 }
 0x47c   : > { %v4580_v62 = vpop.eup %4579  ;;  %4605 = vrcp.f32 %v3291_v41  ;;  %v3065_v5 = vsel %vm5683_vm4, %v3033_v55, %v2678_v9  ;;  %v3282_v60 = vmul.f32 1.442695, %v3222_v42 }
 0x47d   : > { %v4582_v16 = vpop.eup %4581  ;;  %4607 = vpow2.f32 %v2508_v17  ;;  %v3421_v4 = vmul.f32 %v4580_v62, %v6508_v37  ;;  %2953 = vadd.xlane.f32.xlu1 %v7022_v13  ;;  %2951 = vadd.xlane.f32.xlu0 %v7035_v10  ;;  %v3284_v17 = vmul.f32 1.442695, %v3223_v15  ;;  %v3224_v62 = vsub.f32 %v6406_v3, %v6908_v12 }
 0x47e   : > { %v7052_v21 = vpop.eup %4583  ;;  %v3420_v0 = vmul.f32 %v4582_v16, %v6504_v19  ;;  %v2531_v24 = vpop.xlane.xlu1 %2530  ;;  %4609 = vpow2.f32 %v2897_v30  ;;  %v3288_v45 = vmul.f32 1.442695, %v3225_v56 }
 0x47f   : > { %v2529_v37 = vpop.xlane.xlu0 %2528  ;;  %v7062_v31 = vpop.eup %4585  ;;  %v3453_v49 = vsel %vm5711_vm8, %v3421_v4, %v3066_v18  ;;  %4611 = vpow2.f32 %v2895_v51  ;;  %v3286_v9 = vmul.f32 1.442695, %v3224_v62  ;;  %v7958_v62 = vld [vmem:[#allocation27_spill] sm:$0xff] }
 0x480   : > { %v7068_v47 = vpop.eup %4587  ;;  %v3486_v23 = vsel %vm3482_vm9, %v3453_v49, 0.0  ;;  %v3452_v19 = vsel %vm5711_vm8, %v3420_v0, %v3065_v5  ;;  %4613 = vrcp.f32 %v2531_v24 }
 0x481   : > { %v7074_v44 = vpop.eup %4589  ;;  %3518 = vst [vmem:[%s7076_s22 + $0x18] sm:$0xff] %v3486_v23  ;;  %v3485_v63 = vsel %vm3482_vm9, %v3452_v19, 0.0  ;;  %3340 = vadd.xlane.f32.xlu1 %v7039_v39  ;;  %3338 = vadd.xlane.f32.xlu0 %v7052_v21  ;;  %4615 = vrcp.f32 %v2529_v37 }
 0x482   : > { %v4592_v53 = vpop.eup %4591  ;;  %3517 = vst [vmem:[%s7076_s22 + $0x10] sm:$0xff] %v3485_v63  ;;  %v2918_v41 = vpop.xlane.xlu1 %2917 }
 0x483   : > { %v2916_v30 = vpop.xlane.xlu0 %2915  ;;  %v4594_v55 = vpop.eup %4593  ;;  %4617 = vrcp.f32 %v2918_v41  ;;  %v2645_v15 = vmul.f32 %v4592_v53, %v6522_v38 }
 0x484   : > { %v4596_v51 = vpop.eup %4595  ;;  %4619 = vrcp.f32 %v2916_v30  ;;  %v2644_v50 = vmul.f32 %v4594_v55, %v6518_v26 }
 0x485   : > { %v4598_v16 = vpop.eup %4597  ;;  %4621 = vpow2.f32 %v3284_v17  ;;  %2578 = vadd.xlane.f32.xlu1 %v7062_v31  ;;  %2576 = vadd.xlane.f32.xlu0 %v7068_v47  ;;  %v3032_v4 = vmul.f32 %v4596_v51, %v6536_v59  ;;  %v2677_v24 = vsel %vm5690_vm5, %v2645_v15, %v6986_v29  ;;  %v7959_v15 = vld [vmem:[#allocation28_spill] sm:$0xff] }
 0x486   : > { %v7091_v61 = vpop.eup %4599  ;;  %4623 = vpow2.f32 %v3282_v60  ;;  %v3305_v3 = vpop.xlane.xlu1 %3304  ;;  %v3031_v18 = vmul.f32 %v4598_v16, %v6532_v6  ;;  %v2676_v6 = vsel %vm5690_vm5, %v2644_v50, %v6972_v27 }
 0x487   : > { %v3303_v12 = vpop.xlane.xlu0 %3302  ;;  %v7095_v42 = vpop.eup %4601  ;;  %4625 = vrcp.f32 %v3305_v3  ;;  %v3064_v59 = vsel %vm5683_vm4, %v3032_v4, %v2677_v24 }
 0x488   : > { %v4604_v38 = vpop.eup %4603  ;;  %4627 = vrcp.f32 %v3303_v12  ;;  %v3063_v49 = vsel %vm5683_vm4, %v3031_v18, %v2676_v6 }
 0x489   : > { %v4606_v0 = vpop.eup %4605  ;;  %v3419_v37 = vmul.f32 %v4604_v38, %v6550_v1  ;;  %2965 = vadd.xlane.f32.xlu1 %v7074_v44  ;;  %2963 = vadd.xlane.f32.xlu0 %v7091_v61  ;;  %4629 = vpow2.f32 %v3288_v45 }
 0x48a   : > { %v7104_v26 = vpop.eup %4607  ;;  %v3418_v5 = vmul.f32 %v4606_v0, %v6546_v54  ;;  %v2527_v29 = vpop.xlane.xlu1 %2526  ;;  %4631 = vpow2.f32 %v3286_v9 }
 0x48b   : > { %v2525_v1 = vpop.xlane.xlu0 %2524  ;;  %v3451_v23 = vsel %vm5711_vm8, %v3419_v37, %v3064_v59  ;;  %v7116_v19 = vpop.eup %4609  ;;  %4633 = vrcp.f32 %v2527_v29 }
 0x48c   : > { %v3484_v27 = vsel %vm3482_vm9, %v3451_v23, 0.0  ;;  %v3450_v17 = vsel %vm5711_vm8, %v3418_v5, %v3063_v49  ;;  %v7122_v63 = vpop.eup %4611  ;;  %4635 = vrcp.f32 %v2525_v1 }
 0x48d   : > { %3516 = vst [vmem:[%s7076_s22 + $0x8] sm:$0xff] %v3484_v27  ;;  %v3483_v54 = vsel %vm3482_vm9, %v3450_v17, 0.0  ;;  %2574 = vadd.xlane.f32.xlu1 %v7095_v42  ;;  %2572 = vadd.xlane.f32.xlu0 %v7104_v26  ;;  %v4614_v53 = vpop.eup %4613 }
 0x48e   : > { %3515 = vst [vmem:[%s7076_s22] sm:$0xff] %v3483_v54  ;;  %v2914_v56 = vpop.xlane.xlu1 %2913  ;;  %v4616_v41 = vpop.eup %4615  ;;  %v2651_v51 = vmul.f32 %v4614_v53, %v6560_v11  ;;  %v7960_v54 = vld [vmem:[#allocation29_spill] sm:$0xff]  ;;  %v7961_v53 = vld [vmem:[#allocation31_spill] sm:$0xff] }
 0x48f   : > { %v2912_v60 = vpop.xlane.xlu0 %2911  ;;  %4637 = vrcp.f32 %v2914_v56  ;;  %v2650_v45 = vmul.f32 %v4616_v41, %v6564_v7  ;;  %v7962_v41 = vld [vmem:[#allocation30_spill] sm:$0xff] }
 0x490   : > { %v4618_v30 = vpop.eup %4617  ;;  %4639 = vrcp.f32 %v2912_v60  ;;  %v2683_v38 = vsel %vm5690_vm5, %v2651_v51, %v7002_v48 }
 0x491   : > { %v4620_v55 = vpop.eup %4619  ;;  %4641 = vtanh.f32 %v7958_v62  ;;  %2961 = vadd.xlane.f32.xlu1 %v7116_v19  ;;  %2959 = vadd.xlane.f32.xlu0 %v7122_v63  ;;  %v3038_v50 = vmul.f32 %v4618_v30, %v6574_v36  ;;  %v2682_v7 = vsel %vm5690_vm5, %v2650_v45, %v6998_v57  ;;  %v7963_v30 = vld [vmem:[#allocation32_spill] sm:$0xff]  ;;  %v7964_v62 = vld [vmem:[#allocation35_spill] sm:$0xff] }
 0x492   : > { %v7134_v16 = vpop.eup %4621  ;;  %4643 = vtanh.f32 %v7959_v15  ;;  %v3301_v4 = vpop.xlane.xlu1 %3300  ;;  %v3037_v9 = vmul.f32 %v4620_v55, %v6578_v34 }
 0x493   : > { %v3299_v3 = vpop.xlane.xlu0 %3298  ;;  %v7139_v12 = vpop.eup %4623  ;;  %4645 = vrcp.f32 %v3301_v4  ;;  %v3070_v36 = vsel %vm5683_vm4, %v3038_v50, %v2683_v38  ;;  %v7965_v4 = vld [vmem:[#allocation36_spill] sm:$0xff]  ;;  %v7966_v38 = vld [vmem:[#allocation110_spill] sm:$0xff] }
 0x494   : > { %v4626_v11 = vpop.eup %4625  ;;  %4647 = vrcp.f32 %v3299_v3 }
 0x495   : > { %v4628_v18 = vpop.eup %4627  ;;  %v3425_v0 = vmul.f32 %v4626_v11, %v6588_v2  ;;  %3348 = vadd.xlane.f32.xlu1 %v7134_v16  ;;  %3346 = vadd.xlane.f32.xlu0 %v7139_v12  ;;  %v3069_v2 = vsel %vm5683_vm4, %v3037_v9, %v2682_v7 }
 0x496   : > { %v3424_v34 = vmul.f32 %v4628_v18, %v6592_v58  ;;  %v2539_v24 = vpop.xlane.xlu1 %2538  ;;  %v7154_v6 = vpop.eup %4629 }
 0x497   : > { %v2537_v37 = vpop.xlane.xlu0 %2536  ;;  %v3457_v48 = vsel %vm5711_vm8, %v3425_v0, %v3070_v36  ;;  %v7160_v59 = vpop.eup %4631  ;;  %4649 = vrcp.f32 %v2539_v24 }
 0x498   : > { %v3490_v57 = vsel %vm3482_vm9, %v3457_v48, 0.0  ;;  %v3456_v5 = vsel %vm5711_vm8, %v3424_v34, %v3069_v2  ;;  %v4634_v29 = vpop.eup %4633  ;;  %4651 = vrcp.f32 %v2537_v37  ;;  %v7967_v34 = vld [vmem:[#allocation37_spill] sm:$0xff] }
 0x499   : > { %3522 = vst [vmem:[%s7076_s22 + $0x38] sm:$0xff] %v3490_v57  ;;  %v3489_v58 = vsel %vm3482_vm9, %v3456_v5, 0.0  ;;  %3352 = vadd.xlane.f32.xlu1 %v7154_v6  ;;  %3350 = vadd.xlane.f32.xlu0 %v7160_v59  ;;  %v4636_v23 = vpop.eup %4635  ;;  %v2649_v56 = vmul.f32 %v4634_v29, %v7961_v53  ;;  %v7968_v53 = vld [vmem:[#allocation33_spill] sm:$0xff] }
 0x49a   : > { %3521 = vst [vmem:[%s7076_s22 + $0x30] sm:$0xff] %v3489_v58  ;;  %v2926_v1 = vpop.xlane.xlu1 %2925  ;;  %v2648_v55 = vmul.f32 %v4636_v23, %v7963_v30  ;;  %v7970_v30 = vld [vmem:[#allocation34_spill] sm:$0xff] }
 0x49b   : > { %v2924_v49 = vpop.xlane.xlu0 %2923  ;;  %4653 = vrcp.f32 %v2926_v1 }
 0x49c   : > { %v4638_v27 = vpop.eup %4637  ;;  %4655 = vrcp.f32 %v2924_v49 }
 0x49d   : > { %v4640_v17 = vpop.eup %4639  ;;  %4657 = vtanh.f32 %v7960_v54  ;;  %v3036_v51 = vmul.f32 %v4638_v27, %v7964_v62 }
 0x49e   : > { %v4642_v60 = vpop.eup %4641  ;;  %4659 = vtanh.f32 %v7962_v41  ;;  %v3313_v15 = vpop.xlane.xlu1 %3312  ;;  %v3035_v3 = vmul.f32 %v4640_v17, %v7965_v4 }
 0x49f   : > { %v3311_v45 = vpop.xlane.xlu0 %3310  ;;  %v4644_v50 = vpop.eup %4643  ;;  %4661 = vrcp.f32 %v3313_v15  ;;  %v2680_v7 = vsel %vm5690_vm5, %v2648_v55, %v4642_v60  ;;  %v7971_v55 = vld [vmem:[#allocation41_spill] sm:$0xff] }
 0x4a0   : > { %v4646_v9 = vpop.eup %4645  ;;  %4663 = vrcp.f32 %v3311_v45  ;;  %v2681_v18 = vsel %vm5690_vm5, %v2649_v56, %v4644_v50  ;;  %v3067_v48 = vsel %vm5683_vm4, %v3035_v3, %v2680_v7  ;;  %v7969_v56 = vld [vmem:[#allocation40_spill] sm:$0xff]  ;;  %v7973_v3 = vld [vmem:[#allocation43_spill] sm:$0xff] }
 0x4a1   : > { %v4648_v11 = vpop.eup %4647  ;;  %v3423_v0 = vmul.f32 %v4646_v9, %v7966_v38  ;;  %v3068_v36 = vsel %vm5683_vm4, %v3036_v51, %v2681_v18  ;;  %v7972_v51 = vld [vmem:[#allocation42_spill] sm:$0xff] }
 0x4a2   : > { %v3422_v24 = vmul.f32 %v4648_v11, %v7967_v34  ;;  %v2535_v37 = vpop.xlane.xlu1 %2534 }
 0x4a3   : > { %v2533_v2 = vpop.xlane.xlu0 %2532  ;;  %v3455_v57 = vsel %vm5711_vm8, %v3423_v0, %v3068_v36  ;;  %4665 = vrcp.f32 %v2535_v37  ;;  %v7974_v0 = vld [vmem:[#allocation44_spill] sm:$0xff] }
 0x4a4   : > { %v3488_v5 = vsel %vm3482_vm9, %v3455_v57, 0.0  ;;  %v3454_v58 = vsel %vm5711_vm8, %v3422_v24, %v3067_v48  ;;  %v4650_v1 = vpop.eup %4649  ;;  %4667 = vrcp.f32 %v2533_v2  ;;  %v7975_v24 = vld [vmem:[#allocation45_spill] sm:$0xff] }
 0x4a5   : > { %3520 = vst [vmem:[%s7076_s22 + $0x28] sm:$0xff] %v3488_v5  ;;  %v3487_v29 = vsel %vm3482_vm9, %v3454_v58, 0.0  ;;  %v4652_v27 = vpop.eup %4651  ;;  %v2655_v60 = vmul.f32 %v4650_v1, %v7969_v56  ;;  %v7976_v56 = vld [vmem:[#allocation38_spill] sm:$0xff] }
 0x4a6   : > { %3519 = vst [vmem:[%s7076_s22 + $0x20] sm:$0xff] %v3487_v29  ;;  %v2922_v49 = vpop.xlane.xlu1 %2921  ;;  %v2654_v62 = vmul.f32 %v4652_v27, %v7971_v55  ;;  %v7978_v55 = vld [vmem:[#allocation39_spill] sm:$0xff] }
 0x4a7   : > { %v2920_v23 = vpop.xlane.xlu0 %2919  ;;  %4669 = vrcp.f32 %v2922_v49 }
 0x4a8   : > { %v4654_v17 = vpop.eup %4653  ;;  %4671 = vrcp.f32 %v2920_v23 }
 0x4a9   : > { %v4656_v54 = vpop.eup %4655  ;;  %4673 = vtanh.f32 %v7968_v53  ;;  %v3042_v15 = vmul.f32 %v4654_v17, %v7972_v51 }
 0x4aa   : > { %v4658_v41 = vpop.eup %4657  ;;  %4675 = vtanh.f32 %v7970_v30  ;;  %v3309_v45 = vpop.xlane.xlu1 %3308  ;;  %v3041_v9 = vmul.f32 %v4656_v54, %v7973_v3 }
 0x4ab   : > { %v3307_v50 = vpop.xlane.xlu0 %3306  ;;  %v4660_v4 = vpop.eup %4659  ;;  %4677 = vrcp.f32 %v3309_v45  ;;  %v2686_v36 = vsel %vm5690_vm5, %v2654_v62, %v4658_v41  ;;  %v7979_v62 = vld [vmem:[#allocation49_spill] sm:$0xff] }
 0x4ac   : > { %v4662_v11 = vpop.eup %4661  ;;  %4679 = vrcp.f32 %v3307_v50  ;;  %v2687_v38 = vsel %vm5690_vm5, %v2655_v60, %v4660_v4  ;;  %v3073_v57 = vsel %vm5683_vm4, %v3041_v9, %v2686_v36  ;;  %v7977_v60 = vld [vmem:[#allocation48_spill] sm:$0xff]  ;;  %v7981_v9 = vld [vmem:[#allocation51_spill] sm:$0xff] }
 0x4ad   : > { %v4664_v18 = vpop.eup %4663  ;;  %v3429_v7 = vmul.f32 %v4662_v11, %v7974_v0  ;;  %v3074_v34 = vsel %vm5683_vm4, %v3042_v15, %v2687_v38  ;;  %v7980_v15 = vld [vmem:[#allocation50_spill] sm:$0xff] }
 0x4ae   : > { %v3428_v37 = vmul.f32 %v4664_v18, %v7975_v24  ;;  %v2547_v2 = vpop.xlane.xlu1 %2546 }
 0x4af   : > { %v2545_v48 = vpop.xlane.xlu0 %2544  ;;  %v3461_v5 = vsel %vm5711_vm8, %v3429_v7, %v3074_v34  ;;  %4681 = vrcp.f32 %v2547_v2  ;;  %v7982_v7 = vld [vmem:[#allocation52_spill] sm:$0xff] }
 0x4b0   : > { %v3494_v58 = vsel %vm3482_vm9, %v3461_v5, 0.0  ;;  %v3460_v29 = vsel %vm5711_vm8, %v3428_v37, %v3073_v57  ;;  %v4666_v49 = vpop.eup %4665  ;;  %4683 = vrcp.f32 %v2545_v48  ;;  %v7983_v37 = vld [vmem:[#allocation53_spill] sm:$0xff] }
 0x4b1   : > { %3526 = vst [vmem:[%s7076_s22 + $0x58] sm:$0xff] %v3494_v58  ;;  %v3493_v1 = vsel %vm3482_vm9, %v3460_v29, 0.0  ;;  %v4668_v17 = vpop.eup %4667  ;;  %v2653_v41 = vmul.f32 %v4666_v49, %v7977_v60  ;;  %v7984_v60 = vld [vmem:[#allocation46_spill] sm:$0xff] }
 0x4b2   : > { %3525 = vst [vmem:[%s7076_s22 + $0x50] sm:$0xff] %v3493_v1  ;;  %v2934_v23 = vpop.xlane.xlu1 %2933  ;;  %v2652_v51 = vmul.f32 %v4668_v17, %v7979_v62  ;;  %v7986_v62 = vld [vmem:[#allocation47_spill] sm:$0xff] }
 0x4b3   : > { %v2932_v27 = vpop.xlane.xlu0 %2931  ;;  %4685 = vrcp.f32 %v2934_v23 }
 0x4b4   : > { %v4670_v54 = vpop.eup %4669  ;;  %4687 = vrcp.f32 %v2932_v27 }
 0x4b5   : > { %v4672_v53 = vpop.eup %4671  ;;  %4689 = vtanh.f32 %v7976_v56  ;;  %v3040_v45 = vmul.f32 %v4670_v54, %v7980_v15 }
 0x4b6   : > { %v4674_v30 = vpop.eup %4673  ;;  %4691 = vtanh.f32 %v7978_v55  ;;  %v3321_v50 = vpop.xlane.xlu1 %3320  ;;  %v3039_v11 = vmul.f32 %v4672_v53, %v7981_v9 }
 0x4b7   : > { %v3319_v4 = vpop.xlane.xlu0 %3318  ;;  %v4676_v3 = vpop.eup %4675  ;;  %4693 = vrcp.f32 %v3321_v50  ;;  %v2684_v34 = vsel %vm5690_vm5, %v2652_v51, %v4674_v30  ;;  %v7987_v51 = vld [vmem:[#allocation57_spill] sm:$0xff] }
 0x4b8   : > { %v4678_v18 = vpop.eup %4677  ;;  %4695 = vrcp.f32 %v3319_v4  ;;  %v2685_v0 = vsel %vm5690_vm5, %v2653_v41, %v4676_v3  ;;  %v3071_v5 = vsel %vm5683_vm4, %v3039_v11, %v2684_v34  ;;  %v7985_v41 = vld [vmem:[#allocation56_spill] sm:$0xff]  ;;  %v7989_v11 = vld [vmem:[#allocation59_spill] sm:$0xff] }
 0x4b9   : > { %v4680_v38 = vpop.eup %4679  ;;  %v3427_v36 = vmul.f32 %v4678_v18, %v7982_v7  ;;  %v3072_v24 = vsel %vm5683_vm4, %v3040_v45, %v2685_v0  ;;  %v7988_v45 = vld [vmem:[#allocation58_spill] sm:$0xff] }
 0x4ba   : > { %v3426_v2 = vmul.f32 %v4680_v38, %v7983_v37  ;;  %v2543_v48 = vpop.xlane.xlu1 %2542 }
 0x4bb   : > { %v2541_v57 = vpop.xlane.xlu0 %2540  ;;  %v3459_v58 = vsel %vm5711_vm8, %v3427_v36, %v3072_v24  ;;  %4697 = vrcp.f32 %v2543_v48  ;;  %v7990_v36 = vld [vmem:[#allocation60_spill] sm:$0xff] }
 0x4bc   : > { %v3492_v29 = vsel %vm3482_vm9, %v3459_v58, 0.0  ;;  %v3458_v1 = vsel %vm5711_vm8, %v3426_v2, %v3071_v5  ;;  %v4682_v23 = vpop.eup %4681  ;;  %4699 = vrcp.f32 %v2541_v57  ;;  %v7991_v2 = vld [vmem:[#allocation61_spill] sm:$0xff] }
 0x4bd   : > { %3524 = vst [vmem:[%s7076_s22 + $0x48] sm:$0xff] %v3492_v29  ;;  %v3491_v49 = vsel %vm3482_vm9, %v3458_v1, 0.0  ;;  %v4684_v54 = vpop.eup %4683  ;;  %v2659_v30 = vmul.f32 %v4682_v23, %v7985_v41  ;;  %v7992_v41 = vld [vmem:[#allocation54_spill] sm:$0xff] }
 0x4be   : > { %3523 = vst [vmem:[%s7076_s22 + $0x40] sm:$0xff] %v3491_v49  ;;  %v2930_v27 = vpop.xlane.xlu1 %2929  ;;  %v2658_v15 = vmul.f32 %v4684_v54, %v7987_v51  ;;  %v7994_v51 = vld [vmem:[#allocation55_spill] sm:$0xff] }
 0x4bf   : > { %v2928_v17 = vpop.xlane.xlu0 %2927  ;;  %4701 = vrcp.f32 %v2930_v27 }
 0x4c0   : > { %v4686_v53 = vpop.eup %4685  ;;  %4703 = vrcp.f32 %v2928_v17 }
 0x4c1   : > { %v4688_v56 = vpop.eup %4687  ;;  %4705 = vtanh.f32 %v7984_v60  ;;  %v3046_v50 = vmul.f32 %v4686_v53, %v7988_v45 }
 0x4c2   : > { %v4690_v55 = vpop.eup %4689  ;;  %4707 = vtanh.f32 %v7986_v62  ;;  %v3317_v4 = vpop.xlane.xlu1 %3316  ;;  %v3045_v18 = vmul.f32 %v4688_v56, %v7989_v11 }
 0x4c3   : > { %v3315_v3 = vpop.xlane.xlu0 %3314  ;;  %v4692_v9 = vpop.eup %4691  ;;  %4709 = vrcp.f32 %v3317_v4  ;;  %v2690_v24 = vsel %vm5690_vm5, %v2658_v15, %v4690_v55  ;;  %v7995_v15 = vld [vmem:[#allocation65_spill] sm:$0xff] }
 0x4c4   : > { %v4694_v38 = vpop.eup %4693  ;;  %4711 = vrcp.f32 %v3315_v3  ;;  %v2691_v7 = vsel %vm5690_vm5, %v2659_v30, %v4692_v9  ;;  %v3077_v58 = vsel %vm5683_vm4, %v3045_v18, %v2690_v24  ;;  %v7993_v30 = vld [vmem:[#allocation64_spill] sm:$0xff]  ;;  %v7997_v18 = vld [vmem:[#allocation67_spill] sm:$0xff] }
 0x4c5   : > { %v4696_v0 = vpop.eup %4695  ;;  %v3433_v34 = vmul.f32 %v4694_v38, %v7990_v36  ;;  %v3078_v37 = vsel %vm5683_vm4, %v3046_v50, %v2691_v7  ;;  %v7996_v50 = vld [vmem:[#allocation66_spill] sm:$0xff] }
 0x4c6   : > { %v3432_v48 = vmul.f32 %v4696_v0, %v7991_v2  ;;  %v2555_v57 = vpop.xlane.xlu1 %2554 }
 0x4c7   : > { %v2553_v5 = vpop.xlane.xlu0 %2552  ;;  %v3465_v29 = vsel %vm5711_vm8, %v3433_v34, %v3078_v37  ;;  %4713 = vrcp.f32 %v2555_v57  ;;  %v7998_v34 = vld [vmem:[#allocation68_spill] sm:$0xff] }
 0x4c8   : > { %v3498_v1 = vsel %vm3482_vm9, %v3465_v29, 0.0  ;;  %v3464_v49 = vsel %vm5711_vm8, %v3432_v48, %v3077_v58  ;;  %v4698_v27 = vpop.eup %4697  ;;  %4715 = vrcp.f32 %v2553_v5  ;;  %v7999_v48 = vld [vmem:[#allocation69_spill] sm:$0xff] }
 0x4c9   : > { %3530 = vst [vmem:[%s7076_s22 + $0x78] sm:$0xff] %v3498_v1  ;;  %v3497_v23 = vsel %vm3482_vm9, %v3464_v49, 0.0  ;;  %v4700_v53 = vpop.eup %4699  ;;  %v2657_v55 = vmul.f32 %v4698_v27, %v7993_v30  ;;  %v8000_v30 = vld [vmem:[#allocation62_spill] sm:$0xff] }
 0x4ca   : > { %3529 = vst [vmem:[%s7076_s22 + $0x70] sm:$0xff] %v3497_v23  ;;  %v2942_v17 = vpop.xlane.xlu1 %2941  ;;  %v2656_v45 = vmul.f32 %v4700_v53, %v7995_v15  ;;  %v8002_v15 = vld [vmem:[#allocation63_spill] sm:$0xff] }
 0x4cb   : > { %v2940_v54 = vpop.xlane.xlu0 %2939  ;;  %4717 = vrcp.f32 %v2942_v17 }
 0x4cc   : > { %v4702_v56 = vpop.eup %4701  ;;  %4719 = vrcp.f32 %v2940_v54 }
 0x4cd   : > { %v4704_v60 = vpop.eup %4703  ;;  %4721 = vtanh.f32 %v7992_v41  ;;  %v3044_v4 = vmul.f32 %v4702_v56, %v7996_v50 }
 0x4ce   : > { %v4706_v62 = vpop.eup %4705  ;;  %4723 = vtanh.f32 %v7994_v51  ;;  %v3329_v3 = vpop.xlane.xlu1 %3328  ;;  %v3043_v38 = vmul.f32 %v4704_v60, %v7997_v18 }
 0x4cf   : > { %v3327_v9 = vpop.xlane.xlu0 %3326  ;;  %v4708_v11 = vpop.eup %4707  ;;  %4725 = vrcp.f32 %v3329_v3  ;;  %v2688_v37 = vsel %vm5690_vm5, %v2656_v45, %v4706_v62  ;;  %v8003_v45 = vld [vmem:[#allocation73_spill] sm:$0xff] }
 0x4d0   : > { %v4710_v0 = vpop.eup %4709  ;;  %4727 = vrcp.f32 %v3327_v9  ;;  %v2689_v36 = vsel %vm5690_vm5, %v2657_v55, %v4708_v11  ;;  %v3075_v29 = vsel %vm5683_vm4, %v3043_v38, %v2688_v37  ;;  %v8001_v55 = vld [vmem:[#allocation72_spill] sm:$0xff]  ;;  %v8005_v38 = vld [vmem:[#allocation75_spill] sm:$0xff] }
 0x4d1   : > { %v4712_v7 = vpop.eup %4711  ;;  %v3431_v24 = vmul.f32 %v4710_v0, %v7998_v34  ;;  %v3076_v2 = vsel %vm5683_vm4, %v3044_v4, %v2689_v36  ;;  %v8004_v4 = vld [vmem:[#allocation74_spill] sm:$0xff] }
 0x4d2   : > { %v3430_v57 = vmul.f32 %v4712_v7, %v7999_v48  ;;  %v2551_v5 = vpop.xlane.xlu1 %2550 }
 0x4d3   : > { %v2549_v58 = vpop.xlane.xlu0 %2548  ;;  %v3463_v1 = vsel %vm5711_vm8, %v3431_v24, %v3076_v2  ;;  %4729 = vrcp.f32 %v2551_v5  ;;  %v8006_v24 = vld [vmem:[#allocation76_spill] sm:$0xff] }
 0x4d4   : > { %v3496_v49 = vsel %vm3482_vm9, %v3463_v1, 0.0  ;;  %v3462_v23 = vsel %vm5711_vm8, %v3430_v57, %v3075_v29  ;;  %v4714_v17 = vpop.eup %4713  ;;  %4731 = vrcp.f32 %v2549_v58  ;;  %v8007_v57 = vld [vmem:[#allocation77_spill] sm:$0xff] }
 0x4d5   : > { %3528 = vst [vmem:[%s7076_s22 + $0x68] sm:$0xff] %v3496_v49  ;;  %v3495_v27 = vsel %vm3482_vm9, %v3462_v23, 0.0  ;;  %v4716_v56 = vpop.eup %4715  ;;  %v2663_v62 = vmul.f32 %v4714_v17, %v8001_v55  ;;  %v8008_v55 = vld [vmem:[#allocation70_spill] sm:$0xff] }
 0x4d6   : > { %3527 = vst [vmem:[%s7076_s22 + $0x60] sm:$0xff] %v3495_v27  ;;  %v2938_v54 = vpop.xlane.xlu1 %2937  ;;  %v2662_v50 = vmul.f32 %v4716_v56, %v8003_v45  ;;  %v8010_v45 = vld [vmem:[#allocation71_spill] sm:$0xff] }
 0x4d7   : > { %v2936_v53 = vpop.xlane.xlu0 %2935  ;;  %4733 = vrcp.f32 %v2938_v54 }
 0x4d8   : > { %v4718_v60 = vpop.eup %4717  ;;  %4735 = vrcp.f32 %v2936_v53 }
 0x4d9   : > { %v4720_v41 = vpop.eup %4719  ;;  %4737 = vtanh.f32 %v8000_v30  ;;  %v3050_v3 = vmul.f32 %v4718_v60, %v8004_v4 }
 0x4da   : > { %v4722_v51 = vpop.eup %4721  ;;  %4739 = vtanh.f32 %v8002_v15  ;;  %v3325_v9 = vpop.xlane.xlu1 %3324  ;;  %v3049_v0 = vmul.f32 %v4720_v41, %v8005_v38 }
 0x4db   : > { %v3323_v11 = vpop.xlane.xlu0 %3322  ;;  %v4724_v18 = vpop.eup %4723  ;;  %4741 = vrcp.f32 %v3325_v9  ;;  %v2694_v2 = vsel %vm5690_vm5, %v2662_v50, %v4722_v51  ;;  %v8011_v50 = vld [vmem:[#allocation81_spill] sm:$0xff] }
 0x4dc   : > { %v4726_v7 = vpop.eup %4725  ;;  %4743 = vrcp.f32 %v3323_v11  ;;  %v2695_v34 = vsel %vm5690_vm5, %v2663_v62, %v4724_v18  ;;  %v3081_v1 = vsel %vm5683_vm4, %v3049_v0, %v2694_v2  ;;  %v8009_v62 = vld [vmem:[#allocation80_spill] sm:$0xff]  ;;  %v8013_v0 = vld [vmem:[#allocation83_spill] sm:$0xff] }
 0x4dd   : > { %v4728_v36 = vpop.eup %4727  ;;  %v3437_v37 = vmul.f32 %v4726_v7, %v8006_v24  ;;  %v3082_v48 = vsel %vm5683_vm4, %v3050_v3, %v2695_v34  ;;  %v8012_v3 = vld [vmem:[#allocation82_spill] sm:$0xff] }
 0x4de   : > { %v3436_v5 = vmul.f32 %v4728_v36, %v8007_v57  ;;  %v2563_v58 = vpop.xlane.xlu1 %2562 }
 0x4df   : > { %v2561_v29 = vpop.xlane.xlu0 %2560  ;;  %v3469_v49 = vsel %vm5711_vm8, %v3437_v37, %v3082_v48  ;;  %4745 = vrcp.f32 %v2563_v58  ;;  %v8014_v37 = vld [vmem:[#allocation84_spill] sm:$0xff] }
 0x4e0   : > { %v3502_v23 = vsel %vm3482_vm9, %v3469_v49, 0.0  ;;  %v3468_v27 = vsel %vm5711_vm8, %v3436_v5, %v3081_v1  ;;  %v4730_v54 = vpop.eup %4729  ;;  %4747 = vrcp.f32 %v2561_v29  ;;  %v8015_v5 = vld [vmem:[#allocation85_spill] sm:$0xff] }
 0x4e1   : > { %3534 = vst [vmem:[%s7076_s22 + $0x98] sm:$0xff] %v3502_v23  ;;  %v3501_v17 = vsel %vm3482_vm9, %v3468_v27, 0.0  ;;  %v4732_v60 = vpop.eup %4731  ;;  %v2661_v51 = vmul.f32 %v4730_v54, %v8009_v62  ;;  %v8016_v62 = vld [vmem:[#allocation78_spill] sm:$0xff] }
 0x4e2   : > { %3533 = vst [vmem:[%s7076_s22 + $0x90] sm:$0xff] %v3501_v17  ;;  %v2950_v53 = vpop.xlane.xlu1 %2949  ;;  %v2660_v4 = vmul.f32 %v4732_v60, %v8011_v50  ;;  %v8018_v50 = vld [vmem:[#allocation79_spill] sm:$0xff] }
 0x4e3   : > { %v2948_v56 = vpop.xlane.xlu0 %2947  ;;  %4749 = vrcp.f32 %v2950_v53 }
 0x4e4   : > { %v4734_v41 = vpop.eup %4733  ;;  %4751 = vrcp.f32 %v2948_v56 }
 0x4e5   : > { %v4736_v30 = vpop.eup %4735  ;;  %4753 = vtanh.f32 %v8008_v55  ;;  %v3048_v9 = vmul.f32 %v4734_v41, %v8012_v3 }
 0x4e6   : > { %v4738_v15 = vpop.eup %4737  ;;  %4755 = vtanh.f32 %v8010_v45  ;;  %v3337_v11 = vpop.xlane.xlu1 %3336  ;;  %v3047_v7 = vmul.f32 %v4736_v30, %v8013_v0 }
 0x4e7   : > { %v3335_v18 = vpop.xlane.xlu0 %3334  ;;  %v4740_v38 = vpop.eup %4739  ;;  %4757 = vrcp.f32 %v3337_v11  ;;  %v2692_v48 = vsel %vm5690_vm5, %v2660_v4, %v4738_v15  ;;  %v8019_v4 = vld [vmem:[#allocation89_spill] sm:$0xff] }
 0x4e8   : > { %v4742_v36 = vpop.eup %4741  ;;  %4759 = vrcp.f32 %v3335_v18  ;;  %v2693_v24 = vsel %vm5690_vm5, %v2661_v51, %v4740_v38  ;;  %v3079_v49 = vsel %vm5683_vm4, %v3047_v7, %v2692_v48  ;;  %v8017_v51 = vld [vmem:[#allocation88_spill] sm:$0xff]  ;;  %v8021_v7 = vld [vmem:[#allocation91_spill] sm:$0xff] }
 0x4e9   : > { %v4744_v34 = vpop.eup %4743  ;;  %v3435_v2 = vmul.f32 %v4742_v36, %v8014_v37  ;;  %v3080_v57 = vsel %vm5683_vm4, %v3048_v9, %v2693_v24  ;;  %v8020_v9 = vld [vmem:[#allocation90_spill] sm:$0xff] }
 0x4ea   : > { %v3434_v58 = vmul.f32 %v4744_v34, %v8015_v5  ;;  %v2559_v29 = vpop.xlane.xlu1 %2558  ;;  %v8022_v5 = vld [vmem:[#allocation21_spill] sm:$0xff] }
 0x4eb   : > { %v2557_v1 = vpop.xlane.xlu0 %2556  ;;  %v3467_v23 = vsel %vm5711_vm8, %v3435_v2, %v3080_v57  ;;  %4761 = vrcp.f32 %v2559_v29 }
 0x4ec   : > { %v3500_v27 = vsel %vm3482_vm9, %v3467_v23, 0.0  ;;  %v3466_v17 = vsel %vm5711_vm8, %v3434_v58, %v3079_v49  ;;  %v4746_v53 = vpop.eup %4745  ;;  %4763 = vrcp.f32 %v2557_v1 }
 0x4ed   : > { %3532 = vst [vmem:[%s7076_s22 + $0x88] sm:$0xff] %v3500_v27  ;;  %v3499_v54 = vsel %vm3482_vm9, %v3466_v17, 0.0  ;;  %v4748_v41 = vpop.eup %4747  ;;  %v2667_v15 = vmul.f32 %v4746_v53, %v8017_v51 }
 0x4ee   : > { %3531 = vst [vmem:[%s7076_s22 + $0x80] sm:$0xff] %v3499_v54  ;;  %v2946_v56 = vpop.xlane.xlu1 %2945  ;;  %v2666_v3 = vmul.f32 %v4748_v41, %v8019_v4 }
 0x4ef   : > { %v2944_v60 = vpop.xlane.xlu0 %2943  ;;  %4765 = vrcp.f32 %v2946_v56 }
 0x4f0   : > { %v4750_v30 = vpop.eup %4749  ;;  %4767 = vrcp.f32 %v2944_v60 }
 0x4f1   : > { %v4752_v55 = vpop.eup %4751  ;;  %4769 = vtanh.f32 %v8016_v62  ;;  %v3054_v11 = vmul.f32 %v4750_v30, %v8020_v9  ;;  %v8024_v62 = vld [vmem:[#allocation23_spill] sm:$0xff] }
 0x4f2   : > { %v4754_v45 = vpop.eup %4753  ;;  %4771 = vtanh.f32 %v8018_v50  ;;  %v3333_v18 = vpop.xlane.xlu1 %3332  ;;  %v3053_v36 = vmul.f32 %v4752_v55, %v8021_v7  ;;  %v8023_v55 = vld [vmem:[#allocation86_spill] sm:$0xff]  ;;  %v8026_v50 = vld [vmem:[#allocation92_spill] sm:$0xff] }
 0x4f3   : > { %v3331_v38 = vpop.xlane.xlu0 %3330  ;;  %v4756_v0 = vpop.eup %4755  ;;  %4773 = vrcp.f32 %v3333_v18  ;;  %v2698_v48 = vsel %vm5690_vm5, %v2666_v3, %v4754_v45  ;;  %v8025_v45 = vld [vmem:[#allocation87_spill] sm:$0xff]  ;;  %v8027_v3 = vld [vmem:[#allocation93_spill] sm:$0xff] }
 0x4f4   : > { %v4758_v34 = vpop.eup %4757  ;;  %4775 = vrcp.f32 %v3331_v38  ;;  %v2699_v37 = vsel %vm5690_vm5, %v2667_v15, %v4756_v0  ;;  %v3085_v49 = vsel %vm5683_vm4, %v3053_v36, %v2698_v48  ;;  %v8028_v0 = vld [vmem:[#allocation22_spill] sm:$0xff] }
 0x4f5   : > { %v4760_v24 = vpop.eup %4759  ;;  %v3441_v2 = vmul.f32 %v4758_v34, %v6926_v28  ;;  %v3086_v57 = vsel %vm5683_vm4, %v3054_v11, %v2699_v37 }
 0x4f6   : > { %v3440_v58 = vmul.f32 %v4760_v24, %v8022_v5  ;;  %v2571_v29 = vpop.xlane.xlu1 %2570 }
 0x4f7   : > { %v2569_v1 = vpop.xlane.xlu0 %2568  ;;  %v3473_v23 = vsel %vm5711_vm8, %v3441_v2, %v3086_v57  ;;  %4777 = vrcp.f32 %v2571_v29 }
 0x4f8   : > { %v3506_v27 = vsel %vm3482_vm9, %v3473_v23, 0.0  ;;  %v3472_v28 = vsel %vm5711_vm8, %v3440_v58, %v3085_v49  ;;  %v4762_v54 = vpop.eup %4761  ;;  %4779 = vrcp.f32 %v2569_v1 }
 0x4f9   : > { %3538 = vst [vmem:[%s7076_s22 + $0xb8] sm:$0xff] %v3506_v27  ;;  %v3505_v17 = vsel %vm3482_vm9, %v3472_v28, 0.0  ;;  %v4764_v60 = vpop.eup %4763  ;;  %v2665_v51 = vmul.f32 %v4762_v54, %v8024_v62  ;;  %v8031_v62 = vld [vmem:[#allocation96_spill] sm:$0xff] }
 0x4fa   : > { %3537 = vst [vmem:[%s7076_s22 + $0xb0] sm:$0xff] %v3505_v17  ;;  %v2958_v53 = vpop.xlane.xlu1 %2957  ;;  %v2664_v4 = vmul.f32 %v4764_v60, %v8026_v50 }
 0x4fb   : > { %v2956_v56 = vpop.xlane.xlu0 %2955  ;;  %4781 = vrcp.f32 %v2958_v53 }
 0x4fc   : > { %v4766_v41 = vpop.eup %4765  ;;  %4783 = vrcp.f32 %v2956_v56  ;;  %v8029_v56 = vld [vmem:[#allocation94_spill] sm:$0xff] }
 0x4fd   : > { %v4768_v30 = vpop.eup %4767  ;;  %4785 = vtanh.f32 %v8023_v55  ;;  %v3052_v9 = vmul.f32 %v4766_v41, %v8027_v3 }
 0x4fe   : > { %v4770_v15 = vpop.eup %4769  ;;  %4787 = vtanh.f32 %v8025_v45  ;;  %v3345_v11 = vpop.xlane.xlu1 %3344  ;;  %v3051_v7 = vmul.f32 %v4768_v30, %v8028_v0  ;;  %v8030_v30 = vld [vmem:[#allocation95_spill] sm:$0xff] }
 0x4ff   : > { %v3343_v18 = vpop.xlane.xlu0 %3342  ;;  %v4772_v38 = vpop.eup %4771  ;;  %4789 = vrcp.f32 %v3345_v11  ;;  %v2696_v2 = vsel %vm5690_vm5, %v2664_v4, %v4770_v15  ;;  %v8032_v4 = vld [vmem:[#allocation24_spill] sm:$0xff] }
 0x500   : > { %v4774_v36 = vpop.eup %4773  ;;  %4791 = vrcp.f32 %v3343_v18  ;;  %v2697_v24 = vsel %vm5690_vm5, %v2665_v51, %v4772_v38  ;;  %v3083_v29 = vsel %vm5683_vm4, %v3051_v7, %v2696_v2 }
 0x501   : > { %v4776_v34 = vpop.eup %4775  ;;  %v3439_v37 = vmul.f32 %v4774_v36, %v6976_v33  ;;  %v3084_v48 = vsel %vm5683_vm4, %v3052_v9, %v2697_v24 }
 0x502   : > { %v3438_v57 = vmul.f32 %v4776_v34, %v6978_v40  ;;  %v2567_v5 = vpop.xlane.xlu1 %2566 }
 0x503   : > { %v2565_v58 = vpop.xlane.xlu0 %2564  ;;  %v3471_v1 = vsel %vm5711_vm8, %v3439_v37, %v3084_v48  ;;  %4793 = vrcp.f32 %v2567_v5 }
 0x504   : > { %v3504_v49 = vsel %vm3482_vm9, %v3471_v1, 0.0  ;;  %v3470_v33 = vsel %vm5711_vm8, %v3438_v57, %v3083_v29  ;;  %v4778_v40 = vpop.eup %4777  ;;  %4795 = vrcp.f32 %v2565_v58  ;;  %v8033_v1 = vld [vmem:[#allocation108_spill] sm:$0xff] }
 0x505   : > { %3536 = vst [vmem:[%s7076_s22 + $0xa8] sm:$0xff] %v3504_v49  ;;  %v3503_v23 = vsel %vm3482_vm9, %v3470_v33, 0.0  ;;  %v4780_v17 = vpop.eup %4779  ;;  %v2671_v60 = vmul.f32 %v4778_v40, %v6990_v32 }
 0x506   : > { %3535 = vst [vmem:[%s7076_s22 + $0xa0] sm:$0xff] %v3503_v23  ;;  %v2954_v27 = vpop.xlane.xlu1 %2953  ;;  %v2670_v55 = vmul.f32 %v4780_v17, %v6994_v52  ;;  %v8034_v23 = vld [vmem:[#allocation109_spill] sm:$0xff] }
 0x507   : > { %v2952_v28 = vpop.xlane.xlu0 %2951  ;;  %4797 = vrcp.f32 %v2954_v27 }
 0x508   : > { %v4782_v54 = vpop.eup %4781  ;;  %4799 = vrcp.f32 %v2952_v28 }
 0x509   : > { %v4784_v53 = vpop.eup %4783  ;;  %4801 = vtanh.f32 %v8029_v56  ;;  %v3058_v51 = vmul.f32 %v4782_v54, %v8031_v62 }
 0x50a   : > { %v4786_v41 = vpop.eup %4785  ;;  %4803 = vtanh.f32 %v8030_v30  ;;  %v3341_v15 = vpop.xlane.xlu1 %3340  ;;  %v3057_v3 = vmul.f32 %v4784_v53, %v8032_v4  ;;  %v8035_v4 = vld [vmem:[#allocation102_spill] sm:$0xff] }
 0x50b   : > { %v3339_v45 = vpop.xlane.xlu0 %3338  ;;  %v4788_v50 = vpop.eup %4787  ;;  %4805 = vrcp.f32 %v3341_v15  ;;  %v2702_v52 = vsel %vm5690_vm5, %v2670_v55, %v4786_v41 }
 0x50c   : > { %v4790_v9 = vpop.eup %4789  ;;  %4807 = vrcp.f32 %v3339_v45  ;;  %v2703_v32 = vsel %vm5690_vm5, %v2671_v60, %v4788_v50  ;;  %v3089_v34 = vsel %vm5683_vm4, %v3057_v3, %v2702_v52 }
 0x50d   : > { %v4792_v11 = vpop.eup %4791  ;;  %v3445_v18 = vmul.f32 %v4790_v9, %v7008_v46  ;;  %v3090_v38 = vsel %vm5683_vm4, %v3058_v51, %v2703_v32  ;;  %4809 = vtanh.f32 %v8033_v1  ;;  %v8036_v9 = vld [vmem:[#allocation103_spill] sm:$0xff] }
 0x50e   : > { %v3444_v0 = vmul.f32 %v4792_v11, %v7014_v8  ;;  %v2579_v7 = vpop.xlane.xlu1 %2578  ;;  %4811 = vtanh.f32 %v8034_v23 }
 0x50f   : > { %v2577_v36 = vpop.xlane.xlu0 %2576  ;;  %v3477_v24 = vsel %vm5711_vm8, %v3445_v18, %v3090_v38  ;;  %4813 = vrcp.f32 %v2579_v7 }
 0x510   : > { %v3510_v37 = vsel %vm3482_vm9, %v3477_v24, 0.0  ;;  %v3476_v46 = vsel %vm5711_vm8, %v3444_v0, %v3089_v34  ;;  %v4794_v48 = vpop.eup %4793  ;;  %4815 = vrcp.f32 %v2577_v36 }
 0x511   : > { %3542 = vst [vmem:[%s7076_s22 + $0xd8] sm:$0xff] %v3510_v37  ;;  %v3509_v2 = vsel %vm3482_vm9, %v3476_v46, 0.0  ;;  %v4796_v5 = vpop.eup %4795  ;;  %v2669_v49 = vmul.f32 %v4794_v48, %v7018_v25 }
 0x512   : > { %3541 = vst [vmem:[%s7076_s22 + $0xd0] sm:$0xff] %v3509_v2  ;;  %v2966_v8 = vpop.xlane.xlu1 %2965  ;;  %v2668_v40 = vmul.f32 %v4796_v5, %v7020_v22 }
 0x513   : > { %v2964_v57 = vpop.xlane.xlu0 %2963 }
 0x514   : > { %v4798_v58 = vpop.eup %4797 }
 0x515   : > { %v4800_v29 = vpop.eup %4799  ;;  %v3056_v27 = vmul.f32 %v4798_v58, %v7022_v13 }
 0x516   : > { %v4802_v33 = vpop.eup %4801  ;;  %v2575_v28 = vpop.xlane.xlu1 %2574  ;;  %v3055_v53 = vmul.f32 %v4800_v29, %v7035_v10 }
 0x517   : > { %v2573_v17 = vpop.xlane.xlu0 %2572  ;;  %v4804_v54 = vpop.eup %4803  ;;  %4817 = vrcp.f32 %v2575_v28  ;;  %v2700_v22 = vsel %vm5690_vm5, %v2668_v40, %v4802_v33 }
 0x518   : > { %v4806_v56 = vpop.eup %4805  ;;  %v2701_v25 = vsel %vm5690_vm5, %v2669_v49, %v4804_v54  ;;  %4819 = vrcp.f32 %v2573_v17  ;;  %v3087_v62 = vsel %vm5683_vm4, %v3055_v53, %v2700_v22 }
 0x519   : > { %v4808_v60 = vpop.eup %4807  ;;  %v3443_v41 = vmul.f32 %v4806_v56, %v7039_v39  ;;  %v3088_v13 = vsel %vm5683_vm4, %v3056_v27, %v2701_v25 }
 0x51a   : > { %v3442_v10 = vmul.f32 %v4808_v60, %v7052_v21  ;;  %v2962_v30 = vpop.xlane.xlu1 %2961  ;;  %v4810_v3 = vpop.eup %4809 }
 0x51b   : > { %v2960_v55 = vpop.xlane.xlu0 %2959  ;;  %v3475_v51 = vsel %vm5711_vm8, %v3443_v41, %v3088_v13  ;;  %4821 = vrcp.f32 %v2962_v30  ;;  %v4812_v18 = vpop.eup %4811 }
 0x51c   : > { %v3508_v39 = vsel %vm3482_vm9, %v3475_v51, 0.0  ;;  %v3474_v15 = vsel %vm5711_vm8, %v3442_v10, %v3087_v62  ;;  %4823 = vrcp.f32 %v2960_v55  ;;  %v4814_v52 = vpop.eup %4813 }
 0x51d   : > { %3540 = vst [vmem:[%s7076_s22 + $0xc8] sm:$0xff] %v3508_v39  ;;  %v3507_v21 = vsel %vm3482_vm9, %v3474_v15, 0.0  ;;  %4825 = vrcp.f32 %v2966_v8  ;;  %v4816_v38 = vpop.eup %4815  ;;  %v2675_v58 = vmul.f32 %v4814_v52, %v7062_v31 }
 0x51e   : > { %3539 = vst [vmem:[%s7076_s22 + $0xc0] sm:$0xff] %v3507_v21  ;;  %4827 = vrcp.f32 %v2964_v57  ;;  %v3349_v45 = vpop.xlane.xlu1 %3348  ;;  %v2674_v29 = vmul.f32 %v4816_v38, %v7068_v47 }
 0x51f   : > { %v3347_v50 = vpop.xlane.xlu0 %3346  ;;  %4829 = vrcp.f32 %v3349_v45 }
 0x520   : > { %4831 = vrcp.f32 %v3347_v50 }
 0x521   : > { %4833 = vtanh.f32 %v8035_v4 }
 0x522   : > { %4835 = vtanh.f32 %v8036_v9  ;;  %v3353_v11 = vpop.xlane.xlu1 %3352 }
 0x523   : > { %v3351_v32 = vpop.xlane.xlu0 %3350  ;;  %4837 = vrcp.f32 %v3353_v11 }
 0x524   : > { %4839 = vrcp.f32 %v3351_v32  ;;  %v4818_v0 = vpop.eup %4817 }
 0x525   : > { %v4820_v7 = vpop.eup %4819  ;;  %v2673_v24 = vmul.f32 %v4818_v0, %v7095_v42 }
 0x526   : > { %v2672_v46 = vmul.f32 %v4820_v7, %v7104_v26 }
 0x527   : > { %v2705_v1 = vsel %vm5690_vm5, %v2673_v24, %v4812_v18 }
 0x528   : > { %v4822_v36 = vpop.eup %4821 }
 0x529   : > { %v4824_v34 = vpop.eup %4823  ;;  %v3060_v2 = vmul.f32 %v4822_v36, %v7116_v19  ;;  %v2704_v19 = vsel %vm5690_vm5, %v2672_v46, %v4810_v3 }
 0x52a   : > { %v4826_v37 = vpop.eup %4825  ;;  %v3059_v8 = vmul.f32 %v4824_v34, %v7122_v63 }
 0x52b   : > { %v4828_v48 = vpop.eup %4827  ;;  %v3062_v26 = vmul.f32 %v4826_v37, %v7074_v44  ;;  %v3092_v63 = vsel %vm5683_vm4, %v3060_v2, %v2705_v1 }
 0x52c   : > { %v4830_v57 = vpop.eup %4829  ;;  %v3061_v47 = vmul.f32 %v4828_v48, %v7091_v61  ;;  %v3091_v23 = vsel %vm5683_vm4, %v3059_v8, %v2704_v19 }
 0x52d   : > { %v4832_v5 = vpop.eup %4831  ;;  %v3447_v42 = vmul.f32 %v4830_v57, %v7134_v16 }
 0x52e   : > { %v4834_v49 = vpop.eup %4833  ;;  %v3446_v31 = vmul.f32 %v4832_v5, %v7139_v12 }
 0x52f   : > { %v4836_v33 = vpop.eup %4835  ;;  %v3479_v16 = vsel %vm5711_vm8, %v3447_v42, %v3092_v63  ;;  %v2706_v54 = vsel %vm5690_vm5, %v2674_v29, %v4834_v49 }
 0x530   : > { %v4838_v40 = vpop.eup %4837  ;;  %v3512_v44 = vsel %vm3482_vm9, %v3479_v16, 0.0  ;;  %v3478_v27 = vsel %vm5711_vm8, %v3446_v31, %v3091_v23  ;;  %v2707_v61 = vsel %vm5690_vm5, %v2675_v58, %v4836_v33  ;;  %v3093_v60 = vsel %vm5683_vm4, %v3061_v47, %v2706_v54 }
 0x531   : > { %v4840_v12 = vpop.eup %4839  ;;  %3544 = vst [vmem:[%s7076_s22 + $0xe8] sm:$0xff] %v3512_v44  ;;  %v3511_v28 = vsel %vm3482_vm9, %v3478_v27, 0.0  ;;  %v3449_v17 = vmul.f32 %v4838_v40, %v7154_v6  ;;  %v3094_v53 = vsel %vm5683_vm4, %v3062_v26, %v2707_v61 }
 0x532   : > { %3543 = vst [vmem:[%s7076_s22 + $0xe0] sm:$0xff] %v3511_v28  ;;  %v3448_v56 = vmul.f32 %v4840_v12, %v7160_v59 }
 0x533   : > { %v3481_v25 = vsel %vm5711_vm8, %v3449_v17, %v3094_v53 }
 0x534   : > { %v3514_v20 = vsel %vm3482_vm9, %v3481_v25, 0.0  ;;  %v3480_v14 = vsel %vm5711_vm8, %v3448_v56, %v3093_v60 }
 0x535   : > { %3546 = vst [vmem:[%s7076_s22 + $0xf8] sm:$0xff] %v3514_v20  ;;  %v3513_v6 = vsel %vm3482_vm9, %v3480_v14, 0.0 }
 0x536   : > { %3545 = vst [vmem:[%s7076_s22 + $0xf0] sm:$0xff] %v3513_v6 }
 0x537   : > { %5038 = shalt.err (!%p5035_p3)
}
 0x538   : > { %s5039_s28 = scalar_lea.hbm %s7505_s6, 4096  ;;  %s5043_s24 = scalar_lea.hbm %s7568_s10, 8192 }
 0x539   : > { %p5040_p4 = scmp.ne.s32.totalorder %s7505_s6, %s5039_s28  ;;  %p5044_p0 = scmp.lt.s32.totalorder %s7505_s6, %s7568_s10 }
 0x53a   : > { %p5045_p7 = scmp.lt.s32.totalorder %s5043_s24, %s5039_s28 }
 0x53b   : > { %p5041_p6 = pnand %p5040_p4, %p8037_p8 }
 0x53c   : > { %p5046_p2 = por %p5045_p7, %p5044_p0 }
 0x53d   : > { %p5042_p12 = pneg %p5041_p6 }
 0x53f   : > { %p5047_p9 = pnand %p5046_p2, %p5042_p12 }
 0x541   : > { %5050 = shalt.err (!%p5047_p9)
}
 0x542   : > { %s5113_s19 = smov 128   ;;  %s5114_s25 = smov 8  }
 0x543   : > { %4244 = dma.vmem_to_hbm [thread:$0]  (%p8037_p8), %s7507_s4, 4096, %s7505_s6, %s3548_s21, %s5113_s19, %s5113_s19, %s5114_s25  }
 0x544 PF: > { %s3576_s23 = sand.u32 1, %s5089_s13   ;;  %p8038_p10 = scmp.ne.s32.totalorder %s7733_s11, 0 }
 0x545   : > { %p8039_p11 = scmp.ge.s32.totalorder %s5101_s16, 2  ;;  %s3577_s1 = scalar_lea.sflag [#allocation4], %s3576_s23 }
 0x547   : > { %p4270_p13 = pnand %p8039_p11, %p8038_p10 }
 0x549   : > { %p4271_p5 = pneg %p4270_p13 }
 0x54b   : > { %5084 = dma.done.wait (%p4271_p5), %s3577_s1, 4096  }
 0x54c   : > { %5086 = vsyncadd (%p4271_p5), %s3577_s1, 4294963200  ;;  %p26_p1 = scmp.ge.s32.totalorder %s5291_s26, 4   ;;  %s8040_s13 = smov %s5093_s14 }
 0x54d   : > { %s8041_s14 = smov %s5097_s15  ;;  %s8042_s15 = smov %s5302_s18 }
 0x54e   : > { %s8043_s16 = smov %s5291_s26  ;;  %28 = sbr.rel (!%p26_p1) target bundleno = 13 (0xd), region = 129 }
 0x553   :  { %3582 = vsyncpa [#allocation3], 1 }
 0x554   :  { %3584 = vsyncpa [#allocation3 + $0x1], 1 }
 0x555   :  { %3585 = vsyncpa [#allocation6], 1 }
 0x556   :  { %3586 = vsyncpa [#allocation9], 1 }
 0x557   :  { %3587 = vsyncpa [#allocation12], 1 }
 0x558   :  { %3588 = vsyncpa [#allocation4], 1 }
 0x559   :  { %3590 = vsyncpa [#allocation4 + $0x1], 1 }

</bundles_post_ra>
